<compile_context>
chip_gen: v7x
topology: tpu7x:2x2x1
jax: 0.10.0
libtpu: 0.0.40
codegen_flags: <defaults>
</compile_context>

<pallas_src>
import functools

import jax
import jax.numpy as jnp
from jax.experimental import pallas as pl
from jax.experimental.pallas import tpu as pltpu


# ----------------------------------------------------------------------------
# In-kernel helper: 3x3 "same" conv via 9 accumulated tap matmuls
# ----------------------------------------------------------------------------
def _conv3x3_taps(src_ref, w_tap_fn, b, hh, ww, cin):
    """src_ref: (b, hh+2, ww+2, cin) f32 ref (zero halo, interior = conv input).
    w_tap_fn(t) -> (cin, cout) bf16 weight for tap t = 3*dy + dx.
    Returns (b*hh*ww, cout) f32 accumulator."""
    m = b * hh * ww
    acc = None
    for dy in range(3):
        for dx in range(3):
            patch = src_ref[:, dy:dy + hh, dx:dx + ww, :]
            patch = patch.reshape(m, cin).astype(jnp.bfloat16)
            part = jnp.dot(patch, w_tap_fn(3 * dy + dx),
                           preferred_element_type=jnp.float32)
            acc = part if acc is None else acc + part
    return acc


# ----------------------------------------------------------------------------
# Fused ConvSequence kernel (B samples per grid step, fully VMEM resident)
# ----------------------------------------------------------------------------
def _conv_sequence_kernel(xpad_ref, conv_w_ref, conv_b_ref, rb_cw_ref,
                          rb_l1w_ref, rb_l1b_ref, rb_l2w_ref, rb_l2b_ref,
                          o_ref,
                          mp_w, mp_h, pad_r,
                          *, B, H, W, Cin, C, Hp, Wp):
    f32 = jnp.float32

    # Halo init ONCE per grid step (interiors are always fully overwritten before
    # use, so only the halos logically need this).  Scratch is deliberately NOT
    # assumed to persist across steps: the batch axis is "parallel", so each
    # TensorCore owns its own scratch copy.
    mp_w[...] = jnp.full(mp_w.shape, -jnp.inf, f32)
    mp_h[...] = jnp.full(mp_h.shape, -jnp.inf, f32)
    pad_r[...] = jnp.zeros(pad_r.shape, f32)

    # ---- Stage 1: conv3x3 (Cin -> C) + bias (input arrives pre-padded) -------
    y = _conv3x3_taps(xpad_ref, lambda t: conv_w_ref[t], B, H, W, Cin)
    y = y + conv_b_ref[...]                                   # (B*H*W, C) f32

    # ---- Stage 2: max_pool2d(kernel=3, stride=2, pad=1), separable -----------
    mp_w[:, :, 1:W + 1, :] = y.reshape(B, H, W, C)
    cmax = mp_w[:, :, pl.ds(0, Wp, stride=2), :]
    cmax = jnp.maximum(cmax, mp_w[:, :, pl.ds(1, Wp, stride=2), :])
    cmax = jnp.maximum(cmax, mp_w[:, :, pl.ds(2, Wp, stride=2), :])
    mp_h[:, 1:H + 1, :, :] = cmax
    xcur = mp_h[:, pl.ds(0, Hp, stride=2), :, :]
    xcur = jnp.maximum(xcur, mp_h[:, pl.ds(1, Hp, stride=2), :, :])
    xcur = jnp.maximum(xcur, mp_h[:, pl.ds(2, Hp, stride=2), :, :])  # (B,Hp,Wp,C)

    # ---- Stages 3 & 4: two ResBlockSqEx (conv-conv-SqEx-residual) ------------
    inv_hw = 1.0 / float(Hp * Wp)
    for blk in range(2):
        # inplace-ReLU quirk: relu_x is both the conv1 input and the residual.
        relu_x = jnp.maximum(xcur, 0.0)                       # (B, Hp, Wp, C) f32

        pad_r[:, 1:Hp + 1, 1:Wp + 1, :] = relu_x
        y1 = _conv3x3_taps(pad_r, lambda t, _b=blk: rb_cw_ref[_b, 0, t],
                           B, Hp, Wp, C)
        y1 = jnp.maximum(y1, 0.0)                             # (B*Hp*Wp, C)

        pad_r[:, 1:Hp + 1, 1:Wp + 1, :] = y1.reshape(B, Hp, Wp, C)
        y2 = _conv3x3_taps(pad_r, lambda t, _b=blk: rb_cw_ref[_b, 1, t],
                           B, Hp, Wp, C)                      # (B*Hp*Wp, C)

        # Squeeze-Excite gate: global mean -> linear -> relu -> linear -> sigmoid.
        pooled = jnp.sum(y2.reshape(B, Hp * Wp, C), axis=1) * inv_hw       # (B, C)
        hid = jnp.dot(pooled.astype(jnp.bfloat16), rb_l1w_ref[blk],
                      preferred_element_type=f32) + rb_l1b_ref[blk]
        hid = jnp.maximum(hid, 0.0)                                        # (B, Cr)
        z = jnp.dot(hid.astype(jnp.bfloat16), rb_l2w_ref[blk],
                    preferred_element_type=f32) + rb_l2b_ref[blk]          # (B, C)
        gate = 1.0 / (1.0 + jnp.exp(-z))

        xcur = relu_x + y2.reshape(B, Hp, Wp, C) * gate.reshape(B, 1, 1, C)

    # ---- Lane-dense output store (output block minor dim = Wp*C) -------------
    # Written with Wp static lane-slice stores (guaranteed lowering); the HBM
    # writeback DMA then moves dense 256-lane rows instead of 4x-padded ones.
    for j in range(Wp):
        o_ref[:, :, j * C:(j + 1) * C] = xcur[:, :, j, :]


# ----------------------------------------------------------------------------
# Public wrapper (NCHW in / NCHW out, like the PyTorch module)
# ----------------------------------------------------------------------------
def _pick_batch_block(n, max_b=8):
    """Samples per grid step: keep >= 2 grid steps (megacore) and modest VMEM."""
    if n <= 1:
        return 1
    best = 1
    for b in range(1, min(n // 2, max_b) + 1):
        if n % b == 0:
            best = b
    return best


def conv_sequence_forward(x_nchw, params, *, batch_block=None):
    n, cin, h, w = x_nchw.shape
    c = params["conv_w"].shape[-1]
    cr = params["rb0"]["l1_w_t"].shape[-1]
    hp, wp = (h + 1) // 2, (w + 1) // 2

    if batch_block is None:
        batch_block = _pick_batch_block(n)
    assert n % batch_block == 0, (n, batch_block)
    bb = batch_block

    # NCHW -> NHWC plus the conv1 zero halo (tiny XLA pad on the raw input).
    x_nhwc = jnp.transpose(x_nchw, (0, 2, 3, 1)).astype(jnp.float32)
    x_pad = jnp.pad(x_nhwc, ((0, 0), (1, 1), (1, 1), (0, 0)))

    # Parameter packing; MXU operands in bf16 (weights are bf16-snapped -> lossless).
    conv_w = params["conv_w"].reshape(9, cin, c).astype(jnp.bfloat16)  # tap = 3*dy+dx
    conv_b = params["conv_b"].reshape(1, c).astype(jnp.float32)
    rb_cw = jnp.stack([
        jnp.stack([params[k]["conv1_w"].reshape(9, c, c),
                   params[k]["conv2_w"].reshape(9, c, c)])
        for k in ("rb0", "rb1")]).astype(jnp.bfloat16)                 # (2, 2, 9, C, C)
    rb_l1w = jnp.stack([params[k]["l1_w_t"] for k in ("rb0", "rb1")]).astype(jnp.bfloat16)
    rb_l1b = jnp.stack([params[k]["l1_b"].reshape(1, cr)
                        for k in ("rb0", "rb1")]).astype(jnp.float32)
    rb_l2w = jnp.stack([params[k]["l2_w_t"] for k in ("rb0", "rb1")]).astype(jnp.bfloat16)
    rb_l2b = jnp.stack([params[k]["l2_b"].reshape(1, c)
                        for k in ("rb0", "rb1")]).astype(jnp.float32)

    kern = functools.partial(_conv_sequence_kernel,
                             B=bb, H=h, W=w, Cin=cin, C=c, Hp=hp, Wp=wp)
    out = pl.pallas_call(
        kern,
        out_shape=jax.ShapeDtypeStruct((n, hp, wp * c), jnp.float32),
        grid_spec=pltpu.PrefetchScalarGridSpec(
            num_scalar_prefetch=0,
            grid=(n // bb,),
            in_specs=[
                pl.BlockSpec((bb, h + 2, w + 2, cin), lambda i: (i, 0, 0, 0)),
                pl.BlockSpec((9, cin, c), lambda i: (0, 0, 0)),
                pl.BlockSpec((1, c), lambda i: (0, 0)),
                pl.BlockSpec((2, 2, 9, c, c), lambda i: (0, 0, 0, 0, 0)),
                pl.BlockSpec((2, c, cr), lambda i: (0, 0, 0)),
                pl.BlockSpec((2, 1, cr), lambda i: (0, 0, 0)),
                pl.BlockSpec((2, cr, c), lambda i: (0, 0, 0)),
                pl.BlockSpec((2, 1, c), lambda i: (0, 0, 0)),
            ],
            out_specs=pl.BlockSpec((bb, hp, wp * c), lambda i: (i, 0, 0)),
            scratch_shapes=[
                pltpu.VMEM((bb, h, w + 2, c), jnp.float32),        # pool col pass (-inf halo)
                pltpu.VMEM((bb, h + 2, wp, c), jnp.float32),       # pool row pass (-inf halo)
                pltpu.VMEM((bb, hp + 2, wp + 2, c), jnp.float32),  # resblock conv zero halo
            ]),
        compiler_params=pltpu.CompilerParams(
            dimension_semantics=("parallel",),       # shard batch chunks over TCs
            vmem_limit_bytes=32 * 1024 * 1024),
    )(x_pad, conv_w, conv_b, rb_cw, rb_l1w, rb_l1b, rb_l2w, rb_l2b)

    out = out.reshape(n, hp, wp, c)
    return jnp.transpose(out, (0, 3, 1, 2))                   # NHWC -> NCHW


# ----------------------------------------------------------------------------
# Pure-JAX reference with the SAME precision policy (bf16 MXU operands, f32 acc)
# ----------------------------------------------------------------------------
def _conv3x3_ref(x, w, b=None):
    y = jax.lax.conv_general_dilated(
        x.astype(jnp.bfloat16), w.astype(jnp.bfloat16),
        window_strides=(1, 1), padding=((1, 1), (1, 1)),
        dimension_numbers=("NHWC", "HWIO", "NHWC"),
        preferred_element_type=jnp.float32)
    if b is not None:
        y = y + b.reshape(1, 1, 1, -1)
    return y


def _maxpool_ref(x):
    return jax.lax.reduce_window(
        x, -jnp.inf, jax.lax.max,
        (1, 3, 3, 1), (1, 2, 2, 1), ((0, 0), (1, 1), (1, 1), (0, 0)))


def _res_block_ref(x, p):
    rx = jnp.maximum(x, 0.0)            # inplace-ReLU quirk: residual adds relu(x)
    y = _conv3x3_ref(rx, p["conv1_w"])
    y = _conv3x3_ref(jnp.maximum(y, 0.0), p["conv2_w"])
    pooled = jnp.mean(y, axis=(1, 2))   # (N, C)
    hid = jnp.maximum(
        jnp.dot(pooled.astype(jnp.bfloat16), p["l1_w_t"].astype(jnp.bfloat16),
                preferred_element_type=jnp.float32) + p["l1_b"], 0.0)
    z = jnp.dot(hid.astype(jnp.bfloat16), p["l2_w_t"].astype(jnp.bfloat16),
                preferred_element_type=jnp.float32) + p["l2_b"]
    gate = 1.0 / (1.0 + jnp.exp(-z))
    return rx + y * gate[:, None, None, :]


def conv_sequence_ref(x_nchw, params):
    x = jnp.transpose(x_nchw, (0, 2, 3, 1))
    x = _conv3x3_ref(x, params["conv_w"], params["conv_b"])
    x = _maxpool_ref(x)
    x = _res_block_ref(x, params["rb0"])
    x = _res_block_ref(x, params["rb1"])
    return jnp.transpose(x, (0, 3, 1, 2))


# ----------------------------------------------------------------------------
# Deterministic parameter init (weights snapped to the bf16 grid)
# ----------------------------------------------------------------------------
def _q(x):
    return x.astype(jnp.bfloat16).astype(jnp.float32)


def _nrm(key, shape, scale):
    return _q(scale * jax.random.normal(key, shape, jnp.float32))


def init_params(key, cin, cout):
    assert cout % 16 == 0, "out_channels must be divisible by the SqEx reduction (16)"
    cr = cout // 16
    ks = jax.random.split(key, 14)

    def rb(k0, k1, k2, k3, k4, k5):
        return {
            "conv1_w": _nrm(k0, (3, 3, cout, cout), 0.08),
            "conv2_w": _nrm(k1, (3, 3, cout, cout), 0.08),
            "l1_w_t": _nrm(k2, (cout, cr), 0.3),   # Linear1 weight, pre-transposed
            "l1_b": _nrm(k3, (cr,), 0.1),
            "l2_w_t": _nrm(k4, (cr, cout), 0.3),   # Linear2 weight, pre-transposed
            "l2_b": _nrm(k5, (cout,), 0.1),
        }

    return {
        "conv_w": _nrm(ks[0], (3, 3, cin, cout), 0.15),
        "conv_b": _nrm(ks[1], (cout,), 0.1),
        "rb0": rb(*ks[2:8]),
        "rb1": rb(*ks[8:14]),
    }


# ----------------------------------------------------------------------------
if __name__ == "__main__":
    N, CIN, H, W = 2, 4, 16, 16          # input_shape = (4, 16, 16), batch = 2
    COUT = 32                            # out_channels (divisible by 16 for SqEx)

    key = jax.random.PRNGKey(0)
    kx, kp = jax.random.split(key)
    x = _q(jax.random.normal(kx, (N, CIN, H, W), jnp.float32))   # NCHW like PyTorch
    params = init_params(kp, CIN, COUT)

    fwd = jax.jit(lambda inp: conv_sequence_forward(inp, params))
    out = jax.block_until_ready(fwd(x))

    expected_shape = (N, COUT, (H + 1) // 2, (W + 1) // 2)
    assert out.shape == expected_shape, (out.shape, expected_shape)

    ref = jax.block_until_ready(conv_sequence_ref(x, params))
    max_abs_diff = float(jnp.max(jnp.abs(out - ref)))
    # Same bf16-operand / f32-accumulate policy as the reference; only f32
    # summation order differs, which can propagate a 1-ulp bf16 re-rounding of an
    # intermediate activation to ~1e-3 at the output.  2e-2 still catches any
    # structural error (those give O(0.1+)).
    assert max_abs_diff < 2e-2, f"mismatch vs reference: {max_abs_diff}"

    print("KERNEL_OK")
</pallas_src>

<mosaic_0001>
module attributes {stable_mosaic.version = 11 : i64} {
  func.func @_conv_sequence_kernel(%arg0: i32, %arg1: memref<1x18x18x4xf32, #tpu.memory_space<vmem>>, %arg2: memref<9x4x32xbf16, #tpu.memory_space<vmem>>, %arg3: memref<1x32xf32, #tpu.memory_space<vmem>>, %arg4: memref<2x2x9x32x32xbf16, #tpu.memory_space<vmem>>, %arg5: memref<2x32x2xbf16, #tpu.memory_space<vmem>>, %arg6: memref<2x1x2xf32, #tpu.memory_space<vmem>>, %arg7: memref<2x2x32xbf16, #tpu.memory_space<vmem>>, %arg8: memref<2x1x32xf32, #tpu.memory_space<vmem>>, %arg9: memref<1x8x256xf32, #tpu.memory_space<vmem>>, %arg10: memref<1x16x18x32xf32, #tpu.memory_space<vmem>>, %arg11: memref<1x18x8x32xf32, #tpu.memory_space<vmem>>, %arg12: memref<1x10x10x32xf32, #tpu.memory_space<vmem>>) attributes {dimension_semantics = [#tpu.dimension_semantics<parallel>], iteration_bounds = array<i64: 2>, scalar_prefetch = 0 : i64, scratch_operands = 3 : i64, tpu.core_type = #tpu.core_type<tc>, window_params = [{transform_indices = @transform_0, window_bounds = array<i64: 1, 18, 18, 4>}, {pipeline_mode = #tpu.pipeline_mode<synchronous>, transform_indices = @transform_1, window_bounds = array<i64: 9, 4, 32>}, {pipeline_mode = #tpu.pipeline_mode<synchronous>, transform_indices = @transform_2, window_bounds = array<i64: 1, 32>}, {pipeline_mode = #tpu.pipeline_mode<synchronous>, transform_indices = @transform_3, window_bounds = array<i64: 2, 2, 9, 32, 32>}, {pipeline_mode = #tpu.pipeline_mode<synchronous>, transform_indices = @transform_4, window_bounds = array<i64: 2, 32, 2>}, {pipeline_mode = #tpu.pipeline_mode<synchronous>, transform_indices = @transform_5, window_bounds = array<i64: 2, 1, 2>}, {pipeline_mode = #tpu.pipeline_mode<synchronous>, transform_indices = @transform_6, window_bounds = array<i64: 2, 2, 32>}, {pipeline_mode = #tpu.pipeline_mode<synchronous>, transform_indices = @transform_7, window_bounds = array<i64: 2, 1, 32>}, {transform_indices = @transform_8, window_bounds = array<i64: 1, 8, 256>}]} {
    %cst = arith.constant 0xFF800000 : f32
    %0 = vector.broadcast %cst : f32 to vector<1x16x18x32xf32>
    %c0 = arith.constant 0 : index
    %c0_0 = arith.constant 0 : index
    %c0_1 = arith.constant 0 : index
    %c0_2 = arith.constant 0 : index
    %1 = vector.load %arg10[%c0, %c0_0, %c0_1, %c0_2] : memref<1x16x18x32xf32, #tpu.memory_space<vmem>>, vector<1x16x18x32xf32>
    tpu.vector_store %arg10[%c0, %c0_0, %c0_1, %c0_2], %0 {strides = array<i32>} : memref<1x16x18x32xf32, #tpu.memory_space<vmem>>, vector<1x16x18x32xf32>,
    %cst_3 = arith.constant 0xFF800000 : f32
    %2 = vector.broadcast %cst_3 : f32 to vector<1x18x8x32xf32>
    %c0_4 = arith.constant 0 : index
    %c0_5 = arith.constant 0 : index
    %c0_6 = arith.constant 0 : index
    %c0_7 = arith.constant 0 : index
    %3 = vector.load %arg11[%c0_4, %c0_5, %c0_6, %c0_7] : memref<1x18x8x32xf32, #tpu.memory_space<vmem>>, vector<1x18x8x32xf32>
    tpu.vector_store %arg11[%c0_4, %c0_5, %c0_6, %c0_7], %2 {strides = array<i32>} : memref<1x18x8x32xf32, #tpu.memory_space<vmem>>, vector<1x18x8x32xf32>,
    %cst_8 = arith.constant 0.000000e+00 : f32
    %4 = vector.broadcast %cst_8 : f32 to vector<1x10x10x32xf32>
    %c0_9 = arith.constant 0 : index
    %c0_10 = arith.constant 0 : index
    %c0_11 = arith.constant 0 : index
    %c0_12 = arith.constant 0 : index
    %5 = vector.load %arg12[%c0_9, %c0_10, %c0_11, %c0_12] : memref<1x10x10x32xf32, #tpu.memory_space<vmem>>, vector<1x10x10x32xf32>
    tpu.vector_store %arg12[%c0_9, %c0_10, %c0_11, %c0_12], %4 {strides = array<i32>} : memref<1x10x10x32xf32, #tpu.memory_space<vmem>>, vector<1x10x10x32xf32>,
    %c0_13 = arith.constant 0 : index
    %c0_14 = arith.constant 0 : index
    %c0_15 = arith.constant 0 : index
    %c0_16 = arith.constant 0 : index
    %6 = vector.load %arg1[%c0_13, %c0_14, %c0_15, %c0_16] : memref<1x18x18x4xf32, #tpu.memory_space<vmem>>, vector<1x16x16x4xf32>
    %7 = vector.shape_cast %6 : vector<1x16x16x4xf32> to vector<256x4xf32>
    %8 = arith.truncf %7 : vector<256x4xf32> to vector<256x4xbf16>
    %c0_17 = arith.constant 0 : index
    %c0_18 = arith.constant 0 : index
    %c0_19 = arith.constant 0 : index
    %9 = vector.load %arg2[%c0_17, %c0_18, %c0_19] : memref<9x4x32xbf16, #tpu.memory_space<vmem>>, vector<1x4x32xbf16>
    %10 = vector.shape_cast %9 : vector<1x4x32xbf16> to vector<4x32xbf16>
    %cst_20 = arith.constant dense<0.000000e+00> : vector<256x32xf32>
    %11 = tpu.matmul %8, %10, %cst_20 {dimension_numbers = #tpu.dot_dimension_numbers<[1], [0], [0], [1], [0, 0, 1, 1], [], []>} : vector<256x4xbf16>, vector<4x32xbf16>, vector<256x32xf32> -> vector<256x32xf32>
    %c0_21 = arith.constant 0 : index
    %c0_22 = arith.constant 0 : index
    %c1 = arith.constant 1 : index
    %c0_23 = arith.constant 0 : index
    %12 = vector.load %arg1[%c0_21, %c0_22, %c1, %c0_23] : memref<1x18x18x4xf32, #tpu.memory_space<vmem>>, vector<1x16x16x4xf32>
    %13 = vector.shape_cast %12 : vector<1x16x16x4xf32> to vector<256x4xf32>
    %14 = arith.truncf %13 : vector<256x4xf32> to vector<256x4xbf16>
    %c1_24 = arith.constant 1 : index
    %c0_25 = arith.constant 0 : index
    %c0_26 = arith.constant 0 : index
    %15 = vector.load %arg2[%c1_24, %c0_25, %c0_26] : memref<9x4x32xbf16, #tpu.memory_space<vmem>>, vector<1x4x32xbf16>
    %16 = vector.shape_cast %15 : vector<1x4x32xbf16> to vector<4x32xbf16>
    %cst_27 = arith.constant dense<0.000000e+00> : vector<256x32xf32>
    %17 = tpu.matmul %14, %16, %cst_27 {dimension_numbers = #tpu.dot_dimension_numbers<[1], [0], [0], [1], [0, 0, 1, 1], [], []>} : vector<256x4xbf16>, vector<4x32xbf16>, vector<256x32xf32> -> vector<256x32xf32>
    %18 = arith.addf %11, %17 : vector<256x32xf32>
    %c0_28 = arith.constant 0 : index
    %c0_29 = arith.constant 0 : index
    %c2 = arith.constant 2 : index
    %c0_30 = arith.constant 0 : index
    %19 = vector.load %arg1[%c0_28, %c0_29, %c2, %c0_30] : memref<1x18x18x4xf32, #tpu.memory_space<vmem>>, vector<1x16x16x4xf32>
    %20 = vector.shape_cast %19 : vector<1x16x16x4xf32> to vector<256x4xf32>
    %21 = arith.truncf %20 : vector<256x4xf32> to vector<256x4xbf16>
    %c2_31 = arith.constant 2 : index
    %c0_32 = arith.constant 0 : index
    %c0_33 = arith.constant 0 : index
    %22 = vector.load %arg2[%c2_31, %c0_32, %c0_33] : memref<9x4x32xbf16, #tpu.memory_space<vmem>>, vector<1x4x32xbf16>
    %23 = vector.shape_cast %22 : vector<1x4x32xbf16> to vector<4x32xbf16>
    %cst_34 = arith.constant dense<0.000000e+00> : vector<256x32xf32>
    %24 = tpu.matmul %21, %23, %cst_34 {dimension_numbers = #tpu.dot_dimension_numbers<[1], [0], [0], [1], [0, 0, 1, 1], [], []>} : vector<256x4xbf16>, vector<4x32xbf16>, vector<256x32xf32> -> vector<256x32xf32>
    %25 = arith.addf %18, %24 : vector<256x32xf32>
    %c0_35 = arith.constant 0 : index
    %c1_36 = arith.constant 1 : index
    %c0_37 = arith.constant 0 : index
    %c0_38 = arith.constant 0 : index
    %26 = vector.load %arg1[%c0_35, %c1_36, %c0_37, %c0_38] : memref<1x18x18x4xf32, #tpu.memory_space<vmem>>, vector<1x16x16x4xf32>
    %27 = vector.shape_cast %26 : vector<1x16x16x4xf32> to vector<256x4xf32>
    %28 = arith.truncf %27 : vector<256x4xf32> to vector<256x4xbf16>
    %c3 = arith.constant 3 : index
    %c0_39 = arith.constant 0 : index
    %c0_40 = arith.constant 0 : index
    %29 = vector.load %arg2[%c3, %c0_39, %c0_40] : memref<9x4x32xbf16, #tpu.memory_space<vmem>>, vector<1x4x32xbf16>
    %30 = vector.shape_cast %29 : vector<1x4x32xbf16> to vector<4x32xbf16>
    %cst_41 = arith.constant dense<0.000000e+00> : vector<256x32xf32>
    %31 = tpu.matmul %28, %30, %cst_41 {dimension_numbers = #tpu.dot_dimension_numbers<[1], [0], [0], [1], [0, 0, 1, 1], [], []>} : vector<256x4xbf16>, vector<4x32xbf16>, vector<256x32xf32> -> vector<256x32xf32>
    %32 = arith.addf %25, %31 : vector<256x32xf32>
    %c0_42 = arith.constant 0 : index
    %c1_43 = arith.constant 1 : index
    %c1_44 = arith.constant 1 : index
    %c0_45 = arith.constant 0 : index
    %33 = vector.load %arg1[%c0_42, %c1_43, %c1_44, %c0_45] : memref<1x18x18x4xf32, #tpu.memory_space<vmem>>, vector<1x16x16x4xf32>
    %34 = vector.shape_cast %33 : vector<1x16x16x4xf32> to vector<256x4xf32>
    %35 = arith.truncf %34 : vector<256x4xf32> to vector<256x4xbf16>
    %c4 = arith.constant 4 : index
    %c0_46 = arith.constant 0 : index
    %c0_47 = arith.constant 0 : index
    %36 = vector.load %arg2[%c4, %c0_46, %c0_47] : memref<9x4x32xbf16, #tpu.memory_space<vmem>>, vector<1x4x32xbf16>
    %37 = vector.shape_cast %36 : vector<1x4x32xbf16> to vector<4x32xbf16>
    %cst_48 = arith.constant dense<0.000000e+00> : vector<256x32xf32>
    %38 = tpu.matmul %35, %37, %cst_48 {dimension_numbers = #tpu.dot_dimension_numbers<[1], [0], [0], [1], [0, 0, 1, 1], [], []>} : vector<256x4xbf16>, vector<4x32xbf16>, vector<256x32xf32> -> vector<256x32xf32>
    %39 = arith.addf %32, %38 : vector<256x32xf32>
    %c0_49 = arith.constant 0 : index
    %c1_50 = arith.constant 1 : index
    %c2_51 = arith.constant 2 : index
    %c0_52 = arith.constant 0 : index
    %40 = vector.load %arg1[%c0_49, %c1_50, %c2_51, %c0_52] : memref<1x18x18x4xf32, #tpu.memory_space<vmem>>, vector<1x16x16x4xf32>
    %41 = vector.shape_cast %40 : vector<1x16x16x4xf32> to vector<256x4xf32>
    %42 = arith.truncf %41 : vector<256x4xf32> to vector<256x4xbf16>
    %c5 = arith.constant 5 : index
    %c0_53 = arith.constant 0 : index
    %c0_54 = arith.constant 0 : index
    %43 = vector.load %arg2[%c5, %c0_53, %c0_54] : memref<9x4x32xbf16, #tpu.memory_space<vmem>>, vector<1x4x32xbf16>
    %44 = vector.shape_cast %43 : vector<1x4x32xbf16> to vector<4x32xbf16>
    %cst_55 = arith.constant dense<0.000000e+00> : vector<256x32xf32>
    %45 = tpu.matmul %42, %44, %cst_55 {dimension_numbers = #tpu.dot_dimension_numbers<[1], [0], [0], [1], [0, 0, 1, 1], [], []>} : vector<256x4xbf16>, vector<4x32xbf16>, vector<256x32xf32> -> vector<256x32xf32>
    %46 = arith.addf %39, %45 : vector<256x32xf32>
    %c0_56 = arith.constant 0 : index
    %c2_57 = arith.constant 2 : index
    %c0_58 = arith.constant 0 : index
    %c0_59 = arith.constant 0 : index
    %47 = vector.load %arg1[%c0_56, %c2_57, %c0_58, %c0_59] : memref<1x18x18x4xf32, #tpu.memory_space<vmem>>, vector<1x16x16x4xf32>
    %48 = vector.shape_cast %47 : vector<1x16x16x4xf32> to vector<256x4xf32>
    %49 = arith.truncf %48 : vector<256x4xf32> to vector<256x4xbf16>
    %c6 = arith.constant 6 : index
    %c0_60 = arith.constant 0 : index
    %c0_61 = arith.constant 0 : index
    %50 = vector.load %arg2[%c6, %c0_60, %c0_61] : memref<9x4x32xbf16, #tpu.memory_space<vmem>>, vector<1x4x32xbf16>
    %51 = vector.shape_cast %50 : vector<1x4x32xbf16> to vector<4x32xbf16>
    %cst_62 = arith.constant dense<0.000000e+00> : vector<256x32xf32>
    %52 = tpu.matmul %49, %51, %cst_62 {dimension_numbers = #tpu.dot_dimension_numbers<[1], [0], [0], [1], [0, 0, 1, 1], [], []>} : vector<256x4xbf16>, vector<4x32xbf16>, vector<256x32xf32> -> vector<256x32xf32>
    %53 = arith.addf %46, %52 : vector<256x32xf32>
    %c0_63 = arith.constant 0 : index
    %c2_64 = arith.constant 2 : index
    %c1_65 = arith.constant 1 : index
    %c0_66 = arith.constant 0 : index
    %54 = vector.load %arg1[%c0_63, %c2_64, %c1_65, %c0_66] : memref<1x18x18x4xf32, #tpu.memory_space<vmem>>, vector<1x16x16x4xf32>
    %55 = vector.shape_cast %54 : vector<1x16x16x4xf32> to vector<256x4xf32>
    %56 = arith.truncf %55 : vector<256x4xf32> to vector<256x4xbf16>
    %c7 = arith.constant 7 : index
    %c0_67 = arith.constant 0 : index
    %c0_68 = arith.constant 0 : index
    %57 = vector.load %arg2[%c7, %c0_67, %c0_68] : memref<9x4x32xbf16, #tpu.memory_space<vmem>>, vector<1x4x32xbf16>
    %58 = vector.shape_cast %57 : vector<1x4x32xbf16> to vector<4x32xbf16>
    %cst_69 = arith.constant dense<0.000000e+00> : vector<256x32xf32>
    %59 = tpu.matmul %56, %58, %cst_69 {dimension_numbers = #tpu.dot_dimension_numbers<[1], [0], [0], [1], [0, 0, 1, 1], [], []>} : vector<256x4xbf16>, vector<4x32xbf16>, vector<256x32xf32> -> vector<256x32xf32>
    %60 = arith.addf %53, %59 : vector<256x32xf32>
    %c0_70 = arith.constant 0 : index
    %c2_71 = arith.constant 2 : index
    %c2_72 = arith.constant 2 : index
    %c0_73 = arith.constant 0 : index
    %61 = vector.load %arg1[%c0_70, %c2_71, %c2_72, %c0_73] : memref<1x18x18x4xf32, #tpu.memory_space<vmem>>, vector<1x16x16x4xf32>
    %62 = vector.shape_cast %61 : vector<1x16x16x4xf32> to vector<256x4xf32>
    %63 = arith.truncf %62 : vector<256x4xf32> to vector<256x4xbf16>
    %c8 = arith.constant 8 : index
    %c0_74 = arith.constant 0 : index
    %c0_75 = arith.constant 0 : index
    %64 = vector.load %arg2[%c8, %c0_74, %c0_75] : memref<9x4x32xbf16, #tpu.memory_space<vmem>>, vector<1x4x32xbf16>
    %65 = vector.shape_cast %64 : vector<1x4x32xbf16> to vector<4x32xbf16>
    %cst_76 = arith.constant dense<0.000000e+00> : vector<256x32xf32>
    %66 = tpu.matmul %63, %65, %cst_76 {dimension_numbers = #tpu.dot_dimension_numbers<[1], [0], [0], [1], [0, 0, 1, 1], [], []>} : vector<256x4xbf16>, vector<4x32xbf16>, vector<256x32xf32> -> vector<256x32xf32>
    %67 = arith.addf %60, %66 : vector<256x32xf32>
    %c0_77 = arith.constant 0 : index
    %c0_78 = arith.constant 0 : index
    %68 = vector.load %arg3[%c0_77, %c0_78] : memref<1x32xf32, #tpu.memory_space<vmem>>, vector<1x32xf32>
    %69 = vector.broadcast %68 : vector<1x32xf32> to vector<256x32xf32>
    %70 = arith.addf %67, %69 : vector<256x32xf32>
    %71 = vector.shape_cast %70 : vector<256x32xf32> to vector<1x16x16x32xf32>
    %c0_79 = arith.constant 0 : index
    %c0_80 = arith.constant 0 : index
    %c1_81 = arith.constant 1 : index
    %c0_82 = arith.constant 0 : index
    %72 = vector.load %arg10[%c0_79, %c0_80, %c1_81, %c0_82] : memref<1x16x18x32xf32, #tpu.memory_space<vmem>>, vector<1x16x16x32xf32>
    tpu.vector_store %arg10[%c0_79, %c0_80, %c1_81, %c0_82], %71 {strides = array<i32>} : memref<1x16x18x32xf32, #tpu.memory_space<vmem>>, vector<1x16x16x32xf32>,
    %c0_83 = arith.constant 0 : index
    %c0_84 = arith.constant 0 : index
    %c0_85 = arith.constant 0 : index
    %c0_86 = arith.constant 0 : index
    %73 = tpu.strided_load %arg10[%c0_83, %c0_84, %c0_85, %c0_86] {strides = array<i32: 1, 1, 2, 1>} : memref<1x16x18x32xf32, #tpu.memory_space<vmem>>, vector<1x16x8x32xf32>
    %c0_87 = arith.constant 0 : index
    %c0_88 = arith.constant 0 : index
    %c1_89 = arith.constant 1 : index
    %c0_90 = arith.constant 0 : index
    %74 = tpu.strided_load %arg10[%c0_87, %c0_88, %c1_89, %c0_90] {strides = array<i32: 1, 1, 2, 1>} : memref<1x16x18x32xf32, #tpu.memory_space<vmem>>, vector<1x16x8x32xf32>
    %75 = arith.maximumf %73, %74 : vector<1x16x8x32xf32>
    %c0_91 = arith.constant 0 : index
    %c0_92 = arith.constant 0 : index
    %c2_93 = arith.constant 2 : index
    %c0_94 = arith.constant 0 : index
    %76 = tpu.strided_load %arg10[%c0_91, %c0_92, %c2_93, %c0_94] {strides = array<i32: 1, 1, 2, 1>} : memref<1x16x18x32xf32, #tpu.memory_space<vmem>>, vector<1x16x8x32xf32>
    %77 = arith.maximumf %75, %76 : vector<1x16x8x32xf32>
    %c0_95 = arith.constant 0 : index
    %c1_96 = arith.constant 1 : index
    %c0_97 = arith.constant 0 : index
    %c0_98 = arith.constant 0 : index
    %78 = vector.load %arg11[%c0_95, %c1_96, %c0_97, %c0_98] : memref<1x18x8x32xf32, #tpu.memory_space<vmem>>, vector<1x16x8x32xf32>
    tpu.vector_store %arg11[%c0_95, %c1_96, %c0_97, %c0_98], %77 {strides = array<i32>} : memref<1x18x8x32xf32, #tpu.memory_space<vmem>>, vector<1x16x8x32xf32>,
    %c0_99 = arith.constant 0 : index
    %c0_100 = arith.constant 0 : index
    %c0_101 = arith.constant 0 : index
    %c0_102 = arith.constant 0 : index
    %79 = tpu.strided_load %arg11[%c0_99, %c0_100, %c0_101, %c0_102] {strides = array<i32: 1, 2, 1, 1>} : memref<1x18x8x32xf32, #tpu.memory_space<vmem>>, vector<1x8x8x32xf32>
    %c0_103 = arith.constant 0 : index
    %c1_104 = arith.constant 1 : index
    %c0_105 = arith.constant 0 : index
    %c0_106 = arith.constant 0 : index
    %80 = tpu.strided_load %arg11[%c0_103, %c1_104, %c0_105, %c0_106] {strides = array<i32: 1, 2, 1, 1>} : memref<1x18x8x32xf32, #tpu.memory_space<vmem>>, vector<1x8x8x32xf32>
    %81 = arith.maximumf %79, %80 : vector<1x8x8x32xf32>
    %c0_107 = arith.constant 0 : index
    %c2_108 = arith.constant 2 : index
    %c0_109 = arith.constant 0 : index
    %c0_110 = arith.constant 0 : index
    %82 = tpu.strided_load %arg11[%c0_107, %c2_108, %c0_109, %c0_110] {strides = array<i32: 1, 2, 1, 1>} : memref<1x18x8x32xf32, #tpu.memory_space<vmem>>, vector<1x8x8x32xf32>
    %83 = arith.maximumf %81, %82 : vector<1x8x8x32xf32>
    %cst_111 = arith.constant 0.000000e+00 : f32
    %84 = vector.broadcast %cst_111 : f32 to vector<1x8x8x32xf32>
    %85 = arith.maximumf %83, %84 : vector<1x8x8x32xf32>
    %c0_112 = arith.constant 0 : index
    %c1_113 = arith.constant 1 : index
    %c1_114 = arith.constant 1 : index
    %c0_115 = arith.constant 0 : index
    %86 = vector.load %arg12[%c0_112, %c1_113, %c1_114, %c0_115] : memref<1x10x10x32xf32, #tpu.memory_space<vmem>>, vector<1x8x8x32xf32>
    tpu.vector_store %arg12[%c0_112, %c1_113, %c1_114, %c0_115], %85 {strides = array<i32>} : memref<1x10x10x32xf32, #tpu.memory_space<vmem>>, vector<1x8x8x32xf32>,
    %c0_116 = arith.constant 0 : index
    %c0_117 = arith.constant 0 : index
    %c0_118 = arith.constant 0 : index
    %c0_119 = arith.constant 0 : index
    %87 = vector.load %arg12[%c0_116, %c0_117, %c0_118, %c0_119] : memref<1x10x10x32xf32, #tpu.memory_space<vmem>>, vector<1x8x8x32xf32>
    %88 = vector.shape_cast %87 : vector<1x8x8x32xf32> to vector<64x32xf32>
    %89 = arith.truncf %88 : vector<64x32xf32> to vector<64x32xbf16>
    %c0_120 = arith.constant 0 : index
    %c0_121 = arith.constant 0 : index
    %c0_122 = arith.constant 0 : index
    %c0_123 = arith.constant 0 : index
    %c0_124 = arith.constant 0 : index
    %90 = vector.load %arg4[%c0_120, %c0_121, %c0_122, %c0_123, %c0_124] : memref<2x2x9x32x32xbf16, #tpu.memory_space<vmem>>, vector<1x1x1x32x32xbf16>
    %91 = vector.shape_cast %90 : vector<1x1x1x32x32xbf16> to vector<32x32xbf16>
    %cst_125 = arith.constant dense<0.000000e+00> : vector<64x32xf32>
    %92 = tpu.matmul %89, %91, %cst_125 {dimension_numbers = #tpu.dot_dimension_numbers<[1], [0], [0], [1], [0, 0, 1, 1], [], []>} : vector<64x32xbf16>, vector<32x32xbf16>, vector<64x32xf32> -> vector<64x32xf32>
    %c0_126 = arith.constant 0 : index
    %c0_127 = arith.constant 0 : index
    %c1_128 = arith.constant 1 : index
    %c0_129 = arith.constant 0 : index
    %93 = vector.load %arg12[%c0_126, %c0_127, %c1_128, %c0_129] : memref<1x10x10x32xf32, #tpu.memory_space<vmem>>, vector<1x8x8x32xf32>
    %94 = vector.shape_cast %93 : vector<1x8x8x32xf32> to vector<64x32xf32>
    %95 = arith.truncf %94 : vector<64x32xf32> to vector<64x32xbf16>
    %c0_130 = arith.constant 0 : index
    %c0_131 = arith.constant 0 : index
    %c1_132 = arith.constant 1 : index
    %c0_133 = arith.constant 0 : index
    %c0_134 = arith.constant 0 : index
    %96 = vector.load %arg4[%c0_130, %c0_131, %c1_132, %c0_133, %c0_134] : memref<2x2x9x32x32xbf16, #tpu.memory_space<vmem>>, vector<1x1x1x32x32xbf16>
    %97 = vector.shape_cast %96 : vector<1x1x1x32x32xbf16> to vector<32x32xbf16>
    %cst_135 = arith.constant dense<0.000000e+00> : vector<64x32xf32>
    %98 = tpu.matmul %95, %97, %cst_135 {dimension_numbers = #tpu.dot_dimension_numbers<[1], [0], [0], [1], [0, 0, 1, 1], [], []>} : vector<64x32xbf16>, vector<32x32xbf16>, vector<64x32xf32> -> vector<64x32xf32>
    %99 = arith.addf %92, %98 : vector<64x32xf32>
    %c0_136 = arith.constant 0 : index
    %c0_137 = arith.constant 0 : index
    %c2_138 = arith.constant 2 : index
    %c0_139 = arith.constant 0 : index
    %100 = vector.load %arg12[%c0_136, %c0_137, %c2_138, %c0_139] : memref<1x10x10x32xf32, #tpu.memory_space<vmem>>, vector<1x8x8x32xf32>
    %101 = vector.shape_cast %100 : vector<1x8x8x32xf32> to vector<64x32xf32>
    %102 = arith.truncf %101 : vector<64x32xf32> to vector<64x32xbf16>
    %c0_140 = arith.constant 0 : index
    %c0_141 = arith.constant 0 : index
    %c2_142 = arith.constant 2 : index
    %c0_143 = arith.constant 0 : index
    %c0_144 = arith.constant 0 : index
    %103 = vector.load %arg4[%c0_140, %c0_141, %c2_142, %c0_143, %c0_144] : memref<2x2x9x32x32xbf16, #tpu.memory_space<vmem>>, vector<1x1x1x32x32xbf16>
    %104 = vector.shape_cast %103 : vector<1x1x1x32x32xbf16> to vector<32x32xbf16>
    %cst_145 = arith.constant dense<0.000000e+00> : vector<64x32xf32>
    %105 = tpu.matmul %102, %104, %cst_145 {dimension_numbers = #tpu.dot_dimension_numbers<[1], [0], [0], [1], [0, 0, 1, 1], [], []>} : vector<64x32xbf16>, vector<32x32xbf16>, vector<64x32xf32> -> vector<64x32xf32>
    %106 = arith.addf %99, %105 : vector<64x32xf32>
    %c0_146 = arith.constant 0 : index
    %c1_147 = arith.constant 1 : index
    %c0_148 = arith.constant 0 : index
    %c0_149 = arith.constant 0 : index
    %107 = vector.load %arg12[%c0_146, %c1_147, %c0_148, %c0_149] : memref<1x10x10x32xf32, #tpu.memory_space<vmem>>, vector<1x8x8x32xf32>
    %108 = vector.shape_cast %107 : vector<1x8x8x32xf32> to vector<64x32xf32>
    %109 = arith.truncf %108 : vector<64x32xf32> to vector<64x32xbf16>
    %c0_150 = arith.constant 0 : index
    %c0_151 = arith.constant 0 : index
    %c3_152 = arith.constant 3 : index
    %c0_153 = arith.constant 0 : index
    %c0_154 = arith.constant 0 : index
    %110 = vector.load %arg4[%c0_150, %c0_151, %c3_152, %c0_153, %c0_154] : memref<2x2x9x32x32xbf16, #tpu.memory_space<vmem>>, vector<1x1x1x32x32xbf16>
    %111 = vector.shape_cast %110 : vector<1x1x1x32x32xbf16> to vector<32x32xbf16>
    %cst_155 = arith.constant dense<0.000000e+00> : vector<64x32xf32>
    %112 = tpu.matmul %109, %111, %cst_155 {dimension_numbers = #tpu.dot_dimension_numbers<[1], [0], [0], [1], [0, 0, 1, 1], [], []>} : vector<64x32xbf16>, vector<32x32xbf16>, vector<64x32xf32> -> vector<64x32xf32>
    %113 = arith.addf %106, %112 : vector<64x32xf32>
    %c0_156 = arith.constant 0 : index
    %c1_157 = arith.constant 1 : index
    %c1_158 = arith.constant 1 : index
    %c0_159 = arith.constant 0 : index
    %114 = vector.load %arg12[%c0_156, %c1_157, %c1_158, %c0_159] : memref<1x10x10x32xf32, #tpu.memory_space<vmem>>, vector<1x8x8x32xf32>
    %115 = vector.shape_cast %114 : vector<1x8x8x32xf32> to vector<64x32xf32>
    %116 = arith.truncf %115 : vector<64x32xf32> to vector<64x32xbf16>
    %c0_160 = arith.constant 0 : index
    %c0_161 = arith.constant 0 : index
    %c4_162 = arith.constant 4 : index
    %c0_163 = arith.constant 0 : index
    %c0_164 = arith.constant 0 : index
    %117 = vector.load %arg4[%c0_160, %c0_161, %c4_162, %c0_163, %c0_164] : memref<2x2x9x32x32xbf16, #tpu.memory_space<vmem>>, vector<1x1x1x32x32xbf16>
    %118 = vector.shape_cast %117 : vector<1x1x1x32x32xbf16> to vector<32x32xbf16>
    %cst_165 = arith.constant dense<0.000000e+00> : vector<64x32xf32>
    %119 = tpu.matmul %116, %118, %cst_165 {dimension_numbers = #tpu.dot_dimension_numbers<[1], [0], [0], [1], [0, 0, 1, 1], [], []>} : vector<64x32xbf16>, vector<32x32xbf16>, vector<64x32xf32> -> vector<64x32xf32>
    %120 = arith.addf %113, %119 : vector<64x32xf32>
    %c0_166 = arith.constant 0 : index
    %c1_167 = arith.constant 1 : index
    %c2_168 = arith.constant 2 : index
    %c0_169 = arith.constant 0 : index
    %121 = vector.load %arg12[%c0_166, %c1_167, %c2_168, %c0_169] : memref<1x10x10x32xf32, #tpu.memory_space<vmem>>, vector<1x8x8x32xf32>
    %122 = vector.shape_cast %121 : vector<1x8x8x32xf32> to vector<64x32xf32>
    %123 = arith.truncf %122 : vector<64x32xf32> to vector<64x32xbf16>
    %c0_170 = arith.constant 0 : index
    %c0_171 = arith.constant 0 : index
    %c5_172 = arith.constant 5 : index
    %c0_173 = arith.constant 0 : index
    %c0_174 = arith.constant 0 : index
    %124 = vector.load %arg4[%c0_170, %c0_171, %c5_172, %c0_173, %c0_174] : memref<2x2x9x32x32xbf16, #tpu.memory_space<vmem>>, vector<1x1x1x32x32xbf16>
    %125 = vector.shape_cast %124 : vector<1x1x1x32x32xbf16> to vector<32x32xbf16>
    %cst_175 = arith.constant dense<0.000000e+00> : vector<64x32xf32>
    %126 = tpu.matmul %123, %125, %cst_175 {dimension_numbers = #tpu.dot_dimension_numbers<[1], [0], [0], [1], [0, 0, 1, 1], [], []>} : vector<64x32xbf16>, vector<32x32xbf16>, vector<64x32xf32> -> vector<64x32xf32>
    %127 = arith.addf %120, %126 : vector<64x32xf32>
    %c0_176 = arith.constant 0 : index
    %c2_177 = arith.constant 2 : index
    %c0_178 = arith.constant 0 : index
    %c0_179 = arith.constant 0 : index
    %128 = vector.load %arg12[%c0_176, %c2_177, %c0_178, %c0_179] : memref<1x10x10x32xf32, #tpu.memory_space<vmem>>, vector<1x8x8x32xf32>
    %129 = vector.shape_cast %128 : vector<1x8x8x32xf32> to vector<64x32xf32>
    %130 = arith.truncf %129 : vector<64x32xf32> to vector<64x32xbf16>
    %c0_180 = arith.constant 0 : index
    %c0_181 = arith.constant 0 : index
    %c6_182 = arith.constant 6 : index
    %c0_183 = arith.constant 0 : index
    %c0_184 = arith.constant 0 : index
    %131 = vector.load %arg4[%c0_180, %c0_181, %c6_182, %c0_183, %c0_184] : memref<2x2x9x32x32xbf16, #tpu.memory_space<vmem>>, vector<1x1x1x32x32xbf16>
    %132 = vector.shape_cast %131 : vector<1x1x1x32x32xbf16> to vector<32x32xbf16>
    %cst_185 = arith.constant dense<0.000000e+00> : vector<64x32xf32>
    %133 = tpu.matmul %130, %132, %cst_185 {dimension_numbers = #tpu.dot_dimension_numbers<[1], [0], [0], [1], [0, 0, 1, 1], [], []>} : vector<64x32xbf16>, vector<32x32xbf16>, vector<64x32xf32> -> vector<64x32xf32>
    %134 = arith.addf %127, %133 : vector<64x32xf32>
    %c0_186 = arith.constant 0 : index
    %c2_187 = arith.constant 2 : index
    %c1_188 = arith.constant 1 : index
    %c0_189 = arith.constant 0 : index
    %135 = vector.load %arg12[%c0_186, %c2_187, %c1_188, %c0_189] : memref<1x10x10x32xf32, #tpu.memory_space<vmem>>, vector<1x8x8x32xf32>
    %136 = vector.shape_cast %135 : vector<1x8x8x32xf32> to vector<64x32xf32>
    %137 = arith.truncf %136 : vector<64x32xf32> to vector<64x32xbf16>
    %c0_190 = arith.constant 0 : index
    %c0_191 = arith.constant 0 : index
    %c7_192 = arith.constant 7 : index
    %c0_193 = arith.constant 0 : index
    %c0_194 = arith.constant 0 : index
    %138 = vector.load %arg4[%c0_190, %c0_191, %c7_192, %c0_193, %c0_194] : memref<2x2x9x32x32xbf16, #tpu.memory_space<vmem>>, vector<1x1x1x32x32xbf16>
    %139 = vector.shape_cast %138 : vector<1x1x1x32x32xbf16> to vector<32x32xbf16>
    %cst_195 = arith.constant dense<0.000000e+00> : vector<64x32xf32>
    %140 = tpu.matmul %137, %139, %cst_195 {dimension_numbers = #tpu.dot_dimension_numbers<[1], [0], [0], [1], [0, 0, 1, 1], [], []>} : vector<64x32xbf16>, vector<32x32xbf16>, vector<64x32xf32> -> vector<64x32xf32>
    %141 = arith.addf %134, %140 : vector<64x32xf32>
    %c0_196 = arith.constant 0 : index
    %c2_197 = arith.constant 2 : index
    %c2_198 = arith.constant 2 : index
    %c0_199 = arith.constant 0 : index
    %142 = vector.load %arg12[%c0_196, %c2_197, %c2_198, %c0_199] : memref<1x10x10x32xf32, #tpu.memory_space<vmem>>, vector<1x8x8x32xf32>
    %143 = vector.shape_cast %142 : vector<1x8x8x32xf32> to vector<64x32xf32>
    %144 = arith.truncf %143 : vector<64x32xf32> to vector<64x32xbf16>
    %c0_200 = arith.constant 0 : index
    %c0_201 = arith.constant 0 : index
    %c8_202 = arith.constant 8 : index
    %c0_203 = arith.constant 0 : index
    %c0_204 = arith.constant 0 : index
    %145 = vector.load %arg4[%c0_200, %c0_201, %c8_202, %c0_203, %c0_204] : memref<2x2x9x32x32xbf16, #tpu.memory_space<vmem>>, vector<1x1x1x32x32xbf16>
    %146 = vector.shape_cast %145 : vector<1x1x1x32x32xbf16> to vector<32x32xbf16>
    %cst_205 = arith.constant dense<0.000000e+00> : vector<64x32xf32>
    %147 = tpu.matmul %144, %146, %cst_205 {dimension_numbers = #tpu.dot_dimension_numbers<[1], [0], [0], [1], [0, 0, 1, 1], [], []>} : vector<64x32xbf16>, vector<32x32xbf16>, vector<64x32xf32> -> vector<64x32xf32>
    %148 = arith.addf %141, %147 : vector<64x32xf32>
    %cst_206 = arith.constant 0.000000e+00 : f32
    %149 = vector.broadcast %cst_206 : f32 to vector<64x32xf32>
    %150 = arith.maximumf %148, %149 : vector<64x32xf32>
    %151 = vector.shape_cast %150 : vector<64x32xf32> to vector<1x8x8x32xf32>
    %c0_207 = arith.constant 0 : index
    %c1_208 = arith.constant 1 : index
    %c1_209 = arith.constant 1 : index
    %c0_210 = arith.constant 0 : index
    %152 = vector.load %arg12[%c0_207, %c1_208, %c1_209, %c0_210] : memref<1x10x10x32xf32, #tpu.memory_space<vmem>>, vector<1x8x8x32xf32>
    tpu.vector_store %arg12[%c0_207, %c1_208, %c1_209, %c0_210], %151 {strides = array<i32>} : memref<1x10x10x32xf32, #tpu.memory_space<vmem>>, vector<1x8x8x32xf32>,
    %c0_211 = arith.constant 0 : index
    %c0_212 = arith.constant 0 : index
    %c0_213 = arith.constant 0 : index
    %c0_214 = arith.constant 0 : index
    %153 = vector.load %arg12[%c0_211, %c0_212, %c0_213, %c0_214] : memref<1x10x10x32xf32, #tpu.memory_space<vmem>>, vector<1x8x8x32xf32>
    %154 = vector.shape_cast %153 : vector<1x8x8x32xf32> to vector<64x32xf32>
    %155 = arith.truncf %154 : vector<64x32xf32> to vector<64x32xbf16>
    %c0_215 = arith.constant 0 : index
    %c1_216 = arith.constant 1 : index
    %c0_217 = arith.constant 0 : index
    %c0_218 = arith.constant 0 : index
    %c0_219 = arith.constant 0 : index
    %156 = vector.load %arg4[%c0_215, %c1_216, %c0_217, %c0_218, %c0_219] : memref<2x2x9x32x32xbf16, #tpu.memory_space<vmem>>, vector<1x1x1x32x32xbf16>
    %157 = vector.shape_cast %156 : vector<1x1x1x32x32xbf16> to vector<32x32xbf16>
    %cst_220 = arith.constant dense<0.000000e+00> : vector<64x32xf32>
    %158 = tpu.matmul %155, %157, %cst_220 {dimension_numbers = #tpu.dot_dimension_numbers<[1], [0], [0], [1], [0, 0, 1, 1], [], []>} : vector<64x32xbf16>, vector<32x32xbf16>, vector<64x32xf32> -> vector<64x32xf32>
    %c0_221 = arith.constant 0 : index
    %c0_222 = arith.constant 0 : index
    %c1_223 = arith.constant 1 : index
    %c0_224 = arith.constant 0 : index
    %159 = vector.load %arg12[%c0_221, %c0_222, %c1_223, %c0_224] : memref<1x10x10x32xf32, #tpu.memory_space<vmem>>, vector<1x8x8x32xf32>
    %160 = vector.shape_cast %159 : vector<1x8x8x32xf32> to vector<64x32xf32>
    %161 = arith.truncf %160 : vector<64x32xf32> to vector<64x32xbf16>
    %c0_225 = arith.constant 0 : index
    %c1_226 = arith.constant 1 : index
    %c1_227 = arith.constant 1 : index
    %c0_228 = arith.constant 0 : index
    %c0_229 = arith.constant 0 : index
    %162 = vector.load %arg4[%c0_225, %c1_226, %c1_227, %c0_228, %c0_229] : memref<2x2x9x32x32xbf16, #tpu.memory_space<vmem>>, vector<1x1x1x32x32xbf16>
    %163 = vector.shape_cast %162 : vector<1x1x1x32x32xbf16> to vector<32x32xbf16>
    %cst_230 = arith.constant dense<0.000000e+00> : vector<64x32xf32>
    %164 = tpu.matmul %161, %163, %cst_230 {dimension_numbers = #tpu.dot_dimension_numbers<[1], [0], [0], [1], [0, 0, 1, 1], [], []>} : vector<64x32xbf16>, vector<32x32xbf16>, vector<64x32xf32> -> vector<64x32xf32>
    %165 = arith.addf %158, %164 : vector<64x32xf32>
    %c0_231 = arith.constant 0 : index
    %c0_232 = arith.constant 0 : index
    %c2_233 = arith.constant 2 : index
    %c0_234 = arith.constant 0 : index
    %166 = vector.load %arg12[%c0_231, %c0_232, %c2_233, %c0_234] : memref<1x10x10x32xf32, #tpu.memory_space<vmem>>, vector<1x8x8x32xf32>
    %167 = vector.shape_cast %166 : vector<1x8x8x32xf32> to vector<64x32xf32>
    %168 = arith.truncf %167 : vector<64x32xf32> to vector<64x32xbf16>
    %c0_235 = arith.constant 0 : index
    %c1_236 = arith.constant 1 : index
    %c2_237 = arith.constant 2 : index
    %c0_238 = arith.constant 0 : index
    %c0_239 = arith.constant 0 : index
    %169 = vector.load %arg4[%c0_235, %c1_236, %c2_237, %c0_238, %c0_239] : memref<2x2x9x32x32xbf16, #tpu.memory_space<vmem>>, vector<1x1x1x32x32xbf16>
    %170 = vector.shape_cast %169 : vector<1x1x1x32x32xbf16> to vector<32x32xbf16>
    %cst_240 = arith.constant dense<0.000000e+00> : vector<64x32xf32>
    %171 = tpu.matmul %168, %170, %cst_240 {dimension_numbers = #tpu.dot_dimension_numbers<[1], [0], [0], [1], [0, 0, 1, 1], [], []>} : vector<64x32xbf16>, vector<32x32xbf16>, vector<64x32xf32> -> vector<64x32xf32>
    %172 = arith.addf %165, %171 : vector<64x32xf32>
    %c0_241 = arith.constant 0 : index
    %c1_242 = arith.constant 1 : index
    %c0_243 = arith.constant 0 : index
    %c0_244 = arith.constant 0 : index
    %173 = vector.load %arg12[%c0_241, %c1_242, %c0_243, %c0_244] : memref<1x10x10x32xf32, #tpu.memory_space<vmem>>, vector<1x8x8x32xf32>
    %174 = vector.shape_cast %173 : vector<1x8x8x32xf32> to vector<64x32xf32>
    %175 = arith.truncf %174 : vector<64x32xf32> to vector<64x32xbf16>
    %c0_245 = arith.constant 0 : index
    %c1_246 = arith.constant 1 : index
    %c3_247 = arith.constant 3 : index
    %c0_248 = arith.constant 0 : index
    %c0_249 = arith.constant 0 : index
    %176 = vector.load %arg4[%c0_245, %c1_246, %c3_247, %c0_248, %c0_249] : memref<2x2x9x32x32xbf16, #tpu.memory_space<vmem>>, vector<1x1x1x32x32xbf16>
    %177 = vector.shape_cast %176 : vector<1x1x1x32x32xbf16> to vector<32x32xbf16>
    %cst_250 = arith.constant dense<0.000000e+00> : vector<64x32xf32>
    %178 = tpu.matmul %175, %177, %cst_250 {dimension_numbers = #tpu.dot_dimension_numbers<[1], [0], [0], [1], [0, 0, 1, 1], [], []>} : vector<64x32xbf16>, vector<32x32xbf16>, vector<64x32xf32> -> vector<64x32xf32>
    %179 = arith.addf %172, %178 : vector<64x32xf32>
    %c0_251 = arith.constant 0 : index
    %c1_252 = arith.constant 1 : index
    %c1_253 = arith.constant 1 : index
    %c0_254 = arith.constant 0 : index
    %180 = vector.load %arg12[%c0_251, %c1_252, %c1_253, %c0_254] : memref<1x10x10x32xf32, #tpu.memory_space<vmem>>, vector<1x8x8x32xf32>
    %181 = vector.shape_cast %180 : vector<1x8x8x32xf32> to vector<64x32xf32>
    %182 = arith.truncf %181 : vector<64x32xf32> to vector<64x32xbf16>
    %c0_255 = arith.constant 0 : index
    %c1_256 = arith.constant 1 : index
    %c4_257 = arith.constant 4 : index
    %c0_258 = arith.constant 0 : index
    %c0_259 = arith.constant 0 : index
    %183 = vector.load %arg4[%c0_255, %c1_256, %c4_257, %c0_258, %c0_259] : memref<2x2x9x32x32xbf16, #tpu.memory_space<vmem>>, vector<1x1x1x32x32xbf16>
    %184 = vector.shape_cast %183 : vector<1x1x1x32x32xbf16> to vector<32x32xbf16>
    %cst_260 = arith.constant dense<0.000000e+00> : vector<64x32xf32>
    %185 = tpu.matmul %182, %184, %cst_260 {dimension_numbers = #tpu.dot_dimension_numbers<[1], [0], [0], [1], [0, 0, 1, 1], [], []>} : vector<64x32xbf16>, vector<32x32xbf16>, vector<64x32xf32> -> vector<64x32xf32>
    %186 = arith.addf %179, %185 : vector<64x32xf32>
    %c0_261 = arith.constant 0 : index
    %c1_262 = arith.constant 1 : index
    %c2_263 = arith.constant 2 : index
    %c0_264 = arith.constant 0 : index
    %187 = vector.load %arg12[%c0_261, %c1_262, %c2_263, %c0_264] : memref<1x10x10x32xf32, #tpu.memory_space<vmem>>, vector<1x8x8x32xf32>
    %188 = vector.shape_cast %187 : vector<1x8x8x32xf32> to vector<64x32xf32>
    %189 = arith.truncf %188 : vector<64x32xf32> to vector<64x32xbf16>
    %c0_265 = arith.constant 0 : index
    %c1_266 = arith.constant 1 : index
    %c5_267 = arith.constant 5 : index
    %c0_268 = arith.constant 0 : index
    %c0_269 = arith.constant 0 : index
    %190 = vector.load %arg4[%c0_265, %c1_266, %c5_267, %c0_268, %c0_269] : memref<2x2x9x32x32xbf16, #tpu.memory_space<vmem>>, vector<1x1x1x32x32xbf16>
    %191 = vector.shape_cast %190 : vector<1x1x1x32x32xbf16> to vector<32x32xbf16>
    %cst_270 = arith.constant dense<0.000000e+00> : vector<64x32xf32>
    %192 = tpu.matmul %189, %191, %cst_270 {dimension_numbers = #tpu.dot_dimension_numbers<[1], [0], [0], [1], [0, 0, 1, 1], [], []>} : vector<64x32xbf16>, vector<32x32xbf16>, vector<64x32xf32> -> vector<64x32xf32>
    %193 = arith.addf %186, %192 : vector<64x32xf32>
    %c0_271 = arith.constant 0 : index
    %c2_272 = arith.constant 2 : index
    %c0_273 = arith.constant 0 : index
    %c0_274 = arith.constant 0 : index
    %194 = vector.load %arg12[%c0_271, %c2_272, %c0_273, %c0_274] : memref<1x10x10x32xf32, #tpu.memory_space<vmem>>, vector<1x8x8x32xf32>
    %195 = vector.shape_cast %194 : vector<1x8x8x32xf32> to vector<64x32xf32>
    %196 = arith.truncf %195 : vector<64x32xf32> to vector<64x32xbf16>
    %c0_275 = arith.constant 0 : index
    %c1_276 = arith.constant 1 : index
    %c6_277 = arith.constant 6 : index
    %c0_278 = arith.constant 0 : index
    %c0_279 = arith.constant 0 : index
    %197 = vector.load %arg4[%c0_275, %c1_276, %c6_277, %c0_278, %c0_279] : memref<2x2x9x32x32xbf16, #tpu.memory_space<vmem>>, vector<1x1x1x32x32xbf16>
    %198 = vector.shape_cast %197 : vector<1x1x1x32x32xbf16> to vector<32x32xbf16>
    %cst_280 = arith.constant dense<0.000000e+00> : vector<64x32xf32>
    %199 = tpu.matmul %196, %198, %cst_280 {dimension_numbers = #tpu.dot_dimension_numbers<[1], [0], [0], [1], [0, 0, 1, 1], [], []>} : vector<64x32xbf16>, vector<32x32xbf16>, vector<64x32xf32> -> vector<64x32xf32>
    %200 = arith.addf %193, %199 : vector<64x32xf32>
    %c0_281 = arith.constant 0 : index
    %c2_282 = arith.constant 2 : index
    %c1_283 = arith.constant 1 : index
    %c0_284 = arith.constant 0 : index
    %201 = vector.load %arg12[%c0_281, %c2_282, %c1_283, %c0_284] : memref<1x10x10x32xf32, #tpu.memory_space<vmem>>, vector<1x8x8x32xf32>
    %202 = vector.shape_cast %201 : vector<1x8x8x32xf32> to vector<64x32xf32>
    %203 = arith.truncf %202 : vector<64x32xf32> to vector<64x32xbf16>
    %c0_285 = arith.constant 0 : index
    %c1_286 = arith.constant 1 : index
    %c7_287 = arith.constant 7 : index
    %c0_288 = arith.constant 0 : index
    %c0_289 = arith.constant 0 : index
    %204 = vector.load %arg4[%c0_285, %c1_286, %c7_287, %c0_288, %c0_289] : memref<2x2x9x32x32xbf16, #tpu.memory_space<vmem>>, vector<1x1x1x32x32xbf16>
    %205 = vector.shape_cast %204 : vector<1x1x1x32x32xbf16> to vector<32x32xbf16>
    %cst_290 = arith.constant dense<0.000000e+00> : vector<64x32xf32>
    %206 = tpu.matmul %203, %205, %cst_290 {dimension_numbers = #tpu.dot_dimension_numbers<[1], [0], [0], [1], [0, 0, 1, 1], [], []>} : vector<64x32xbf16>, vector<32x32xbf16>, vector<64x32xf32> -> vector<64x32xf32>
    %207 = arith.addf %200, %206 : vector<64x32xf32>
    %c0_291 = arith.constant 0 : index
    %c2_292 = arith.constant 2 : index
    %c2_293 = arith.constant 2 : index
    %c0_294 = arith.constant 0 : index
    %208 = vector.load %arg12[%c0_291, %c2_292, %c2_293, %c0_294] : memref<1x10x10x32xf32, #tpu.memory_space<vmem>>, vector<1x8x8x32xf32>
    %209 = vector.shape_cast %208 : vector<1x8x8x32xf32> to vector<64x32xf32>
    %210 = arith.truncf %209 : vector<64x32xf32> to vector<64x32xbf16>
    %c0_295 = arith.constant 0 : index
    %c1_296 = arith.constant 1 : index
    %c8_297 = arith.constant 8 : index
    %c0_298 = arith.constant 0 : index
    %c0_299 = arith.constant 0 : index
    %211 = vector.load %arg4[%c0_295, %c1_296, %c8_297, %c0_298, %c0_299] : memref<2x2x9x32x32xbf16, #tpu.memory_space<vmem>>, vector<1x1x1x32x32xbf16>
    %212 = vector.shape_cast %211 : vector<1x1x1x32x32xbf16> to vector<32x32xbf16>
    %cst_300 = arith.constant dense<0.000000e+00> : vector<64x32xf32>
    %213 = tpu.matmul %210, %212, %cst_300 {dimension_numbers = #tpu.dot_dimension_numbers<[1], [0], [0], [1], [0, 0, 1, 1], [], []>} : vector<64x32xbf16>, vector<32x32xbf16>, vector<64x32xf32> -> vector<64x32xf32>
    %214 = arith.addf %207, %213 : vector<64x32xf32>
    %215 = vector.shape_cast %214 : vector<64x32xf32> to vector<1x64x32xf32>
    %cst_301 = arith.constant dense<0.000000e+00> : vector<1x32xf32>
    %216 = vector.multi_reduction <add>, %215, %cst_301 [1] : vector<1x64x32xf32> to vector<1x32xf32>
    %cst_302 = arith.constant 1.562500e-02 : f32
    %217 = vector.broadcast %cst_302 : f32 to vector<1x32xf32>
    %218 = arith.mulf %216, %217 : vector<1x32xf32>
    %219 = arith.truncf %218 : vector<1x32xf32> to vector<1x32xbf16>
    %c0_303 = arith.constant 0 : index
    %c0_304 = arith.constant 0 : index
    %c0_305 = arith.constant 0 : index
    %220 = vector.load %arg5[%c0_303, %c0_304, %c0_305] : memref<2x32x2xbf16, #tpu.memory_space<vmem>>, vector<1x32x2xbf16>
    %221 = vector.shape_cast %220 : vector<1x32x2xbf16> to vector<32x2xbf16>
    %cst_306 = arith.constant dense<0.000000e+00> : vector<1x2xf32>
    %222 = tpu.matmul %219, %221, %cst_306 {dimension_numbers = #tpu.dot_dimension_numbers<[1], [0], [0], [1], [0, 0, 1, 1], [], []>} : vector<1x32xbf16>, vector<32x2xbf16>, vector<1x2xf32> -> vector<1x2xf32>
    %c0_307 = arith.constant 0 : index
    %c0_308 = arith.constant 0 : index
    %c0_309 = arith.constant 0 : index
    %223 = vector.load %arg6[%c0_307, %c0_308, %c0_309] : memref<2x1x2xf32, #tpu.memory_space<vmem>>, vector<1x1x2xf32>
    %224 = vector.shape_cast %223 : vector<1x1x2xf32> to vector<1x2xf32>
    %225 = arith.addf %222, %224 : vector<1x2xf32>
    %cst_310 = arith.constant 0.000000e+00 : f32
    %226 = vector.broadcast %cst_310 : f32 to vector<1x2xf32>
    %227 = arith.maximumf %225, %226 : vector<1x2xf32>
    %228 = arith.truncf %227 : vector<1x2xf32> to vector<1x2xbf16>
    %c0_311 = arith.constant 0 : index
    %c0_312 = arith.constant 0 : index
    %c0_313 = arith.constant 0 : index
    %229 = vector.load %arg7[%c0_311, %c0_312, %c0_313] : memref<2x2x32xbf16, #tpu.memory_space<vmem>>, vector<1x2x32xbf16>
    %230 = vector.shape_cast %229 : vector<1x2x32xbf16> to vector<2x32xbf16>
    %cst_314 = arith.constant dense<0.000000e+00> : vector<1x32xf32>
    %231 = tpu.matmul %228, %230, %cst_314 {dimension_numbers = #tpu.dot_dimension_numbers<[1], [0], [0], [1], [0, 0, 1, 1], [], []>} : vector<1x2xbf16>, vector<2x32xbf16>, vector<1x32xf32> -> vector<1x32xf32>
    %c0_315 = arith.constant 0 : index
    %c0_316 = arith.constant 0 : index
    %c0_317 = arith.constant 0 : index
    %232 = vector.load %arg8[%c0_315, %c0_316, %c0_317] : memref<2x1x32xf32, #tpu.memory_space<vmem>>, vector<1x1x32xf32>
    %233 = vector.shape_cast %232 : vector<1x1x32xf32> to vector<1x32xf32>
    %234 = arith.addf %231, %233 : vector<1x32xf32>
    %cst_318 = arith.constant 0.000000e+00 : f32
    %235 = vector.broadcast %cst_318 : f32 to vector<1x32xf32>
    %236 = arith.subf %235, %234 : vector<1x32xf32>
    %237 = math.exp %236 : vector<1x32xf32>
    %cst_319 = arith.constant 1.000000e+00 : f32
    %238 = vector.broadcast %cst_319 : f32 to vector<1x32xf32>
    %239 = arith.addf %238, %237 : vector<1x32xf32>
    %cst_320 = arith.constant 1.000000e+00 : f32
    %240 = vector.broadcast %cst_320 : f32 to vector<1x32xf32>
    %241 = arith.divf %240, %239 : vector<1x32xf32>
    %242 = vector.shape_cast %214 : vector<64x32xf32> to vector<1x8x8x32xf32>
    %243 = vector.shape_cast %241 : vector<1x32xf32> to vector<1x1x1x32xf32>
    %244 = vector.broadcast %243 : vector<1x1x1x32xf32> to vector<1x8x8x32xf32>
    %245 = arith.mulf %242, %244 : vector<1x8x8x32xf32>
    %246 = arith.addf %85, %245 : vector<1x8x8x32xf32>
    %cst_321 = arith.constant 0.000000e+00 : f32
    %247 = vector.broadcast %cst_321 : f32 to vector<1x8x8x32xf32>
    %248 = arith.maximumf %246, %247 : vector<1x8x8x32xf32>
    %c0_322 = arith.constant 0 : index
    %c1_323 = arith.constant 1 : index
    %c1_324 = arith.constant 1 : index
    %c0_325 = arith.constant 0 : index
    %249 = vector.load %arg12[%c0_322, %c1_323, %c1_324, %c0_325] : memref<1x10x10x32xf32, #tpu.memory_space<vmem>>, vector<1x8x8x32xf32>
    tpu.vector_store %arg12[%c0_322, %c1_323, %c1_324, %c0_325], %248 {strides = array<i32>} : memref<1x10x10x32xf32, #tpu.memory_space<vmem>>, vector<1x8x8x32xf32>,
    %c0_326 = arith.constant 0 : index
    %c0_327 = arith.constant 0 : index
    %c0_328 = arith.constant 0 : index
    %c0_329 = arith.constant 0 : index
    %250 = vector.load %arg12[%c0_326, %c0_327, %c0_328, %c0_329] : memref<1x10x10x32xf32, #tpu.memory_space<vmem>>, vector<1x8x8x32xf32>
    %251 = vector.shape_cast %250 : vector<1x8x8x32xf32> to vector<64x32xf32>
    %252 = arith.truncf %251 : vector<64x32xf32> to vector<64x32xbf16>
    %c1_330 = arith.constant 1 : index
    %c0_331 = arith.constant 0 : index
    %c0_332 = arith.constant 0 : index
    %c0_333 = arith.constant 0 : index
    %c0_334 = arith.constant 0 : index
    %253 = vector.load %arg4[%c1_330, %c0_331, %c0_332, %c0_333, %c0_334] : memref<2x2x9x32x32xbf16, #tpu.memory_space<vmem>>, vector<1x1x1x32x32xbf16>
    %254 = vector.shape_cast %253 : vector<1x1x1x32x32xbf16> to vector<32x32xbf16>
    %cst_335 = arith.constant dense<0.000000e+00> : vector<64x32xf32>
    %255 = tpu.matmul %252, %254, %cst_335 {dimension_numbers = #tpu.dot_dimension_numbers<[1], [0], [0], [1], [0, 0, 1, 1], [], []>} : vector<64x32xbf16>, vector<32x32xbf16>, vector<64x32xf32> -> vector<64x32xf32>
    %c0_336 = arith.constant 0 : index
    %c0_337 = arith.constant 0 : index
    %c1_338 = arith.constant 1 : index
    %c0_339 = arith.constant 0 : index
    %256 = vector.load %arg12[%c0_336, %c0_337, %c1_338, %c0_339] : memref<1x10x10x32xf32, #tpu.memory_space<vmem>>, vector<1x8x8x32xf32>
    %257 = vector.shape_cast %256 : vector<1x8x8x32xf32> to vector<64x32xf32>
    %258 = arith.truncf %257 : vector<64x32xf32> to vector<64x32xbf16>
    %c1_340 = arith.constant 1 : index
    %c0_341 = arith.constant 0 : index
    %c1_342 = arith.constant 1 : index
    %c0_343 = arith.constant 0 : index
    %c0_344 = arith.constant 0 : index
    %259 = vector.load %arg4[%c1_340, %c0_341, %c1_342, %c0_343, %c0_344] : memref<2x2x9x32x32xbf16, #tpu.memory_space<vmem>>, vector<1x1x1x32x32xbf16>
    %260 = vector.shape_cast %259 : vector<1x1x1x32x32xbf16> to vector<32x32xbf16>
    %cst_345 = arith.constant dense<0.000000e+00> : vector<64x32xf32>
    %261 = tpu.matmul %258, %260, %cst_345 {dimension_numbers = #tpu.dot_dimension_numbers<[1], [0], [0], [1], [0, 0, 1, 1], [], []>} : vector<64x32xbf16>, vector<32x32xbf16>, vector<64x32xf32> -> vector<64x32xf32>
    %262 = arith.addf %255, %261 : vector<64x32xf32>
    %c0_346 = arith.constant 0 : index
    %c0_347 = arith.constant 0 : index
    %c2_348 = arith.constant 2 : index
    %c0_349 = arith.constant 0 : index
    %263 = vector.load %arg12[%c0_346, %c0_347, %c2_348, %c0_349] : memref<1x10x10x32xf32, #tpu.memory_space<vmem>>, vector<1x8x8x32xf32>
    %264 = vector.shape_cast %263 : vector<1x8x8x32xf32> to vector<64x32xf32>
    %265 = arith.truncf %264 : vector<64x32xf32> to vector<64x32xbf16>
    %c1_350 = arith.constant 1 : index
    %c0_351 = arith.constant 0 : index
    %c2_352 = arith.constant 2 : index
    %c0_353 = arith.constant 0 : index
    %c0_354 = arith.constant 0 : index
    %266 = vector.load %arg4[%c1_350, %c0_351, %c2_352, %c0_353, %c0_354] : memref<2x2x9x32x32xbf16, #tpu.memory_space<vmem>>, vector<1x1x1x32x32xbf16>
    %267 = vector.shape_cast %266 : vector<1x1x1x32x32xbf16> to vector<32x32xbf16>
    %cst_355 = arith.constant dense<0.000000e+00> : vector<64x32xf32>
    %268 = tpu.matmul %265, %267, %cst_355 {dimension_numbers = #tpu.dot_dimension_numbers<[1], [0], [0], [1], [0, 0, 1, 1], [], []>} : vector<64x32xbf16>, vector<32x32xbf16>, vector<64x32xf32> -> vector<64x32xf32>
    %269 = arith.addf %262, %268 : vector<64x32xf32>
    %c0_356 = arith.constant 0 : index
    %c1_357 = arith.constant 1 : index
    %c0_358 = arith.constant 0 : index
    %c0_359 = arith.constant 0 : index
    %270 = vector.load %arg12[%c0_356, %c1_357, %c0_358, %c0_359] : memref<1x10x10x32xf32, #tpu.memory_space<vmem>>, vector<1x8x8x32xf32>
    %271 = vector.shape_cast %270 : vector<1x8x8x32xf32> to vector<64x32xf32>
    %272 = arith.truncf %271 : vector<64x32xf32> to vector<64x32xbf16>
    %c1_360 = arith.constant 1 : index
    %c0_361 = arith.constant 0 : index
    %c3_362 = arith.constant 3 : index
    %c0_363 = arith.constant 0 : index
    %c0_364 = arith.constant 0 : index
    %273 = vector.load %arg4[%c1_360, %c0_361, %c3_362, %c0_363, %c0_364] : memref<2x2x9x32x32xbf16, #tpu.memory_space<vmem>>, vector<1x1x1x32x32xbf16>
    %274 = vector.shape_cast %273 : vector<1x1x1x32x32xbf16> to vector<32x32xbf16>
    %cst_365 = arith.constant dense<0.000000e+00> : vector<64x32xf32>
    %275 = tpu.matmul %272, %274, %cst_365 {dimension_numbers = #tpu.dot_dimension_numbers<[1], [0], [0], [1], [0, 0, 1, 1], [], []>} : vector<64x32xbf16>, vector<32x32xbf16>, vector<64x32xf32> -> vector<64x32xf32>
    %276 = arith.addf %269, %275 : vector<64x32xf32>
    %c0_366 = arith.constant 0 : index
    %c1_367 = arith.constant 1 : index
    %c1_368 = arith.constant 1 : index
    %c0_369 = arith.constant 0 : index
    %277 = vector.load %arg12[%c0_366, %c1_367, %c1_368, %c0_369] : memref<1x10x10x32xf32, #tpu.memory_space<vmem>>, vector<1x8x8x32xf32>
    %278 = vector.shape_cast %277 : vector<1x8x8x32xf32> to vector<64x32xf32>
    %279 = arith.truncf %278 : vector<64x32xf32> to vector<64x32xbf16>
    %c1_370 = arith.constant 1 : index
    %c0_371 = arith.constant 0 : index
    %c4_372 = arith.constant 4 : index
    %c0_373 = arith.constant 0 : index
    %c0_374 = arith.constant 0 : index
    %280 = vector.load %arg4[%c1_370, %c0_371, %c4_372, %c0_373, %c0_374] : memref<2x2x9x32x32xbf16, #tpu.memory_space<vmem>>, vector<1x1x1x32x32xbf16>
    %281 = vector.shape_cast %280 : vector<1x1x1x32x32xbf16> to vector<32x32xbf16>
    %cst_375 = arith.constant dense<0.000000e+00> : vector<64x32xf32>
    %282 = tpu.matmul %279, %281, %cst_375 {dimension_numbers = #tpu.dot_dimension_numbers<[1], [0], [0], [1], [0, 0, 1, 1], [], []>} : vector<64x32xbf16>, vector<32x32xbf16>, vector<64x32xf32> -> vector<64x32xf32>
    %283 = arith.addf %276, %282 : vector<64x32xf32>
    %c0_376 = arith.constant 0 : index
    %c1_377 = arith.constant 1 : index
    %c2_378 = arith.constant 2 : index
    %c0_379 = arith.constant 0 : index
    %284 = vector.load %arg12[%c0_376, %c1_377, %c2_378, %c0_379] : memref<1x10x10x32xf32, #tpu.memory_space<vmem>>, vector<1x8x8x32xf32>
    %285 = vector.shape_cast %284 : vector<1x8x8x32xf32> to vector<64x32xf32>
    %286 = arith.truncf %285 : vector<64x32xf32> to vector<64x32xbf16>
    %c1_380 = arith.constant 1 : index
    %c0_381 = arith.constant 0 : index
    %c5_382 = arith.constant 5 : index
    %c0_383 = arith.constant 0 : index
    %c0_384 = arith.constant 0 : index
    %287 = vector.load %arg4[%c1_380, %c0_381, %c5_382, %c0_383, %c0_384] : memref<2x2x9x32x32xbf16, #tpu.memory_space<vmem>>, vector<1x1x1x32x32xbf16>
    %288 = vector.shape_cast %287 : vector<1x1x1x32x32xbf16> to vector<32x32xbf16>
    %cst_385 = arith.constant dense<0.000000e+00> : vector<64x32xf32>
    %289 = tpu.matmul %286, %288, %cst_385 {dimension_numbers = #tpu.dot_dimension_numbers<[1], [0], [0], [1], [0, 0, 1, 1], [], []>} : vector<64x32xbf16>, vector<32x32xbf16>, vector<64x32xf32> -> vector<64x32xf32>
    %290 = arith.addf %283, %289 : vector<64x32xf32>
    %c0_386 = arith.constant 0 : index
    %c2_387 = arith.constant 2 : index
    %c0_388 = arith.constant 0 : index
    %c0_389 = arith.constant 0 : index
    %291 = vector.load %arg12[%c0_386, %c2_387, %c0_388, %c0_389] : memref<1x10x10x32xf32, #tpu.memory_space<vmem>>, vector<1x8x8x32xf32>
    %292 = vector.shape_cast %291 : vector<1x8x8x32xf32> to vector<64x32xf32>
    %293 = arith.truncf %292 : vector<64x32xf32> to vector<64x32xbf16>
    %c1_390 = arith.constant 1 : index
    %c0_391 = arith.constant 0 : index
    %c6_392 = arith.constant 6 : index
    %c0_393 = arith.constant 0 : index
    %c0_394 = arith.constant 0 : index
    %294 = vector.load %arg4[%c1_390, %c0_391, %c6_392, %c0_393, %c0_394] : memref<2x2x9x32x32xbf16, #tpu.memory_space<vmem>>, vector<1x1x1x32x32xbf16>
    %295 = vector.shape_cast %294 : vector<1x1x1x32x32xbf16> to vector<32x32xbf16>
    %cst_395 = arith.constant dense<0.000000e+00> : vector<64x32xf32>
    %296 = tpu.matmul %293, %295, %cst_395 {dimension_numbers = #tpu.dot_dimension_numbers<[1], [0], [0], [1], [0, 0, 1, 1], [], []>} : vector<64x32xbf16>, vector<32x32xbf16>, vector<64x32xf32> -> vector<64x32xf32>
    %297 = arith.addf %290, %296 : vector<64x32xf32>
    %c0_396 = arith.constant 0 : index
    %c2_397 = arith.constant 2 : index
    %c1_398 = arith.constant 1 : index
    %c0_399 = arith.constant 0 : index
    %298 = vector.load %arg12[%c0_396, %c2_397, %c1_398, %c0_399] : memref<1x10x10x32xf32, #tpu.memory_space<vmem>>, vector<1x8x8x32xf32>
    %299 = vector.shape_cast %298 : vector<1x8x8x32xf32> to vector<64x32xf32>
    %300 = arith.truncf %299 : vector<64x32xf32> to vector<64x32xbf16>
    %c1_400 = arith.constant 1 : index
    %c0_401 = arith.constant 0 : index
    %c7_402 = arith.constant 7 : index
    %c0_403 = arith.constant 0 : index
    %c0_404 = arith.constant 0 : index
    %301 = vector.load %arg4[%c1_400, %c0_401, %c7_402, %c0_403, %c0_404] : memref<2x2x9x32x32xbf16, #tpu.memory_space<vmem>>, vector<1x1x1x32x32xbf16>
    %302 = vector.shape_cast %301 : vector<1x1x1x32x32xbf16> to vector<32x32xbf16>
    %cst_405 = arith.constant dense<0.000000e+00> : vector<64x32xf32>
    %303 = tpu.matmul %300, %302, %cst_405 {dimension_numbers = #tpu.dot_dimension_numbers<[1], [0], [0], [1], [0, 0, 1, 1], [], []>} : vector<64x32xbf16>, vector<32x32xbf16>, vector<64x32xf32> -> vector<64x32xf32>
    %304 = arith.addf %297, %303 : vector<64x32xf32>
    %c0_406 = arith.constant 0 : index
    %c2_407 = arith.constant 2 : index
    %c2_408 = arith.constant 2 : index
    %c0_409 = arith.constant 0 : index
    %305 = vector.load %arg12[%c0_406, %c2_407, %c2_408, %c0_409] : memref<1x10x10x32xf32, #tpu.memory_space<vmem>>, vector<1x8x8x32xf32>
    %306 = vector.shape_cast %305 : vector<1x8x8x32xf32> to vector<64x32xf32>
    %307 = arith.truncf %306 : vector<64x32xf32> to vector<64x32xbf16>
    %c1_410 = arith.constant 1 : index
    %c0_411 = arith.constant 0 : index
    %c8_412 = arith.constant 8 : index
    %c0_413 = arith.constant 0 : index
    %c0_414 = arith.constant 0 : index
    %308 = vector.load %arg4[%c1_410, %c0_411, %c8_412, %c0_413, %c0_414] : memref<2x2x9x32x32xbf16, #tpu.memory_space<vmem>>, vector<1x1x1x32x32xbf16>
    %309 = vector.shape_cast %308 : vector<1x1x1x32x32xbf16> to vector<32x32xbf16>
    %cst_415 = arith.constant dense<0.000000e+00> : vector<64x32xf32>
    %310 = tpu.matmul %307, %309, %cst_415 {dimension_numbers = #tpu.dot_dimension_numbers<[1], [0], [0], [1], [0, 0, 1, 1], [], []>} : vector<64x32xbf16>, vector<32x32xbf16>, vector<64x32xf32> -> vector<64x32xf32>
    %311 = arith.addf %304, %310 : vector<64x32xf32>
    %cst_416 = arith.constant 0.000000e+00 : f32
    %312 = vector.broadcast %cst_416 : f32 to vector<64x32xf32>
    %313 = arith.maximumf %311, %312 : vector<64x32xf32>
    %314 = vector.shape_cast %313 : vector<64x32xf32> to vector<1x8x8x32xf32>
    %c0_417 = arith.constant 0 : index
    %c1_418 = arith.constant 1 : index
    %c1_419 = arith.constant 1 : index
    %c0_420 = arith.constant 0 : index
    %315 = vector.load %arg12[%c0_417, %c1_418, %c1_419, %c0_420] : memref<1x10x10x32xf32, #tpu.memory_space<vmem>>, vector<1x8x8x32xf32>
    tpu.vector_store %arg12[%c0_417, %c1_418, %c1_419, %c0_420], %314 {strides = array<i32>} : memref<1x10x10x32xf32, #tpu.memory_space<vmem>>, vector<1x8x8x32xf32>,
    %c0_421 = arith.constant 0 : index
    %c0_422 = arith.constant 0 : index
    %c0_423 = arith.constant 0 : index
    %c0_424 = arith.constant 0 : index
    %316 = vector.load %arg12[%c0_421, %c0_422, %c0_423, %c0_424] : memref<1x10x10x32xf32, #tpu.memory_space<vmem>>, vector<1x8x8x32xf32>
    %317 = vector.shape_cast %316 : vector<1x8x8x32xf32> to vector<64x32xf32>
    %318 = arith.truncf %317 : vector<64x32xf32> to vector<64x32xbf16>
    %c1_425 = arith.constant 1 : index
    %c1_426 = arith.constant 1 : index
    %c0_427 = arith.constant 0 : index
    %c0_428 = arith.constant 0 : index
    %c0_429 = arith.constant 0 : index
    %319 = vector.load %arg4[%c1_425, %c1_426, %c0_427, %c0_428, %c0_429] : memref<2x2x9x32x32xbf16, #tpu.memory_space<vmem>>, vector<1x1x1x32x32xbf16>
    %320 = vector.shape_cast %319 : vector<1x1x1x32x32xbf16> to vector<32x32xbf16>
    %cst_430 = arith.constant dense<0.000000e+00> : vector<64x32xf32>
    %321 = tpu.matmul %318, %320, %cst_430 {dimension_numbers = #tpu.dot_dimension_numbers<[1], [0], [0], [1], [0, 0, 1, 1], [], []>} : vector<64x32xbf16>, vector<32x32xbf16>, vector<64x32xf32> -> vector<64x32xf32>
    %c0_431 = arith.constant 0 : index
    %c0_432 = arith.constant 0 : index
    %c1_433 = arith.constant 1 : index
    %c0_434 = arith.constant 0 : index
    %322 = vector.load %arg12[%c0_431, %c0_432, %c1_433, %c0_434] : memref<1x10x10x32xf32, #tpu.memory_space<vmem>>, vector<1x8x8x32xf32>
    %323 = vector.shape_cast %322 : vector<1x8x8x32xf32> to vector<64x32xf32>
    %324 = arith.truncf %323 : vector<64x32xf32> to vector<64x32xbf16>
    %c1_435 = arith.constant 1 : index
    %c1_436 = arith.constant 1 : index
    %c1_437 = arith.constant 1 : index
    %c0_438 = arith.constant 0 : index
    %c0_439 = arith.constant 0 : index
    %325 = vector.load %arg4[%c1_435, %c1_436, %c1_437, %c0_438, %c0_439] : memref<2x2x9x32x32xbf16, #tpu.memory_space<vmem>>, vector<1x1x1x32x32xbf16>
    %326 = vector.shape_cast %325 : vector<1x1x1x32x32xbf16> to vector<32x32xbf16>
    %cst_440 = arith.constant dense<0.000000e+00> : vector<64x32xf32>
    %327 = tpu.matmul %324, %326, %cst_440 {dimension_numbers = #tpu.dot_dimension_numbers<[1], [0], [0], [1], [0, 0, 1, 1], [], []>} : vector<64x32xbf16>, vector<32x32xbf16>, vector<64x32xf32> -> vector<64x32xf32>
    %328 = arith.addf %321, %327 : vector<64x32xf32>
    %c0_441 = arith.constant 0 : index
    %c0_442 = arith.constant 0 : index
    %c2_443 = arith.constant 2 : index
    %c0_444 = arith.constant 0 : index
    %329 = vector.load %arg12[%c0_441, %c0_442, %c2_443, %c0_444] : memref<1x10x10x32xf32, #tpu.memory_space<vmem>>, vector<1x8x8x32xf32>
    %330 = vector.shape_cast %329 : vector<1x8x8x32xf32> to vector<64x32xf32>
    %331 = arith.truncf %330 : vector<64x32xf32> to vector<64x32xbf16>
    %c1_445 = arith.constant 1 : index
    %c1_446 = arith.constant 1 : index
    %c2_447 = arith.constant 2 : index
    %c0_448 = arith.constant 0 : index
    %c0_449 = arith.constant 0 : index
    %332 = vector.load %arg4[%c1_445, %c1_446, %c2_447, %c0_448, %c0_449] : memref<2x2x9x32x32xbf16, #tpu.memory_space<vmem>>, vector<1x1x1x32x32xbf16>
    %333 = vector.shape_cast %332 : vector<1x1x1x32x32xbf16> to vector<32x32xbf16>
    %cst_450 = arith.constant dense<0.000000e+00> : vector<64x32xf32>
    %334 = tpu.matmul %331, %333, %cst_450 {dimension_numbers = #tpu.dot_dimension_numbers<[1], [0], [0], [1], [0, 0, 1, 1], [], []>} : vector<64x32xbf16>, vector<32x32xbf16>, vector<64x32xf32> -> vector<64x32xf32>
    %335 = arith.addf %328, %334 : vector<64x32xf32>
    %c0_451 = arith.constant 0 : index
    %c1_452 = arith.constant 1 : index
    %c0_453 = arith.constant 0 : index
    %c0_454 = arith.constant 0 : index
    %336 = vector.load %arg12[%c0_451, %c1_452, %c0_453, %c0_454] : memref<1x10x10x32xf32, #tpu.memory_space<vmem>>, vector<1x8x8x32xf32>
    %337 = vector.shape_cast %336 : vector<1x8x8x32xf32> to vector<64x32xf32>
    %338 = arith.truncf %337 : vector<64x32xf32> to vector<64x32xbf16>
    %c1_455 = arith.constant 1 : index
    %c1_456 = arith.constant 1 : index
    %c3_457 = arith.constant 3 : index
    %c0_458 = arith.constant 0 : index
    %c0_459 = arith.constant 0 : index
    %339 = vector.load %arg4[%c1_455, %c1_456, %c3_457, %c0_458, %c0_459] : memref<2x2x9x32x32xbf16, #tpu.memory_space<vmem>>, vector<1x1x1x32x32xbf16>
    %340 = vector.shape_cast %339 : vector<1x1x1x32x32xbf16> to vector<32x32xbf16>
    %cst_460 = arith.constant dense<0.000000e+00> : vector<64x32xf32>
    %341 = tpu.matmul %338, %340, %cst_460 {dimension_numbers = #tpu.dot_dimension_numbers<[1], [0], [0], [1], [0, 0, 1, 1], [], []>} : vector<64x32xbf16>, vector<32x32xbf16>, vector<64x32xf32> -> vector<64x32xf32>
    %342 = arith.addf %335, %341 : vector<64x32xf32>
    %c0_461 = arith.constant 0 : index
    %c1_462 = arith.constant 1 : index
    %c1_463 = arith.constant 1 : index
    %c0_464 = arith.constant 0 : index
    %343 = vector.load %arg12[%c0_461, %c1_462, %c1_463, %c0_464] : memref<1x10x10x32xf32, #tpu.memory_space<vmem>>, vector<1x8x8x32xf32>
    %344 = vector.shape_cast %343 : vector<1x8x8x32xf32> to vector<64x32xf32>
    %345 = arith.truncf %344 : vector<64x32xf32> to vector<64x32xbf16>
    %c1_465 = arith.constant 1 : index
    %c1_466 = arith.constant 1 : index
    %c4_467 = arith.constant 4 : index
    %c0_468 = arith.constant 0 : index
    %c0_469 = arith.constant 0 : index
    %346 = vector.load %arg4[%c1_465, %c1_466, %c4_467, %c0_468, %c0_469] : memref<2x2x9x32x32xbf16, #tpu.memory_space<vmem>>, vector<1x1x1x32x32xbf16>
    %347 = vector.shape_cast %346 : vector<1x1x1x32x32xbf16> to vector<32x32xbf16>
    %cst_470 = arith.constant dense<0.000000e+00> : vector<64x32xf32>
    %348 = tpu.matmul %345, %347, %cst_470 {dimension_numbers = #tpu.dot_dimension_numbers<[1], [0], [0], [1], [0, 0, 1, 1], [], []>} : vector<64x32xbf16>, vector<32x32xbf16>, vector<64x32xf32> -> vector<64x32xf32>
    %349 = arith.addf %342, %348 : vector<64x32xf32>
    %c0_471 = arith.constant 0 : index
    %c1_472 = arith.constant 1 : index
    %c2_473 = arith.constant 2 : index
    %c0_474 = arith.constant 0 : index
    %350 = vector.load %arg12[%c0_471, %c1_472, %c2_473, %c0_474] : memref<1x10x10x32xf32, #tpu.memory_space<vmem>>, vector<1x8x8x32xf32>
    %351 = vector.shape_cast %350 : vector<1x8x8x32xf32> to vector<64x32xf32>
    %352 = arith.truncf %351 : vector<64x32xf32> to vector<64x32xbf16>
    %c1_475 = arith.constant 1 : index
    %c1_476 = arith.constant 1 : index
    %c5_477 = arith.constant 5 : index
    %c0_478 = arith.constant 0 : index
    %c0_479 = arith.constant 0 : index
    %353 = vector.load %arg4[%c1_475, %c1_476, %c5_477, %c0_478, %c0_479] : memref<2x2x9x32x32xbf16, #tpu.memory_space<vmem>>, vector<1x1x1x32x32xbf16>
    %354 = vector.shape_cast %353 : vector<1x1x1x32x32xbf16> to vector<32x32xbf16>
    %cst_480 = arith.constant dense<0.000000e+00> : vector<64x32xf32>
    %355 = tpu.matmul %352, %354, %cst_480 {dimension_numbers = #tpu.dot_dimension_numbers<[1], [0], [0], [1], [0, 0, 1, 1], [], []>} : vector<64x32xbf16>, vector<32x32xbf16>, vector<64x32xf32> -> vector<64x32xf32>
    %356 = arith.addf %349, %355 : vector<64x32xf32>
    %c0_481 = arith.constant 0 : index
    %c2_482 = arith.constant 2 : index
    %c0_483 = arith.constant 0 : index
    %c0_484 = arith.constant 0 : index
    %357 = vector.load %arg12[%c0_481, %c2_482, %c0_483, %c0_484] : memref<1x10x10x32xf32, #tpu.memory_space<vmem>>, vector<1x8x8x32xf32>
    %358 = vector.shape_cast %357 : vector<1x8x8x32xf32> to vector<64x32xf32>
    %359 = arith.truncf %358 : vector<64x32xf32> to vector<64x32xbf16>
    %c1_485 = arith.constant 1 : index
    %c1_486 = arith.constant 1 : index
    %c6_487 = arith.constant 6 : index
    %c0_488 = arith.constant 0 : index
    %c0_489 = arith.constant 0 : index
    %360 = vector.load %arg4[%c1_485, %c1_486, %c6_487, %c0_488, %c0_489] : memref<2x2x9x32x32xbf16, #tpu.memory_space<vmem>>, vector<1x1x1x32x32xbf16>
    %361 = vector.shape_cast %360 : vector<1x1x1x32x32xbf16> to vector<32x32xbf16>
    %cst_490 = arith.constant dense<0.000000e+00> : vector<64x32xf32>
    %362 = tpu.matmul %359, %361, %cst_490 {dimension_numbers = #tpu.dot_dimension_numbers<[1], [0], [0], [1], [0, 0, 1, 1], [], []>} : vector<64x32xbf16>, vector<32x32xbf16>, vector<64x32xf32> -> vector<64x32xf32>
    %363 = arith.addf %356, %362 : vector<64x32xf32>
    %c0_491 = arith.constant 0 : index
    %c2_492 = arith.constant 2 : index
    %c1_493 = arith.constant 1 : index
    %c0_494 = arith.constant 0 : index
    %364 = vector.load %arg12[%c0_491, %c2_492, %c1_493, %c0_494] : memref<1x10x10x32xf32, #tpu.memory_space<vmem>>, vector<1x8x8x32xf32>
    %365 = vector.shape_cast %364 : vector<1x8x8x32xf32> to vector<64x32xf32>
    %366 = arith.truncf %365 : vector<64x32xf32> to vector<64x32xbf16>
    %c1_495 = arith.constant 1 : index
    %c1_496 = arith.constant 1 : index
    %c7_497 = arith.constant 7 : index
    %c0_498 = arith.constant 0 : index
    %c0_499 = arith.constant 0 : index
    %367 = vector.load %arg4[%c1_495, %c1_496, %c7_497, %c0_498, %c0_499] : memref<2x2x9x32x32xbf16, #tpu.memory_space<vmem>>, vector<1x1x1x32x32xbf16>
    %368 = vector.shape_cast %367 : vector<1x1x1x32x32xbf16> to vector<32x32xbf16>
    %cst_500 = arith.constant dense<0.000000e+00> : vector<64x32xf32>
    %369 = tpu.matmul %366, %368, %cst_500 {dimension_numbers = #tpu.dot_dimension_numbers<[1], [0], [0], [1], [0, 0, 1, 1], [], []>} : vector<64x32xbf16>, vector<32x32xbf16>, vector<64x32xf32> -> vector<64x32xf32>
    %370 = arith.addf %363, %369 : vector<64x32xf32>
    %c0_501 = arith.constant 0 : index
    %c2_502 = arith.constant 2 : index
    %c2_503 = arith.constant 2 : index
    %c0_504 = arith.constant 0 : index
    %371 = vector.load %arg12[%c0_501, %c2_502, %c2_503, %c0_504] : memref<1x10x10x32xf32, #tpu.memory_space<vmem>>, vector<1x8x8x32xf32>
    %372 = vector.shape_cast %371 : vector<1x8x8x32xf32> to vector<64x32xf32>
    %373 = arith.truncf %372 : vector<64x32xf32> to vector<64x32xbf16>
    %c1_505 = arith.constant 1 : index
    %c1_506 = arith.constant 1 : index
    %c8_507 = arith.constant 8 : index
    %c0_508 = arith.constant 0 : index
    %c0_509 = arith.constant 0 : index
    %374 = vector.load %arg4[%c1_505, %c1_506, %c8_507, %c0_508, %c0_509] : memref<2x2x9x32x32xbf16, #tpu.memory_space<vmem>>, vector<1x1x1x32x32xbf16>
    %375 = vector.shape_cast %374 : vector<1x1x1x32x32xbf16> to vector<32x32xbf16>
    %cst_510 = arith.constant dense<0.000000e+00> : vector<64x32xf32>
    %376 = tpu.matmul %373, %375, %cst_510 {dimension_numbers = #tpu.dot_dimension_numbers<[1], [0], [0], [1], [0, 0, 1, 1], [], []>} : vector<64x32xbf16>, vector<32x32xbf16>, vector<64x32xf32> -> vector<64x32xf32>
    %377 = arith.addf %370, %376 : vector<64x32xf32>
    %378 = vector.shape_cast %377 : vector<64x32xf32> to vector<1x64x32xf32>
    %cst_511 = arith.constant dense<0.000000e+00> : vector<1x32xf32>
    %379 = vector.multi_reduction <add>, %378, %cst_511 [1] : vector<1x64x32xf32> to vector<1x32xf32>
    %cst_512 = arith.constant 1.562500e-02 : f32
    %380 = vector.broadcast %cst_512 : f32 to vector<1x32xf32>
    %381 = arith.mulf %379, %380 : vector<1x32xf32>
    %382 = arith.truncf %381 : vector<1x32xf32> to vector<1x32xbf16>
    %c1_513 = arith.constant 1 : index
    %c0_514 = arith.constant 0 : index
    %c0_515 = arith.constant 0 : index
    %383 = vector.load %arg5[%c1_513, %c0_514, %c0_515] : memref<2x32x2xbf16, #tpu.memory_space<vmem>>, vector<1x32x2xbf16>
    %384 = vector.shape_cast %383 : vector<1x32x2xbf16> to vector<32x2xbf16>
    %cst_516 = arith.constant dense<0.000000e+00> : vector<1x2xf32>
    %385 = tpu.matmul %382, %384, %cst_516 {dimension_numbers = #tpu.dot_dimension_numbers<[1], [0], [0], [1], [0, 0, 1, 1], [], []>} : vector<1x32xbf16>, vector<32x2xbf16>, vector<1x2xf32> -> vector<1x2xf32>
    %c1_517 = arith.constant 1 : index
    %c0_518 = arith.constant 0 : index
    %c0_519 = arith.constant 0 : index
    %386 = vector.load %arg6[%c1_517, %c0_518, %c0_519] : memref<2x1x2xf32, #tpu.memory_space<vmem>>, vector<1x1x2xf32>
    %387 = vector.shape_cast %386 : vector<1x1x2xf32> to vector<1x2xf32>
    %388 = arith.addf %385, %387 : vector<1x2xf32>
    %cst_520 = arith.constant 0.000000e+00 : f32
    %389 = vector.broadcast %cst_520 : f32 to vector<1x2xf32>
    %390 = arith.maximumf %388, %389 : vector<1x2xf32>
    %391 = arith.truncf %390 : vector<1x2xf32> to vector<1x2xbf16>
    %c1_521 = arith.constant 1 : index
    %c0_522 = arith.constant 0 : index
    %c0_523 = arith.constant 0 : index
    %392 = vector.load %arg7[%c1_521, %c0_522, %c0_523] : memref<2x2x32xbf16, #tpu.memory_space<vmem>>, vector<1x2x32xbf16>
    %393 = vector.shape_cast %392 : vector<1x2x32xbf16> to vector<2x32xbf16>
    %cst_524 = arith.constant dense<0.000000e+00> : vector<1x32xf32>
    %394 = tpu.matmul %391, %393, %cst_524 {dimension_numbers = #tpu.dot_dimension_numbers<[1], [0], [0], [1], [0, 0, 1, 1], [], []>} : vector<1x2xbf16>, vector<2x32xbf16>, vector<1x32xf32> -> vector<1x32xf32>
    %c1_525 = arith.constant 1 : index
    %c0_526 = arith.constant 0 : index
    %c0_527 = arith.constant 0 : index
    %395 = vector.load %arg8[%c1_525, %c0_526, %c0_527] : memref<2x1x32xf32, #tpu.memory_space<vmem>>, vector<1x1x32xf32>
    %396 = vector.shape_cast %395 : vector<1x1x32xf32> to vector<1x32xf32>
    %397 = arith.addf %394, %396 : vector<1x32xf32>
    %cst_528 = arith.constant 0.000000e+00 : f32
    %398 = vector.broadcast %cst_528 : f32 to vector<1x32xf32>
    %399 = arith.subf %398, %397 : vector<1x32xf32>
    %400 = math.exp %399 : vector<1x32xf32>
    %cst_529 = arith.constant 1.000000e+00 : f32
    %401 = vector.broadcast %cst_529 : f32 to vector<1x32xf32>
    %402 = arith.addf %401, %400 : vector<1x32xf32>
    %cst_530 = arith.constant 1.000000e+00 : f32
    %403 = vector.broadcast %cst_530 : f32 to vector<1x32xf32>
    %404 = arith.divf %403, %402 : vector<1x32xf32>
    %405 = vector.shape_cast %377 : vector<64x32xf32> to vector<1x8x8x32xf32>
    %406 = vector.shape_cast %404 : vector<1x32xf32> to vector<1x1x1x32xf32>
    %407 = vector.broadcast %406 : vector<1x1x1x32xf32> to vector<1x8x8x32xf32>
    %408 = arith.mulf %405, %407 : vector<1x8x8x32xf32>
    %409 = arith.addf %248, %408 : vector<1x8x8x32xf32>
    %410 = vector.extract_strided_slice %409 {offsets = [0, 0, 0, 0], sizes = [1, 8, 1, 32], strides = [1, 1, 1, 1]} : vector<1x8x8x32xf32> to vector<1x8x1x32xf32>
    %411 = vector.shape_cast %410 : vector<1x8x1x32xf32> to vector<1x8x32xf32>
    %c0_531 = arith.constant 0 : index
    %c0_532 = arith.constant 0 : index
    %c0_533 = arith.constant 0 : index
    %412 = vector.load %arg9[%c0_531, %c0_532, %c0_533] : memref<1x8x256xf32, #tpu.memory_space<vmem>>, vector<1x8x32xf32>
    tpu.vector_store %arg9[%c0_531, %c0_532, %c0_533], %411 {strides = array<i32>} : memref<1x8x256xf32, #tpu.memory_space<vmem>>, vector<1x8x32xf32>,
    %413 = vector.extract_strided_slice %409 {offsets = [0, 0, 1, 0], sizes = [1, 8, 1, 32], strides = [1, 1, 1, 1]} : vector<1x8x8x32xf32> to vector<1x8x1x32xf32>
    %414 = vector.shape_cast %413 : vector<1x8x1x32xf32> to vector<1x8x32xf32>
    %c0_534 = arith.constant 0 : index
    %c0_535 = arith.constant 0 : index
    %c32 = arith.constant 32 : index
    %415 = vector.load %arg9[%c0_534, %c0_535, %c32] : memref<1x8x256xf32, #tpu.memory_space<vmem>>, vector<1x8x32xf32>
    tpu.vector_store %arg9[%c0_534, %c0_535, %c32], %414 {strides = array<i32>} : memref<1x8x256xf32, #tpu.memory_space<vmem>>, vector<1x8x32xf32>,
    %416 = vector.extract_strided_slice %409 {offsets = [0, 0, 2, 0], sizes = [1, 8, 1, 32], strides = [1, 1, 1, 1]} : vector<1x8x8x32xf32> to vector<1x8x1x32xf32>
    %417 = vector.shape_cast %416 : vector<1x8x1x32xf32> to vector<1x8x32xf32>
    %c0_536 = arith.constant 0 : index
    %c0_537 = arith.constant 0 : index
    %c64 = arith.constant 64 : index
    %418 = vector.load %arg9[%c0_536, %c0_537, %c64] : memref<1x8x256xf32, #tpu.memory_space<vmem>>, vector<1x8x32xf32>
    tpu.vector_store %arg9[%c0_536, %c0_537, %c64], %417 {strides = array<i32>} : memref<1x8x256xf32, #tpu.memory_space<vmem>>, vector<1x8x32xf32>,
    %419 = vector.extract_strided_slice %409 {offsets = [0, 0, 3, 0], sizes = [1, 8, 1, 32], strides = [1, 1, 1, 1]} : vector<1x8x8x32xf32> to vector<1x8x1x32xf32>
    %420 = vector.shape_cast %419 : vector<1x8x1x32xf32> to vector<1x8x32xf32>
    %c0_538 = arith.constant 0 : index
    %c0_539 = arith.constant 0 : index
    %c96 = arith.constant 96 : index
    %421 = vector.load %arg9[%c0_538, %c0_539, %c96] : memref<1x8x256xf32, #tpu.memory_space<vmem>>, vector<1x8x32xf32>
    tpu.vector_store %arg9[%c0_538, %c0_539, %c96], %420 {strides = array<i32>} : memref<1x8x256xf32, #tpu.memory_space<vmem>>, vector<1x8x32xf32>,
    %422 = vector.extract_strided_slice %409 {offsets = [0, 0, 4, 0], sizes = [1, 8, 1, 32], strides = [1, 1, 1, 1]} : vector<1x8x8x32xf32> to vector<1x8x1x32xf32>
    %423 = vector.shape_cast %422 : vector<1x8x1x32xf32> to vector<1x8x32xf32>
    %c0_540 = arith.constant 0 : index
    %c0_541 = arith.constant 0 : index
    %c128 = arith.constant 128 : index
    %424 = vector.load %arg9[%c0_540, %c0_541, %c128] : memref<1x8x256xf32, #tpu.memory_space<vmem>>, vector<1x8x32xf32>
    tpu.vector_store %arg9[%c0_540, %c0_541, %c128], %423 {strides = array<i32>} : memref<1x8x256xf32, #tpu.memory_space<vmem>>, vector<1x8x32xf32>,
    %425 = vector.extract_strided_slice %409 {offsets = [0, 0, 5, 0], sizes = [1, 8, 1, 32], strides = [1, 1, 1, 1]} : vector<1x8x8x32xf32> to vector<1x8x1x32xf32>
    %426 = vector.shape_cast %425 : vector<1x8x1x32xf32> to vector<1x8x32xf32>
    %c0_542 = arith.constant 0 : index
    %c0_543 = arith.constant 0 : index
    %c160 = arith.constant 160 : index
    %427 = vector.load %arg9[%c0_542, %c0_543, %c160] : memref<1x8x256xf32, #tpu.memory_space<vmem>>, vector<1x8x32xf32>
    tpu.vector_store %arg9[%c0_542, %c0_543, %c160], %426 {strides = array<i32>} : memref<1x8x256xf32, #tpu.memory_space<vmem>>, vector<1x8x32xf32>,
    %428 = vector.extract_strided_slice %409 {offsets = [0, 0, 6, 0], sizes = [1, 8, 1, 32], strides = [1, 1, 1, 1]} : vector<1x8x8x32xf32> to vector<1x8x1x32xf32>
    %429 = vector.shape_cast %428 : vector<1x8x1x32xf32> to vector<1x8x32xf32>
    %c0_544 = arith.constant 0 : index
    %c0_545 = arith.constant 0 : index
    %c192 = arith.constant 192 : index
    %430 = vector.load %arg9[%c0_544, %c0_545, %c192] : memref<1x8x256xf32, #tpu.memory_space<vmem>>, vector<1x8x32xf32>
    tpu.vector_store %arg9[%c0_544, %c0_545, %c192], %429 {strides = array<i32>} : memref<1x8x256xf32, #tpu.memory_space<vmem>>, vector<1x8x32xf32>,
    %431 = vector.extract_strided_slice %409 {offsets = [0, 0, 7, 0], sizes = [1, 8, 1, 32], strides = [1, 1, 1, 1]} : vector<1x8x8x32xf32> to vector<1x8x1x32xf32>
    %432 = vector.shape_cast %431 : vector<1x8x1x32xf32> to vector<1x8x32xf32>
    %c0_546 = arith.constant 0 : index
    %c0_547 = arith.constant 0 : index
    %c224 = arith.constant 224 : index
    %433 = vector.load %arg9[%c0_546, %c0_547, %c224] : memref<1x8x256xf32, #tpu.memory_space<vmem>>, vector<1x8x32xf32>
    tpu.vector_store %arg9[%c0_546, %c0_547, %c224], %432 {strides = array<i32>} : memref<1x8x256xf32, #tpu.memory_space<vmem>>, vector<1x8x32xf32>,
    return
  }
  func.func @transform_0(%arg0: i32) -> (i32, i32, i32, i32) {
    %c0_i32 = arith.constant 0 : i32
    %c0_i32_0 = arith.constant 0 : i32
    %c0_i32_1 = arith.constant 0 : i32
    %c0_i32_2 = arith.constant 0 : i32
    return %arg0, %c0_i32, %c0_i32_0, %c0_i32_1 : i32, i32, i32, i32
  }
  func.func @transform_1(%arg0: i32) -> (i32, i32, i32) {
    %c0_i32 = arith.constant 0 : i32
    %c0_i32_0 = arith.constant 0 : i32
    %c0_i32_1 = arith.constant 0 : i32
    %c0_i32_2 = arith.constant 0 : i32
    return %c0_i32, %c0_i32_0, %c0_i32_1 : i32, i32, i32
  }
  func.func @transform_2(%arg0: i32) -> (i32, i32) {
    %c0_i32 = arith.constant 0 : i32
    %c0_i32_0 = arith.constant 0 : i32
    %c0_i32_1 = arith.constant 0 : i32
    return %c0_i32, %c0_i32_0 : i32, i32
  }
  func.func @transform_3(%arg0: i32) -> (i32, i32, i32, i32, i32) {
    %c0_i32 = arith.constant 0 : i32
    %c0_i32_0 = arith.constant 0 : i32
    %c0_i32_1 = arith.constant 0 : i32
    %c0_i32_2 = arith.constant 0 : i32
    %c0_i32_3 = arith.constant 0 : i32
    %c0_i32_4 = arith.constant 0 : i32
    return %c0_i32, %c0_i32_0, %c0_i32_1, %c0_i32_2, %c0_i32_3 : i32, i32, i32, i32, i32
  }
  func.func @transform_4(%arg0: i32) -> (i32, i32, i32) {
    %c0_i32 = arith.constant 0 : i32
    %c0_i32_0 = arith.constant 0 : i32
    %c0_i32_1 = arith.constant 0 : i32
    %c0_i32_2 = arith.constant 0 : i32
    return %c0_i32, %c0_i32_0, %c0_i32_1 : i32, i32, i32
  }
  func.func @transform_5(%arg0: i32) -> (i32, i32, i32) {
    %c0_i32 = arith.constant 0 : i32
    %c0_i32_0 = arith.constant 0 : i32
    %c0_i32_1 = arith.constant 0 : i32
    %c0_i32_2 = arith.constant 0 : i32
    return %c0_i32, %c0_i32_0, %c0_i32_1 : i32, i32, i32
  }
  func.func @transform_6(%arg0: i32) -> (i32, i32, i32) {
    %c0_i32 = arith.constant 0 : i32
    %c0_i32_0 = arith.constant 0 : i32
    %c0_i32_1 = arith.constant 0 : i32
    %c0_i32_2 = arith.constant 0 : i32
    return %c0_i32, %c0_i32_0, %c0_i32_1 : i32, i32, i32
  }
  func.func @transform_7(%arg0: i32) -> (i32, i32, i32) {
    %c0_i32 = arith.constant 0 : i32
    %c0_i32_0 = arith.constant 0 : i32
    %c0_i32_1 = arith.constant 0 : i32
    %c0_i32_2 = arith.constant 0 : i32
    return %c0_i32, %c0_i32_0, %c0_i32_1 : i32, i32, i32
  }
  func.func @transform_8(%arg0: i32) -> (i32, i32, i32) {
    %c0_i32 = arith.constant 0 : i32
    %c0_i32_0 = arith.constant 0 : i32
    %c0_i32_1 = arith.constant 0 : i32
    return %arg0, %c0_i32, %c0_i32_0 : i32, i32, i32
  }
}

</mosaic_0001>

<bundles_post_ra>
// kernel: _lambda_.1
= control target key start
LH: loop header
LB: loop body
LE: loop exit
PB: predicated region body
PF: predicated region fallthrough
CT: control target
= control target key end

     0   :  { %s10429_s27 = smov 0   ;;  %s12323_s0 = inlined_call_operand.vmem [shape: f32[2,18,18,4], index: 0, kind: input, shape index: {}]   ;;  %s12324_s1 = inlined_call_operand.vmem [shape: bf16[9,4,32], index: 1, kind: input, shape index: {}]   ;;  %s12325_s2 = inlined_call_operand.vmem [shape: f32[1,32], index: 2, kind: input, shape index: {}]   ;;  %s12326_s3 = inlined_call_operand.vmem [shape: bf16[2,2,9,32,32], index: 3, kind: input, shape index: {}]   ;;  %s12327_s4 = inlined_call_operand.vmem [shape: bf16[2,32,2], index: 4, kind: input, shape index: {}]   ;;  %s12328_s5 = inlined_call_operand.vmem [shape: f32[2,1,2], index: 5, kind: input, shape index: {}]   ;;  %s12329_s6 = inlined_call_operand.vmem [shape: bf16[2,2,32], index: 6, kind: input, shape index: {}]   ;;  %s12330_s7 = inlined_call_operand.vmem [shape: f32[2,1,32], index: 7, kind: input, shape index: {}]   ;;  %s12331_s8 = inlined_call_operand.vmem [shape: f32[2,8,256], index: 8, kind: output, shape index: {}]  }
   0x1 LB: > { %s7878_s28 = sadd.s32 4294967295, %s10376_s27   ;;  %p7882_p0 = scmp.ge.s32.totalorder %s10376_s27, 1  ;;  %s10376_s27 = sphi %s10429_s27, %s18_s27  }
   0x2   : > { %p262_p1 = scmp.lt.s32.totalorder %s10376_s27, 3 }
   0x4   : > { %p263_p2 = pnand %p7882_p0, %p262_p1 }
   0x5   : > { %v7886_v0 = vld [vmem:[%s12324_s1 + $0x2] sm:$0x3] (!%p263_p2)  ;;  %vm543_vm0 = vcmask (!%p263_p2), 1041408   ;;  %p296_p3 = scmp.lt.s32.totalorder (!%p263_p2), %s7878_s28, 1  ;;  %v443_v2 = vld [vmem:[%s12324_s1] sm:$0x3] (!%p263_p2) }
   0x6   : > { %266 = sbr.rel (%p263_p2) target bundleno = 3369 (0xd29), region = 52  ;;  %10262 = vmatprep.subr.msk.bf16.mxu0 (!%p263_p2), %vm543_vm0, %v7886_v0  ;;  %v545_v1 = vsel (!%p263_p2), %vm543_vm0, %v7886_v0, 0  ;;  %vm494_vm1 = vcmask (!%p263_p2), 31744   ;;  %v757_v11 = vsel (!%p263_p2), %vm543_vm0, %v443_v2, 0  ;;  %v10469_v13 = vld [vmem:[%s12324_s1 + $0x4] sm:$0x3] (!%p263_p2) }
   0x7   : > { %8985 = vmatpush3.bf16.msra.mxu0 (!%p263_p2), %v545_v1  ;;  %v1019_v59 = vsel (!%p263_p2), %vm543_vm0, %v10469_v13, 0  ;;  %v10571_v63 = vld [vmem:[%s12324_s1 + $0x6] sm:$0x3] (!%p263_p2)  ;;  %vm307_vm2 = vcmask (!%p263_p2), 261120   ;;  %vm310_vm3 = vcmask (!%p263_p2), 254976   ;;  %vm10380_vm4 = vmmov (!%p263_p2), 0  }
   0x8   : > { %10263 = vmatprep.subr.msk.bf16.mxu0 (!%p263_p2), %vm543_vm0, %v443_v2  ;;  %vm5380_vm5 = vcmask (!%p263_p2), 1040384   ;;  %vm5376_vm6 = vcmask (!%p263_p2), 15360   ;;  %vm7674_vm7 = vcmask (!%p263_p2), 1041409   ;;  %vm7677_vm8 = vcmask (!%p263_p2), 1042434   ;;  %s10381_s15 = smov (!%p263_p2), 64   ;;  %s10382_s16 = smov (!%p263_p2), 32  }
   0x9   : > { %vm7680_vm9 = vcmask (!%p263_p2), 1043459   ;;  %vm7683_vm10 = vcmask (!%p263_p2), 1044484   ;;  %vm7686_vm11 = vcmask (!%p263_p2), 1045509   ;;  %vm7689_vm12 = vcmask (!%p263_p2), 1046534   ;;  %s10383_s17 = smov (!%p263_p2), 96  }
   0xa   : > { %vm7692_vm13 = vcmask (!%p263_p2), 1047559   ;;  %vm7713_vm14 = vcmask (!%p263_p2), 523520   ;;  %vm7732_vm15 = vcmask (!%p263_p2), 785920  }
   0xd   : > { %s12333_s28 = smov (!%p296_p3, %s7878_s28), 1 }
   0xe   : > { %s10271_s11 = smul.u32 432, %s12333_s28  ;;  %s8604_s18 = sshll.u32 %s12333_s28, 4 }
   0xf   : > { %s305_s20 = scalar_lea.vmem %s12331_s8, %s8604_s18 }
  0x10   : > { %s10452_s14 = scalar_lea.vmem %s12323_s0, %s10271_s11 }
  0x11   : > { %v444_v3 = vld [vmem:[%s10452_s14 + $0x1] sm:$0xff]  ;;  %v445_v4 = vld [vmem:[%s10452_s14 + $0x9] sm:$0xff]  ;;  %v446_v5 = vld [vmem:[%s10452_s14 + $0x19] sm:$0xff] }
  0x12   : > { %v476_v6 = vpack.c.bf16 %v445_v4, %v444_v3  ;;  %v447_v7 = vld [vmem:[%s10452_s14 + $0x21] sm:$0xff]  ;;  %v448_v8 = vld [vmem:[%s10452_s14 + $0x31] sm:$0xff]  ;;  %v449_v9 = vld [vmem:[%s10452_s14 + $0x39] sm:$0xff] }
  0x13   : > { %v10460_v10 = vpack.c.bf16 %v447_v7, %v446_v5  ;;  %v10463_v12 = vpack.c.bf16 %v449_v9, %v448_v8  ;;  %v450_v14 = vld [vmem:[%s10452_s14 + $0x49] sm:$0xff]  ;;  %v451_v15 = vld [vmem:[%s10452_s14 + $0x51] sm:$0xff]  ;;  %v452_v16 = vld [vmem:[%s10452_s14 + $0x61] sm:$0xff] }
  0x14   : > { %8986 = vmatprep.mubr.msk.bf16.mxu0 %vm494_vm1, %v476_v6  ;;  %v453_v17 = vld [vmem:[%s10452_s14 + $0x69] sm:$0xff]  ;;  %v10481_v18 = vpack.c.bf16 %v451_v15, %v450_v14  ;;  %v454_v20 = vld [vmem:[%s10452_s14 + $0x79] sm:$0xff]  ;;  %v455_v21 = vld [vmem:[%s10452_s14 + $0x81] sm:$0xff] }
  0x15   : > { %8987 = vmatmul.mubr.msk.bf16.vlgmr.msra.gmra.mrb[0].mxu0 %vm494_vm1, %v10460_v10  ;;  %v10483_v19 = vpack.c.bf16 %v453_v17, %v452_v16  ;;  %v456_v22 = vld [vmem:[%s10452_s14 + $0x91] sm:$0xff]  ;;  %v457_v23 = vld [vmem:[%s10452_s14 + $0x99] sm:$0xff]  ;;  %v10493_v24 = vpack.c.bf16 %v455_v21, %v454_v20  ;;  %v458_v26 = vld [vmem:[%s10452_s14 + $0xa9] sm:$0xff] }
  0x16   : > { %9019 = vmatpush3.bf16.msra.mxu0 %v757_v11  ;;  %8990 = vmatprep.mubr.msk.bf16.mxu0 %vm494_vm1, %v10463_v12  ;;  %v10495_v25 = vpack.c.bf16 %v457_v23, %v456_v22  ;;  %v459_v27 = vld [vmem:[%s10452_s14 + $0xb1] sm:$0xff]  ;;  %v460_v28 = vld [vmem:[%s10452_s14 + $0xc1] sm:$0xff]  ;;  %v461_v29 = vld [vmem:[%s10452_s14 + $0xc9] sm:$0xff] }
  0x17   : > { %10264 = vmatprep.subr.msk.bf16.mxu0 %vm543_vm0, %v10469_v13  ;;  %v10505_v30 = vpack.c.bf16 %v459_v27, %v458_v26  ;;  %v10507_v31 = vpack.c.bf16 %v461_v29, %v460_v28  ;;  %v462_v32 = vld [vmem:[%s10452_s14 + $0xd9] sm:$0xff]  ;;  %v463_v33 = vld [vmem:[%s10452_s14 + $0xe1] sm:$0xff]  ;;  %v464_v34 = vld [vmem:[%s10452_s14 + $0xf1] sm:$0xff] }
  0x18   : > { %v465_v35 = vld [vmem:[%s10452_s14 + $0xf9] sm:$0xff]  ;;  %v10517_v36 = vpack.c.bf16 %v463_v33, %v462_v32  ;;  %v466_v38 = vld [vmem:[%s10452_s14 + $0x109] sm:$0xff]  ;;  %v467_v39 = vld [vmem:[%s10452_s14 + $0x111] sm:$0xff] }
  0x19   : > { %v10519_v37 = vpack.c.bf16 %v465_v35, %v464_v34  ;;  %v468_v40 = vld [vmem:[%s10452_s14 + $0x121] sm:$0xff]  ;;  %v469_v41 = vld [vmem:[%s10452_s14 + $0x129] sm:$0xff]  ;;  %v10529_v42 = vpack.c.bf16 %v467_v39, %v466_v38  ;;  %v470_v44 = vld [vmem:[%s10452_s14 + $0x139] sm:$0xff] }
  0x1a   : > { %v10531_v43 = vpack.c.bf16 %v469_v41, %v468_v40  ;;  %v471_v45 = vld [vmem:[%s10452_s14 + $0x141] sm:$0xff]  ;;  %v472_v46 = vld [vmem:[%s10452_s14 + $0x151] sm:$0xff]  ;;  %v473_v47 = vld [vmem:[%s10452_s14 + $0x159] sm:$0xff] }
  0x1b   : > { %v10541_v48 = vpack.c.bf16 %v471_v45, %v470_v44  ;;  %v10543_v49 = vpack.c.bf16 %v473_v47, %v472_v46  ;;  %v474_v50 = vld [vmem:[%s10452_s14 + $0x169] sm:$0xff]  ;;  %v475_v51 = vld [vmem:[%s10452_s14 + $0x171] sm:$0xff]  ;;  %v395_v52 = vld [vmem:[%s10452_s14] sm:$0xff] }
  0x1c   : > { %v396_v53 = vld [vmem:[%s10452_s14 + $0x8] sm:$0xff]  ;;  %v10553_v54 = vpack.c.bf16 %v475_v51, %v474_v50  ;;  %v397_v56 = vld [vmem:[%s10452_s14 + $0x18] sm:$0xff]  ;;  %v398_v57 = vld [vmem:[%s10452_s14 + $0x20] sm:$0xff] }
  0x1d   : > { %8991 = vmatmul.mubr.msk.bf16.gmra.mrb[4].mxu0 %vm494_vm1, %v10481_v18  ;;  %v427_v55 = vpack.c.bf16 %v396_v53, %v395_v52  ;;  %v399_v58 = vld [vmem:[%s10452_s14 + $0x30] sm:$0xff]  ;;  %v400_v60 = vld [vmem:[%s10452_s14 + $0x38] sm:$0xff]  ;;  %v10564_v61 = vpack.c.bf16 %v398_v57, %v397_v56  ;;  %v401_v0 = vld [vmem:[%s10452_s14 + $0x48] sm:$0xff] }
  0x1e   : > { %8994 = vmatprep.mubr.msk.bf16.mxu0 %vm494_vm1, %v10483_v19  ;;  %v10566_v62 = vpack.c.bf16 %v400_v60, %v399_v58  ;;  %v402_v1 = vld [vmem:[%s10452_s14 + $0x50] sm:$0xff]  ;;  %v403_v2 = vld [vmem:[%s10452_s14 + $0x60] sm:$0xff]  ;;  %v404_v3 = vld [vmem:[%s10452_s14 + $0x68] sm:$0xff] }
  0x1f   : > { %v10583_v4 = vpack.c.bf16 %v402_v1, %v401_v0  ;;  %v10585_v5 = vpack.c.bf16 %v404_v3, %v403_v2  ;;  %v405_v6 = vld [vmem:[%s10452_s14 + $0x78] sm:$0xff]  ;;  %v406_v7 = vld [vmem:[%s10452_s14 + $0x80] sm:$0xff]  ;;  %v407_v8 = vld [vmem:[%s10452_s14 + $0x90] sm:$0xff]  ;;  %v1314_v2 = vsel %vm543_vm0, %v10571_v63, 0 }
  0x20   : > { %v408_v9 = vld [vmem:[%s10452_s14 + $0x98] sm:$0xff]  ;;  %v10595_v11 = vpack.c.bf16 %v406_v7, %v405_v6  ;;  %v409_v14 = vld [vmem:[%s10452_s14 + $0xa8] sm:$0xff]  ;;  %v410_v15 = vld [vmem:[%s10452_s14 + $0xb0] sm:$0xff] }
  0x21   : > { %v10597_v13 = vpack.c.bf16 %v408_v9, %v407_v8  ;;  %v411_v16 = vld [vmem:[%s10452_s14 + $0xc0] sm:$0xff]  ;;  %v412_v17 = vld [vmem:[%s10452_s14 + $0xc8] sm:$0xff]  ;;  %v10607_v20 = vpack.c.bf16 %v410_v15, %v409_v14  ;;  %v413_v22 = vld [vmem:[%s10452_s14 + $0xd8] sm:$0xff] }
  0x22   : > { %v10609_v21 = vpack.c.bf16 %v412_v17, %v411_v16  ;;  %v414_v23 = vld [vmem:[%s10452_s14 + $0xe0] sm:$0xff]  ;;  %v415_v26 = vld [vmem:[%s10452_s14 + $0xf0] sm:$0xff]  ;;  %v416_v27 = vld [vmem:[%s10452_s14 + $0xf8] sm:$0xff] }
  0x23   : > { %v10619_v28 = vpack.c.bf16 %v414_v23, %v413_v22  ;;  %v10621_v29 = vpack.c.bf16 %v416_v27, %v415_v26  ;;  %v417_v32 = vld [vmem:[%s10452_s14 + $0x108] sm:$0xff]  ;;  %v418_v33 = vld [vmem:[%s10452_s14 + $0x110] sm:$0xff]  ;;  %v419_v34 = vld [vmem:[%s10452_s14 + $0x120] sm:$0xff] }
  0x24   : > { %v420_v35 = vld [vmem:[%s10452_s14 + $0x128] sm:$0xff]  ;;  %v10631_v38 = vpack.c.bf16 %v418_v33, %v417_v32  ;;  %v421_v40 = vld [vmem:[%s10452_s14 + $0x138] sm:$0xff]  ;;  %v422_v41 = vld [vmem:[%s10452_s14 + $0x140] sm:$0xff] }
  0x25   : > { %8995 = vmatmul.mubr.msk.bf16.gmra.mrb[8].mxu0 %vm494_vm1, %v10493_v24  ;;  %v10633_v39 = vpack.c.bf16 %v420_v35, %v419_v34  ;;  %v423_v44 = vld [vmem:[%s10452_s14 + $0x150] sm:$0xff]  ;;  %v424_v45 = vld [vmem:[%s10452_s14 + $0x158] sm:$0xff]  ;;  %v10643_v46 = vpack.c.bf16 %v422_v41, %v421_v40  ;;  %v425_v50 = vld [vmem:[%s10452_s14 + $0x168] sm:$0xff] }
  0x26   : > { %8998 = vmatprep.mubr.msk.bf16.mxu0 %vm494_vm1, %v10495_v25  ;;  %v10645_v47 = vpack.c.bf16 %v424_v45, %v423_v44  ;;  %v426_v51 = vld [vmem:[%s10452_s14 + $0x170] sm:$0xff]  ;;  %v920_v52 = vld [vmem:[%s10452_s14 + $0x2] sm:$0xff]  ;;  %v922_v57 = vld [vmem:[%s10452_s14 + $0x1a] sm:$0xff] }
  0x27   : > { %v921_v53 = vld [vmem:[%s10452_s14 + $0xa] sm:$0xff]  ;;  %v923_v58 = vld [vmem:[%s10452_s14 + $0x22] sm:$0xff]  ;;  %v925_v60 = vld [vmem:[%s10452_s14 + $0x3a] sm:$0xff] }
  0x28   : > { %v952_v56 = vpack.c.bf16 %v921_v53, %v920_v52  ;;  %v10664_v0 = vpack.c.bf16 %v923_v58, %v922_v57  ;;  %v8017_v3 = vld [vmem:[%s12324_s1 + $0x8] sm:$0x3]  ;;  %v926_v6 = vld [vmem:[%s10452_s14 + $0x4a] sm:$0xff]  ;;  %v927_v7 = vld [vmem:[%s10452_s14 + $0x52] sm:$0xff] }
  0x29   : > { %v928_v8 = vld [vmem:[%s10452_s14 + $0x62] sm:$0xff]  ;;  %v929_v9 = vld [vmem:[%s10452_s14 + $0x6a] sm:$0xff]  ;;  %v930_v15 = vld [vmem:[%s10452_s14 + $0x7a] sm:$0xff] }
  0x2a   : > { %v10684_v14 = vpack.c.bf16 %v929_v9, %v928_v8  ;;  %v931_v16 = vld [vmem:[%s10452_s14 + $0x82] sm:$0xff]  ;;  %v932_v17 = vld [vmem:[%s10452_s14 + $0x92] sm:$0xff]  ;;  %v933_v22 = vld [vmem:[%s10452_s14 + $0x9a] sm:$0xff] }
  0x2b   : > { %v10694_v23 = vpack.c.bf16 %v931_v16, %v930_v15  ;;  %v10696_v26 = vpack.c.bf16 %v933_v22, %v932_v17  ;;  %v934_v27 = vld [vmem:[%s10452_s14 + $0xaa] sm:$0xff]  ;;  %v935_v32 = vld [vmem:[%s10452_s14 + $0xb2] sm:$0xff]  ;;  %v936_v33 = vld [vmem:[%s10452_s14 + $0xc2] sm:$0xff] }
  0x2c   : > { %v937_v34 = vld [vmem:[%s10452_s14 + $0xca] sm:$0xff]  ;;  %v10706_v35 = vpack.c.bf16 %v935_v32, %v934_v27  ;;  %v938_v41 = vld [vmem:[%s10452_s14 + $0xda] sm:$0xff]  ;;  %v939_v44 = vld [vmem:[%s10452_s14 + $0xe2] sm:$0xff]  ;;  %v1608_v27 = vsel %vm543_vm0, %v8017_v3, 0 }
  0x2d   : > { %8999 = vmatmul.mubr.msk.bf16.gmra.mrb[12].mxu0 %vm494_vm1, %v10505_v30  ;;  %v10708_v40 = vpack.c.bf16 %v937_v34, %v936_v33  ;;  %v940_v45 = vld [vmem:[%s10452_s14 + $0xf2] sm:$0xff]  ;;  %v942_v53 = vld [vmem:[%s10452_s14 + $0x10a] sm:$0xff]  ;;  %v944_v57 = vld [vmem:[%s10452_s14 + $0x122] sm:$0xff] }
  0x2e   : > { %9002 = vmatprep.mubr.msk.bf16.mxu0 %vm494_vm1, %v10507_v31  ;;  %v945_v58 = vld [vmem:[%s10452_s14 + $0x12a] sm:$0xff]  ;;  %v949_v8 = vld [vmem:[%s10452_s14 + $0x15a] sm:$0xff]  ;;  %v951_v17 = vld [vmem:[%s10452_s14 + $0x172] sm:$0xff] }
  0x2f   : > { %v950_v16 = vld [vmem:[%s10452_s14 + $0x16a] sm:$0xff] }
  0x30   : > { %v10752_v22 = vpack.c.bf16 %v951_v17, %v950_v16  ;;  %v8066_v32 = vld [vmem:[%s12324_s1 + $0xa] sm:$0x3] }
  0x31   : > { %v1902_v34 = vsel %vm543_vm0, %v8066_v32, 0 }
  0x35   : > { %9003 = vmatmul.mubr.msk.bf16.gmra.mrb[16].mxu0 %vm494_vm1, %v10517_v36 }
  0x36   : > { %9006 = vmatprep.mubr.msk.bf16.mxu0 %vm494_vm1, %v10519_v37 }
  0x3d   : > { %9007 = vmatmul.mubr.msk.bf16.gmra.mrb[20].mxu0 %vm494_vm1, %v10529_v42 }
  0x3e   : > { %9010 = vmatprep.mubr.msk.bf16.mxu0 %vm494_vm1, %v10531_v43 }
  0x45   : > { %9011 = vmatmul.mubr.msk.bf16.gmra.mrb[24].mxu0 %vm494_vm1, %v10541_v48 }
  0x46   : > { %9014 = vmatprep.mubr.msk.bf16.mxu0 %vm494_vm1, %v10543_v49 }
  0x4d   : > { %9015 = vmatmul.mubr.msk.bf16.gmra.mrb[28].mxu0 %vm494_vm1, %v10553_v54 }
  0x4e   : > { %9020 = vmatprep.mubr.msk.bf16.mxu0 %vm494_vm1, %v427_v55  ;;  %v10655_v55 = vpack.c.bf16 %v426_v51, %v425_v50  ;;  %v941_v50 = vld [vmem:[%s10452_s14 + $0xfa] sm:$0xff]  ;;  %v10718_v51 = vpack.c.bf16 %v939_v44, %v938_v41  ;;  %v8115_v41 = vld [vmem:[%s12324_s1 + $0xc] sm:$0x3] }
  0x4f   : > { %v10720_v52 = vpack.c.bf16 %v941_v50, %v940_v45  ;;  %v8016_v44 = vld [vmem:[%s10452_s14 + $0x189] sm:$0xff]  ;;  %v2197_v50 = vsel %vm543_vm0, %v8115_v41, 0 }
  0x55   : > { %9021 = vmatmul.mubr.msk.bf16.vlgmr.msra.gmra.mrb[0].mxu0 %vm494_vm1, %v10564_v61 }
  0x56   : > { %9053 = vmatpush3.bf16.msra.mxu0 %v1019_v59  ;;  %9024 = vmatprep.mubr.msk.bf16.mxu0 %vm494_vm1, %v10566_v62  ;;  %v924_v59 = vld [vmem:[%s10452_s14 + $0x32] sm:$0xff] }
  0x57   : > { %10265 = vmatprep.subr.msk.bf16.mxu0 %vm543_vm0, %v10571_v63  ;;  %v10666_v1 = vpack.c.bf16 %v925_v60, %v924_v59  ;;  %v10682_v63 = vpack.c.bf16 %v927_v7, %v926_v6  ;;  %v10732_v60 = vpack.c.bf16 %v945_v58, %v944_v57  ;;  %v947_v6 = vld [vmem:[%s10452_s14 + $0x142] sm:$0xff]  ;;  %v948_v7 = vld [vmem:[%s10452_s14 + $0x152] sm:$0xff] }
  0x58   : > { %v10744_v15 = vpack.c.bf16 %v949_v8, %v948_v7 }
  0x5d   : > { %9025 = vmatmul.mubr.msk.bf16.gmra.mrb[4].mxu0 %vm494_vm1, %v10583_v4 }
  0x5e   : > { %9028 = vmatprep.mubr.msk.bf16.mxu0 %vm494_vm1, %v10585_v5 }
  0x65   : > { %9029 = vmatmul.mubr.msk.bf16.gmra.mrb[8].mxu0 %vm494_vm1, %v10595_v11 }
  0x66   : > { %9032 = vmatprep.mubr.msk.bf16.mxu0 %vm494_vm1, %v10597_v13 }
  0x6d   : > { %9033 = vmatmul.mubr.msk.bf16.gmra.mrb[12].mxu0 %vm494_vm1, %v10607_v20 }
  0x6e   : > { %9036 = vmatprep.mubr.msk.bf16.mxu0 %vm494_vm1, %v10609_v21 }
  0x75   : > { %9037 = vmatmul.mubr.msk.bf16.gmra.mrb[16].mxu0 %vm494_vm1, %v10619_v28 }
  0x76   : > { %9040 = vmatprep.mubr.msk.bf16.mxu0 %vm494_vm1, %v10621_v29 }
  0x7d   : > { %9041 = vmatmul.mubr.msk.bf16.gmra.mrb[20].mxu0 %vm494_vm1, %v10631_v38 }
  0x7e   : > { %9044 = vmatprep.mubr.msk.bf16.mxu0 %vm494_vm1, %v10633_v39 }
  0x85   : > { %9045 = vmatmul.mubr.msk.bf16.gmra.mrb[24].mxu0 %vm494_vm1, %v10643_v46 }
  0x86   : > { %9048 = vmatprep.mubr.msk.bf16.mxu0 %vm494_vm1, %v10645_v47 }
  0x8d   : > { %9049 = vmatmul.mubr.msk.bf16.gmra.mrb[28].mxu0 %vm494_vm1, %v10655_v55 }
  0x8e   : > { %9054 = vmatprep.mubr.msk.bf16.mxu0 %vm494_vm1, %v952_v56  ;;  %v943_v56 = vld [vmem:[%s10452_s14 + $0x112] sm:$0xff] }
  0x8f   : > { %v10730_v59 = vpack.c.bf16 %v943_v56, %v942_v53  ;;  %v8164_v53 = vld [vmem:[%s12324_s1 + $0xe] sm:$0x3] }
  0x90   : > { %v8065_v56 = vld [vmem:[%s10452_s14 + $0x18a] sm:$0xff]  ;;  %v2491_v58 = vsel %vm543_vm0, %v8164_v53, 0 }
  0x95   : > { %9055 = vmatmul.mubr.msk.bf16.vlgmr.msra.gmra.mrb[0].mxu0 %vm494_vm1, %v10664_v0 }
  0x96   : > { %9087 = vmatpush3.bf16.msra.mxu0 %v1314_v2  ;;  %9058 = vmatprep.mubr.msk.bf16.mxu0 %vm494_vm1, %v10666_v1  ;;  %v946_v2 = vld [vmem:[%s10452_s14 + $0x13a] sm:$0xff] }
  0x97   : > { %10266 = vmatprep.subr.msk.bf16.mxu0 %vm543_vm0, %v8017_v3  ;;  %v10742_v9 = vpack.c.bf16 %v947_v6, %v946_v2  ;;  %v7967_v3 = vld [vmem:[%s10452_s14 + $0x188] sm:$0xff]  ;;  %v10885_v2 = vld [vmem:[%s12324_s1 + $0x10] sm:$0x3] }
  0x9d   : > { %9059 = vmatmul.mubr.msk.bf16.gmra.mrb[4].mxu0 %vm494_vm1, %v10682_v63 }
  0x9e   : > { %9062 = vmatprep.mubr.msk.bf16.mxu0 %vm494_vm1, %v10684_v14 }
  0xa5   : > { %9063 = vmatmul.mubr.msk.bf16.gmra.mrb[8].mxu0 %vm494_vm1, %v10694_v23 }
  0xa6   : > { %9066 = vmatprep.mubr.msk.bf16.mxu0 %vm494_vm1, %v10696_v26 }
  0xad   : > { %9067 = vmatmul.mubr.msk.bf16.gmra.mrb[12].mxu0 %vm494_vm1, %v10706_v35 }
  0xae   : > { %9070 = vmatprep.mubr.msk.bf16.mxu0 %vm494_vm1, %v10708_v40 }
  0xb5   : > { %9071 = vmatmul.mubr.msk.bf16.gmra.mrb[16].mxu0 %vm494_vm1, %v10718_v51 }
  0xb6   : > { %9074 = vmatprep.mubr.msk.bf16.mxu0 %vm494_vm1, %v10720_v52 }
  0xbd   : > { %9075 = vmatmul.mubr.msk.bf16.gmra.mrb[20].mxu0 %vm494_vm1, %v10730_v59 }
  0xbe   : > { %9078 = vmatprep.mubr.msk.bf16.mxu0 %vm494_vm1, %v10732_v60 }
  0xc5   : > { %9079 = vmatmul.mubr.msk.bf16.gmra.mrb[24].mxu0 %vm494_vm1, %v10742_v9 }
  0xc6   : > { %9082 = vmatprep.mubr.msk.bf16.mxu0 %vm494_vm1, %v10744_v15 }
  0xcd   : > { %9083 = vmatmul.mubr.msk.bf16.gmra.mrb[28].mxu0 %vm494_vm1, %v10752_v22 }
  0xce   : > { %9088 = vmatprep.mubr.msk.bf16.mxu0 %vm494_vm1, %v10564_v61  ;;  %v7966_v61 = vld [vmem:[%s10452_s14 + $0x180] sm:$0xff] }
  0xcf   : > { %v10793_v33 = vpack.c.bf16 %v7967_v3, %v7966_v61 }
  0xd5   : > { %9089 = vmatmul.mubr.msk.bf16.vlgmr.msra.gmra.mrb[0].mxu0 %vm494_vm1, %v10566_v62 }
  0xd6   : > { %9121 = vmatpush3.bf16.msra.mxu0 %v1608_v27  ;;  %9092 = vmatprep.mubr.msk.bf16.mxu0 %vm494_vm1, %v10583_v4 }
  0xd7   : > { %10267 = vmatprep.subr.msk.bf16.mxu0 %vm543_vm0, %v8066_v32 }
  0xdd   : > { %9093 = vmatmul.mubr.msk.bf16.gmra.mrb[4].mxu0 %vm494_vm1, %v10585_v5 }
  0xde   : > { %9096 = vmatprep.mubr.msk.bf16.mxu0 %vm494_vm1, %v10595_v11 }
  0xe5   : > { %9097 = vmatmul.mubr.msk.bf16.gmra.mrb[8].mxu0 %vm494_vm1, %v10597_v13 }
  0xe6   : > { %9100 = vmatprep.mubr.msk.bf16.mxu0 %vm494_vm1, %v10607_v20 }
  0xed   : > { %9101 = vmatmul.mubr.msk.bf16.gmra.mrb[12].mxu0 %vm494_vm1, %v10609_v21 }
  0xee   : > { %9104 = vmatprep.mubr.msk.bf16.mxu0 %vm494_vm1, %v10619_v28 }
  0xf5   : > { %9105 = vmatmul.mubr.msk.bf16.gmra.mrb[16].mxu0 %vm494_vm1, %v10621_v29 }
  0xf6   : > { %9108 = vmatprep.mubr.msk.bf16.mxu0 %vm494_vm1, %v10631_v38 }
  0xfd   : > { %9109 = vmatmul.mubr.msk.bf16.gmra.mrb[20].mxu0 %vm494_vm1, %v10633_v39 }
  0xfe   : > { %9112 = vmatprep.mubr.msk.bf16.mxu0 %vm494_vm1, %v10643_v46 }
 0x105   : > { %9113 = vmatmul.mubr.msk.bf16.gmra.mrb[24].mxu0 %vm494_vm1, %v10645_v47 }
 0x106   : > { %9116 = vmatprep.mubr.msk.bf16.mxu0 %vm494_vm1, %v10655_v55 }
 0x10d   : > { %9117 = vmatmul.mubr.msk.bf16.gmra.mrb[28].mxu0 %vm494_vm1, %v10793_v33 }
 0x10e   : > { %9122 = vmatprep.mubr.msk.bf16.mxu0 %vm494_vm1, %v10460_v10  ;;  %v8015_v10 = vld [vmem:[%s10452_s14 + $0x181] sm:$0xff] }
 0x10f   : > { %v10834_v45 = vpack.c.bf16 %v8016_v44, %v8015_v10 }
 0x115   : > { %9123 = vmatmul.mubr.msk.bf16.vlgmr.msra.gmra.mrb[0].mxu0 %vm494_vm1, %v10463_v12 }
 0x116   : > { %9155 = vmatpush3.bf16.msra.mxu0 %v1902_v34  ;;  %9126 = vmatprep.mubr.msk.bf16.mxu0 %vm494_vm1, %v10481_v18 }
 0x117   : > { %10268 = vmatprep.subr.msk.bf16.mxu0 %vm543_vm0, %v8115_v41 }
 0x11d   : > { %9127 = vmatmul.mubr.msk.bf16.gmra.mrb[4].mxu0 %vm494_vm1, %v10483_v19 }
 0x11e   : > { %9130 = vmatprep.mubr.msk.bf16.mxu0 %vm494_vm1, %v10493_v24 }
 0x125   : > { %9131 = vmatmul.mubr.msk.bf16.gmra.mrb[8].mxu0 %vm494_vm1, %v10495_v25 }
 0x126   : > { %9134 = vmatprep.mubr.msk.bf16.mxu0 %vm494_vm1, %v10505_v30 }
 0x12d   : > { %9135 = vmatmul.mubr.msk.bf16.gmra.mrb[12].mxu0 %vm494_vm1, %v10507_v31 }
 0x12e   : > { %9138 = vmatprep.mubr.msk.bf16.mxu0 %vm494_vm1, %v10517_v36 }
 0x135   : > { %9139 = vmatmul.mubr.msk.bf16.gmra.mrb[16].mxu0 %vm494_vm1, %v10519_v37 }
 0x136   : > { %9142 = vmatprep.mubr.msk.bf16.mxu0 %vm494_vm1, %v10529_v42 }
 0x13d   : > { %9143 = vmatmul.mubr.msk.bf16.gmra.mrb[20].mxu0 %vm494_vm1, %v10531_v43 }
 0x13e   : > { %9146 = vmatprep.mubr.msk.bf16.mxu0 %vm494_vm1, %v10541_v48 }
 0x145   : > { %9147 = vmatmul.mubr.msk.bf16.gmra.mrb[24].mxu0 %vm494_vm1, %v10543_v49 }
 0x146   : > { %9150 = vmatprep.mubr.msk.bf16.mxu0 %vm494_vm1, %v10553_v54 }
 0x14d   : > { %9151 = vmatmul.mubr.msk.bf16.gmra.mrb[28].mxu0 %vm494_vm1, %v10834_v45 }
 0x14e   : > { %9156 = vmatprep.mubr.msk.bf16.mxu0 %vm494_vm1, %v10664_v0  ;;  %v8064_v0 = vld [vmem:[%s10452_s14 + $0x182] sm:$0xff] }
 0x14f   : > { %v10875_v57 = vpack.c.bf16 %v8065_v56, %v8064_v0 }
 0x155   : > { %9157 = vmatmul.mubr.msk.bf16.vlgmr.msra.gmra.mrb[0].mxu0 %vm494_vm1, %v10666_v1 }
 0x156   : > { %9189 = vmatpush3.bf16.msra.mxu0 %v2197_v50  ;;  %9160 = vmatprep.mubr.msk.bf16.mxu0 %vm494_vm1, %v10682_v63 }
 0x157   : > { %10269 = vmatprep.subr.msk.bf16.mxu0 %vm543_vm0, %v8164_v53 }
 0x15d   : > { %9161 = vmatmul.mubr.msk.bf16.gmra.mrb[4].mxu0 %vm494_vm1, %v10684_v14 }
 0x15e   : > { %9164 = vmatprep.mubr.msk.bf16.mxu0 %vm494_vm1, %v10694_v23 }
 0x165   : > { %9165 = vmatmul.mubr.msk.bf16.gmra.mrb[8].mxu0 %vm494_vm1, %v10696_v26 }
 0x166   : > { %9168 = vmatprep.mubr.msk.bf16.mxu0 %vm494_vm1, %v10706_v35 }
 0x16d   : > { %9169 = vmatmul.mubr.msk.bf16.gmra.mrb[12].mxu0 %vm494_vm1, %v10708_v40 }
 0x16e   : > { %9172 = vmatprep.mubr.msk.bf16.mxu0 %vm494_vm1, %v10718_v51 }
 0x175   : > { %9173 = vmatmul.mubr.msk.bf16.gmra.mrb[16].mxu0 %vm494_vm1, %v10720_v52 }
 0x176   : > { %9176 = vmatprep.mubr.msk.bf16.mxu0 %vm494_vm1, %v10730_v59 }
 0x17d   : > { %9177 = vmatmul.mubr.msk.bf16.gmra.mrb[20].mxu0 %vm494_vm1, %v10732_v60 }
 0x17e   : > { %9180 = vmatprep.mubr.msk.bf16.mxu0 %vm494_vm1, %v10742_v9 }
 0x185   : > { %9181 = vmatmul.mubr.msk.bf16.gmra.mrb[24].mxu0 %vm494_vm1, %v10744_v15 }
 0x186   : > { %9184 = vmatprep.mubr.msk.bf16.mxu0 %vm494_vm1, %v10752_v22 }
 0x18d   : > { %9185 = vmatmul.mubr.msk.bf16.gmra.mrb[28].mxu0 %vm494_vm1, %v10875_v57 }
 0x18e   : > { %9190 = vmatprep.mubr.msk.bf16.mxu0 %vm494_vm1, %v10566_v62  ;;  %v8113_v62 = vld [vmem:[%s10452_s14 + $0x198] sm:$0xff] }
 0x195   : > { %9191 = vmatmul.mubr.msk.bf16.vlgmr.msra.gmra.mrb[0].mxu0 %vm494_vm1, %v10583_v4  ;;  %v8114_v4 = vld [vmem:[%s10452_s14 + $0x1a0] sm:$0xff] }
 0x196   : > { %9223 = vmatpush3.bf16.msra.mxu0 %v2491_v58  ;;  %9194 = vmatprep.mubr.msk.bf16.mxu0 %vm494_vm1, %v10585_v5  ;;  %v2145_v5 = vpack.c.bf16 %v8114_v4, %v8113_v62 }
 0x197   : > { %10270 = vmatprep.subr.msk.bf16.mxu0 %vm543_vm0, %v10885_v2 }
 0x19d   : > { %9195 = vmatmul.mubr.msk.bf16.gmra.mrb[4].mxu0 %vm494_vm1, %v10595_v11  ;;  %v10378_v11 = vmov -inf  }
 0x19e   : > { %9198 = vmatprep.mubr.msk.bf16.mxu0 %vm494_vm1, %v10597_v13  ;;  %312 = vst.msk [vmem:[#allocation2 + $0x18] sm:$0xff] %vm307_vm2, %v10378_v11  ;;  %313 = vst.msk [vmem:[#allocation2 + $0x20] sm:$0xff] %vm307_vm2, %v10378_v11 }
 0x19f   : > { %308 = vst.msk [vmem:[#allocation2] sm:$0xff] %vm307_vm2, %v10378_v11  ;;  %309 = vst.msk [vmem:[#allocation2 + $0x8] sm:$0xff] %vm307_vm2, %v10378_v11 }
 0x1a0   : > { %315 = vst.msk [vmem:[#allocation2 + $0x30] sm:$0xff] %vm307_vm2, %v10378_v11  ;;  %316 = vst.msk [vmem:[#allocation2 + $0x38] sm:$0xff] %vm307_vm2, %v10378_v11 }
 0x1a1   : > { %318 = vst.msk [vmem:[#allocation2 + $0x48] sm:$0xff] %vm307_vm2, %v10378_v11  ;;  %319 = vst.msk [vmem:[#allocation2 + $0x50] sm:$0xff] %vm307_vm2, %v10378_v11 }
 0x1a2   : > { %321 = vst.msk [vmem:[#allocation2 + $0x60] sm:$0xff] %vm307_vm2, %v10378_v11  ;;  %322 = vst.msk [vmem:[#allocation2 + $0x68] sm:$0xff] %vm307_vm2, %v10378_v11 }
 0x1a3   : > { %324 = vst.msk [vmem:[#allocation2 + $0x78] sm:$0xff] %vm307_vm2, %v10378_v11  ;;  %325 = vst.msk [vmem:[#allocation2 + $0x80] sm:$0xff] %vm307_vm2, %v10378_v11 }
 0x1a4   : > { %327 = vst.msk [vmem:[#allocation2 + $0x90] sm:$0xff] %vm307_vm2, %v10378_v11  ;;  %328 = vst.msk [vmem:[#allocation2 + $0x98] sm:$0xff] %vm307_vm2, %v10378_v11 }
 0x1a5   : > { %9199 = vmatmul.mubr.msk.bf16.gmra.mrb[8].mxu0 %vm494_vm1, %v10607_v20  ;;  %330 = vst.msk [vmem:[#allocation2 + $0xa8] sm:$0xff] %vm307_vm2, %v10378_v11  ;;  %331 = vst.msk [vmem:[#allocation2 + $0xb0] sm:$0xff] %vm307_vm2, %v10378_v11 }
 0x1a6   : > { %9202 = vmatprep.mubr.msk.bf16.mxu0 %vm494_vm1, %v10609_v21  ;;  %333 = vst.msk [vmem:[#allocation2 + $0xc0] sm:$0xff] %vm307_vm2, %v10378_v11  ;;  %334 = vst.msk [vmem:[#allocation2 + $0xc8] sm:$0xff] %vm307_vm2, %v10378_v11 }
 0x1a7   : > { %336 = vst.msk [vmem:[#allocation2 + $0xd8] sm:$0xff] %vm307_vm2, %v10378_v11  ;;  %337 = vst.msk [vmem:[#allocation2 + $0xe0] sm:$0xff] %vm307_vm2, %v10378_v11 }
 0x1a8   : > { %339 = vst.msk [vmem:[#allocation2 + $0xf0] sm:$0xff] %vm307_vm2, %v10378_v11  ;;  %340 = vst.msk [vmem:[#allocation2 + $0xf8] sm:$0xff] %vm307_vm2, %v10378_v11 }
 0x1a9   : > { %342 = vst.msk [vmem:[#allocation2 + $0x108] sm:$0xff] %vm307_vm2, %v10378_v11  ;;  %343 = vst.msk [vmem:[#allocation2 + $0x110] sm:$0xff] %vm307_vm2, %v10378_v11 }
 0x1aa   : > { %345 = vst.msk [vmem:[#allocation2 + $0x120] sm:$0xff] %vm307_vm2, %v10378_v11  ;;  %346 = vst.msk [vmem:[#allocation2 + $0x128] sm:$0xff] %vm307_vm2, %v10378_v11 }
 0x1ab   : > { %348 = vst.msk [vmem:[#allocation2 + $0x138] sm:$0xff] %vm307_vm2, %v10378_v11  ;;  %349 = vst.msk [vmem:[#allocation2 + $0x140] sm:$0xff] %vm307_vm2, %v10378_v11 }
 0x1ac   : > { %351 = vst.msk [vmem:[#allocation2 + $0x150] sm:$0xff] %vm307_vm2, %v10378_v11  ;;  %352 = vst.msk [vmem:[#allocation2 + $0x158] sm:$0xff] %vm307_vm2, %v10378_v11 }
 0x1ad   : > { %9203 = vmatmul.mubr.msk.bf16.gmra.mrb[12].mxu0 %vm494_vm1, %v10619_v28  ;;  %354 = vst.msk [vmem:[#allocation2 + $0x168] sm:$0xff] %vm307_vm2, %v10378_v11  ;;  %355 = vst.msk [vmem:[#allocation2 + $0x170] sm:$0xff] %vm307_vm2, %v10378_v11 }
 0x1ae   : > { %9206 = vmatprep.mubr.msk.bf16.mxu0 %vm494_vm1, %v10621_v29  ;;  %357 = vst.msk [vmem:[#allocation3] sm:$0xff] %vm307_vm2, %v10378_v11  ;;  %358 = vst.msk [vmem:[#allocation3 + $0x8] sm:$0xff] %vm307_vm2, %v10378_v11 }
 0x1af   : > { %359 = vst.msk [vmem:[#allocation3 + $0x10] sm:$0xff] %vm307_vm2, %v10378_v11  ;;  %360 = vst.msk [vmem:[#allocation3 + $0x18] sm:$0xff] %vm307_vm2, %v10378_v11 }
 0x1b0   : > { %361 = vst.msk [vmem:[#allocation3 + $0x20] sm:$0xff] %vm307_vm2, %v10378_v11  ;;  %362 = vst.msk [vmem:[#allocation3 + $0x28] sm:$0xff] %vm307_vm2, %v10378_v11 }
 0x1b1   : > { %363 = vst.msk [vmem:[#allocation3 + $0x30] sm:$0xff] %vm307_vm2, %v10378_v11  ;;  %364 = vst.msk [vmem:[#allocation3 + $0x38] sm:$0xff] %vm307_vm2, %v10378_v11 }
 0x1b2   : > { %365 = vst.msk [vmem:[#allocation3 + $0x40] sm:$0xff] %vm307_vm2, %v10378_v11  ;;  %366 = vst.msk [vmem:[#allocation3 + $0x48] sm:$0xff] %vm307_vm2, %v10378_v11 }
 0x1b3   : > { %367 = vst.msk [vmem:[#allocation3 + $0x50] sm:$0xff] %vm307_vm2, %v10378_v11  ;;  %368 = vst.msk [vmem:[#allocation3 + $0x58] sm:$0xff] %vm307_vm2, %v10378_v11 }
 0x1b4   : > { %369 = vst.msk [vmem:[#allocation3 + $0x60] sm:$0xff] %vm307_vm2, %v10378_v11  ;;  %370 = vst.msk [vmem:[#allocation3 + $0x68] sm:$0xff] %vm307_vm2, %v10378_v11 }
 0x1b5   : > { %9207 = vmatmul.mubr.msk.bf16.gmra.mrb[16].mxu0 %vm494_vm1, %v10631_v38  ;;  %371 = vst.msk [vmem:[#allocation3 + $0x70] sm:$0xff] %vm307_vm2, %v10378_v11  ;;  %372 = vst.msk [vmem:[#allocation3 + $0x78] sm:$0xff] %vm307_vm2, %v10378_v11  ;;  %v3195_v0 = vld [vmem:[#allocation3] sm:$0xff] }
 0x1b6   : > { %9210 = vmatprep.mubr.msk.bf16.mxu0 %vm494_vm1, %v10633_v39  ;;  %373 = vst.msk [vmem:[#allocation3 + $0x80] sm:$0xff] %vm307_vm2, %v10378_v11 }
 0x1b7   : > { %314 = vst.msk [vmem:[#allocation2 + $0x28] sm:$0x3] %vm310_vm3, %v10378_v11  ;;  %311 = vst.msk [vmem:[#allocation2 + $0x10] sm:$0x3] %vm310_vm3, %v10378_v11 }
 0x1b8   : > { %317 = vst.msk [vmem:[#allocation2 + $0x40] sm:$0x3] %vm310_vm3, %v10378_v11  ;;  %320 = vst.msk [vmem:[#allocation2 + $0x58] sm:$0x3] %vm310_vm3, %v10378_v11 }
 0x1b9   : > { %323 = vst.msk [vmem:[#allocation2 + $0x70] sm:$0x3] %vm310_vm3, %v10378_v11  ;;  %326 = vst.msk [vmem:[#allocation2 + $0x88] sm:$0x3] %vm310_vm3, %v10378_v11 }
 0x1ba   : > { %329 = vst.msk [vmem:[#allocation2 + $0xa0] sm:$0x3] %vm310_vm3, %v10378_v11  ;;  %332 = vst.msk [vmem:[#allocation2 + $0xb8] sm:$0x3] %vm310_vm3, %v10378_v11 }
 0x1bb   : > { %335 = vst.msk [vmem:[#allocation2 + $0xd0] sm:$0x3] %vm310_vm3, %v10378_v11  ;;  %338 = vst.msk [vmem:[#allocation2 + $0xe8] sm:$0x3] %vm310_vm3, %v10378_v11 }
 0x1bc   : > { %341 = vst.msk [vmem:[#allocation2 + $0x100] sm:$0x3] %vm310_vm3, %v10378_v11  ;;  %344 = vst.msk [vmem:[#allocation2 + $0x118] sm:$0x3] %vm310_vm3, %v10378_v11 }
 0x1bd   : > { %9211 = vmatmul.mubr.msk.bf16.gmra.mrb[20].mxu0 %vm494_vm1, %v10643_v46  ;;  %347 = vst.msk [vmem:[#allocation2 + $0x130] sm:$0x3] %vm310_vm3, %v10378_v11  ;;  %350 = vst.msk [vmem:[#allocation2 + $0x148] sm:$0x3] %vm310_vm3, %v10378_v11 }
 0x1be   : > { %9214 = vmatprep.mubr.msk.bf16.mxu0 %vm494_vm1, %v10645_v47  ;;  %353 = vst.msk [vmem:[#allocation2 + $0x160] sm:$0x3] %vm310_vm3, %v10378_v11  ;;  %356 = vst.msk [vmem:[#allocation2 + $0x178] sm:$0x3] %vm310_vm3, %v10378_v11 }
 0x1c5   : > { %9215 = vmatmul.mubr.msk.bf16.gmra.mrb[24].mxu0 %vm494_vm1, %v10655_v55 }
 0x1c6   : > { %9218 = vmatprep.mubr.msk.bf16.mxu0 %vm494_vm1, %v10793_v33 }
 0x1cd   : > { %9219 = vmatmul.mubr.msk.bf16.gmra.mrb[28].mxu0 %vm494_vm1, %v2145_v5 }
 0x1ce   : > { %9224 = vmatprep.mubr.msk.bf16.mxu0 %vm494_vm1, %v10463_v12  ;;  %v2785_v12 = vsel %vm543_vm0, %v10885_v2, 0  ;;  %vm7751_vm0 = vcmask 1048320  }
 0x1d5   : > { %9225 = vmatmul.mubr.msk.bf16.vlgmr.msra.gmra.mrb[0].mxu0 %vm494_vm1, %v10481_v18  ;;  %v8162_v18 = vld [vmem:[%s10452_s14 + $0x199] sm:$0xff] }
 0x1d6   : > { %9257 = vmatpush3.bf16.msra.mxu0 %v2785_v12  ;;  %9228 = vmatprep.mubr.msk.bf16.mxu0 %vm494_vm1, %v10483_v19  ;;  %v8163_v19 = vld [vmem:[%s10452_s14 + $0x1a1] sm:$0xff] }
 0x1dd   : > { %9229 = vmatmul.mubr.msk.bf16.gmra.mrb[4].mxu0 %vm494_vm1, %v10493_v24  ;;  %v2439_v24 = vpack.c.bf16 %v8163_v19, %v8162_v18 }
 0x1de   : > { %9232 = vmatprep.mubr.msk.bf16.mxu0 %vm494_vm1, %v10495_v25  ;;  %v8211_v25 = vld [vmem:[%s10452_s14 + $0x19a] sm:$0xff] }
 0x1e5   : > { %9233 = vmatmul.mubr.msk.bf16.gmra.mrb[8].mxu0 %vm494_vm1, %v10505_v30  ;;  %v8212_v30 = vld [vmem:[%s10452_s14 + $0x1a2] sm:$0xff] }
 0x1e6   : > { %9236 = vmatprep.mubr.msk.bf16.mxu0 %vm494_vm1, %v10507_v31  ;;  %v2733_v31 = vpack.c.bf16 %v8212_v30, %v8211_v25 }
 0x1ed   : > { %9237 = vmatmul.mubr.msk.bf16.gmra.mrb[12].mxu0 %vm494_vm1, %v10517_v36  ;;  %v10379_v36 = vmov 0.0  }
 0x1ee   : > { %9240 = vmatprep.mubr.msk.bf16.mxu0 %vm494_vm1, %v10519_v37  ;;  %375 = vst.msk [vmem:[#allocation4] sm:$0xff] %vm307_vm2, %v10379_v36  ;;  %377 = vst.msk [vmem:[#allocation4 + $0x10] sm:$0xff] %vm307_vm2, %v10379_v36  ;;  %9736 = vmatprep.subr.bf16.mxu0 %v10379_v36  ;;  %v10286_v37 = vld [vmem:[%s12326_s3 + $0x10] sm:$0xff]  }
 0x1ef   : > { %376 = vst.msk [vmem:[#allocation4 + $0x8] sm:$0x3] %vm310_vm3, %v10379_v36  ;;  %378 = vst.msk [vmem:[#allocation4 + $0x18] sm:$0x3] %vm310_vm3, %v10379_v36  ;;  %9290 = vmatprep.subr.bf16.mxu1 %v10286_v37 }
 0x1f0   : > { %379 = vst.msk [vmem:[#allocation4 + $0x20] sm:$0xff] %vm307_vm2, %v10379_v36  ;;  %381 = vst.msk [vmem:[#allocation4 + $0x30] sm:$0xff] %vm307_vm2, %v10379_v36  ;;  %9291 = vmatpush3.bf16.msra.mxu1 %v10286_v37 }
 0x1f1   : > { %380 = vst.msk [vmem:[#allocation4 + $0x28] sm:$0x3] %vm310_vm3, %v10379_v36  ;;  %382 = vst.msk [vmem:[#allocation4 + $0x38] sm:$0x3] %vm310_vm3, %v10379_v36 }
 0x1f2   : > { %383 = vst.msk [vmem:[#allocation4 + $0x40] sm:$0xff] %vm307_vm2, %v10379_v36  ;;  %385 = vst.msk [vmem:[#allocation4 + $0x50] sm:$0xff] %vm307_vm2, %v10379_v36 }
 0x1f3   : > { %384 = vst.msk [vmem:[#allocation4 + $0x48] sm:$0x3] %vm310_vm3, %v10379_v36  ;;  %386 = vst.msk [vmem:[#allocation4 + $0x58] sm:$0x3] %vm310_vm3, %v10379_v36 }
 0x1f4   : > { %387 = vst.msk [vmem:[#allocation4 + $0x60] sm:$0xff] %vm307_vm2, %v10379_v36  ;;  %389 = vst.msk [vmem:[#allocation4 + $0x70] sm:$0xff] %vm307_vm2, %v10379_v36 }
 0x1f5   : > { %9241 = vmatmul.mubr.msk.bf16.gmra.mrb[16].mxu0 %vm494_vm1, %v10529_v42  ;;  %388 = vst.msk [vmem:[#allocation4 + $0x68] sm:$0x3] %vm310_vm3, %v10379_v36  ;;  %390 = vst.msk [vmem:[#allocation4 + $0x78] sm:$0x3] %vm310_vm3, %v10379_v36  ;;  %v10287_v42 = vld [vmem:[%s12326_s3 + $0x18] sm:$0xff]  }
 0x1f6   : > { %9244 = vmatprep.mubr.msk.bf16.mxu0 %vm494_vm1, %v10531_v43  ;;  %391 = vst.msk [vmem:[#allocation4 + $0x80] sm:$0xff] %vm307_vm2, %v10379_v36  ;;  %393 = vst.msk [vmem:[#allocation4 + $0x90] sm:$0xff] %vm307_vm2, %v10379_v36  ;;  %9292 = vmatprep.subr.bf16.mxu1 %v10287_v42  ;;  %v11168_v43 = vld [vmem:[%s12326_s3] sm:$0xff]  }
 0x1f7   : > { %392 = vst.msk [vmem:[#allocation4 + $0x88] sm:$0x3] %vm310_vm3, %v10379_v36  ;;  %394 = vst.msk [vmem:[#allocation4 + $0x98] sm:$0x3] %vm310_vm3, %v10379_v36  ;;  %9293 = vmatpush3.bf16.msra.mxu1 %v10287_v42 }
 0x1f8   : > { %9302 = vmatprep.subr.bf16.mxu1 %v11168_v43 }
 0x1fd   : > { %9245 = vmatmul.mubr.msk.bf16.gmra.mrb[20].mxu0 %vm494_vm1, %v10541_v48  ;;  %v11174_v48 = vld [vmem:[%s12325_s2] ss:$0 sm:$0xff] }
 0x1fe   : > { %9248 = vmatprep.mubr.msk.bf16.mxu0 %vm494_vm1, %v10543_v49 }
 0x205   : > { %9249 = vmatmul.mubr.msk.bf16.gmra.mrb[24].mxu0 %vm494_vm1, %v10553_v54 }
 0x206   : > { %9252 = vmatprep.mubr.msk.bf16.mxu0 %vm494_vm1, %v10834_v45 }
 0x20d   : > { %9253 = vmatmul.mubr.msk.bf16.gmra.mrb[28].mxu0 %vm494_vm1, %v2439_v24 }
 0x20e   : > { %9258 = vmatprep.mubr.msk.bf16.mxu0 %vm494_vm1, %v10666_v1 }
 0x215   : > { %9259 = vmatmul.mubr.msk.bf16.vlgmr.msra.gmra.mrb[0].mxu0 %vm494_vm1, %v10682_v63 }
 0x216   : > { %9262 = vmatprep.mubr.msk.bf16.mxu0 %vm494_vm1, %v10684_v14 }
 0x21d   : > { %9263 = vmatmul.mubr.msk.bf16.gmra.mrb[4].mxu0 %vm494_vm1, %v10694_v23 }
 0x21e   : > { %9266 = vmatprep.mubr.msk.bf16.mxu0 %vm494_vm1, %v10696_v26 }
 0x225   : > { %9267 = vmatmul.mubr.msk.bf16.gmra.mrb[8].mxu0 %vm494_vm1, %v10706_v35 }
 0x226   : > { %9270 = vmatprep.mubr.msk.bf16.mxu0 %vm494_vm1, %v10708_v40 }
 0x22d   : > { %9271 = vmatmul.mubr.msk.bf16.gmra.mrb[12].mxu0 %vm494_vm1, %v10718_v51 }
 0x22e   : > { %9274 = vmatprep.mubr.msk.bf16.mxu0 %vm494_vm1, %v10720_v52 }
 0x235   : > { %9275 = vmatmul.mubr.msk.bf16.gmra.mrb[16].mxu0 %vm494_vm1, %v10730_v59 }
 0x236   : > { %9278 = vmatprep.mubr.msk.bf16.mxu0 %vm494_vm1, %v10732_v60 }
 0x23d   : > { %9279 = vmatmul.mubr.msk.bf16.gmra.mrb[20].mxu0 %vm494_vm1, %v10742_v9 }
 0x23e   : > { %9282 = vmatprep.mubr.msk.bf16.mxu0 %vm494_vm1, %v10744_v15 }
 0x245   : > { %9283 = vmatmul.mubr.msk.bf16.gmra.mrb[24].mxu0 %vm494_vm1, %v10752_v22 }
 0x246   : > { %9286 = vmatprep.mubr.msk.bf16.mxu0 %vm494_vm1, %v10875_v57 }
 0x24d   : > { %9287 = vmatmul.mubr.msk.bf16.gmra.mrb[28].mxu0 %vm494_vm1, %v2733_v31 }
 0x24e   : > { %9740 = vmatprep.mubr.msk.bf16.mxu0 %vm10380_vm4, %v10379_v36 }
 0x2e8   : > { %v9260_v49 = vpop.f32.mrb[0].mxu0 }
 0x2e9   : > { %v2989_v54 = vadd.f32 %v9260_v49, %v11174_v48  ;;  %v2821_v13 = vpop.f32.mrb[1].mxu0 }
 0x2ea   : > { %v2987_v20 = vadd.f32 %v11174_v48, %v2821_v13  ;;  %v9261_v21 = vpop.f32.mrb[2].mxu0 }
 0x2eb   : > { %3021 = vst.msk [vmem:[#allocation2 + $0x19] sm:$0xff] %vm307_vm2, %v2989_v54  ;;  %v2990_v28 = vadd.f32 %v9261_v21, %v11174_v48  ;;  %v2824_v29 = vpop.f32.mrb[3].mxu0 }
 0x2ec   : > { %3019 = vst.msk [vmem:[#allocation2 + $0x1] sm:$0xff] %vm307_vm2, %v2987_v20  ;;  %v2988_v38 = vadd.f32 %v11174_v48, %v2824_v29 }
 0x2ed   : > { %3022 = vst.msk [vmem:[#allocation2 + $0x21] sm:$0xff] %vm307_vm2, %v2990_v28 }
 0x2ee   : > { %3020 = vst.msk [vmem:[#allocation2 + $0x9] sm:$0xff] %vm307_vm2, %v2988_v38 }
 0x2f0   : > { %v9264_v39 = vpop.f32.mrb[4].mxu0 }
 0x2f1   : > { %v2993_v46 = vadd.f32 %v9264_v39, %v11174_v48  ;;  %v2837_v47 = vpop.f32.mrb[5].mxu0 }
 0x2f2   : > { %v2991_v55 = vadd.f32 %v11174_v48, %v2837_v47  ;;  %v9265_v1 = vpop.f32.mrb[6].mxu0 }
 0x2f3   : > { %3025 = vst.msk [vmem:[#allocation2 + $0x49] sm:$0xff] %vm307_vm2, %v2993_v46  ;;  %v2994_v63 = vadd.f32 %v9265_v1, %v11174_v48  ;;  %v2840_v14 = vpop.f32.mrb[7].mxu0 }
 0x2f4   : > { %v3053_v23 = vld [vmem:[#allocation2 + $0x18] ss:$2 sm:$0xff]  ;;  %v3085_v26 = vld [vmem:[#allocation2 + $0x19] ss:$2 sm:$0xff]  ;;  %3023 = vst.msk [vmem:[#allocation2 + $0x31] sm:$0xff] %vm307_vm2, %v2991_v55  ;;  %v2992_v35 = vadd.f32 %v11174_v48, %v2840_v14 }
 0x2f5   : > { %v3115_v40 = vmax.f32 %v3053_v23, %v3085_v26  ;;  %v3051_v51 = vld [vmem:[#allocation2] ss:$2 sm:$0xff]  ;;  %v3083_v52 = vld [vmem:[#allocation2 + $0x1] ss:$2 sm:$0xff]  ;;  %3026 = vst.msk [vmem:[#allocation2 + $0x51] sm:$0xff] %vm307_vm2, %v2994_v63 }
 0x2f6   : > { %v3133_v59 = vld [vmem:[#allocation2 + $0x1a] ss:$2 sm:$0xff]  ;;  %v3114_v60 = vmax.f32 %v3051_v51, %v3083_v52  ;;  %3024 = vst.msk [vmem:[#allocation2 + $0x39] sm:$0xff] %vm307_vm2, %v2992_v35 }
 0x2f7   : > { %v3163_v6 = vmax.f32 %v3115_v40, %v3133_v59  ;;  %v3131_v7 = vld [vmem:[#allocation2 + $0x2] ss:$2 sm:$0xff] }
 0x2f8   : > { %v3162_v8 = vmax.f32 %v3114_v60, %v3131_v7  ;;  %v9268_v9 = vpop.f32.mrb[8].mxu0  ;;  %v11229_v7 = vld [vmem:[#allocation4 + $0x1] sm:$0xff] }
 0x2f9   : > { %3180 = vst.msk [vmem:[#allocation3 + $0x10] sm:$0xff] %vm307_vm2, %v3163_v6  ;;  %v2997_v15 = vadd.f32 %v9268_v9, %v11174_v48  ;;  %v2853_v16 = vpop.f32.mrb[9].mxu0 }
 0x2fa   : > { %3179 = vst.msk [vmem:[#allocation3 + $0x8] sm:$0xff] %vm307_vm2, %v3162_v8  ;;  %v2995_v17 = vadd.f32 %v11174_v48, %v2853_v16  ;;  %v9269_v22 = vpop.f32.mrb[10].mxu0 }
 0x2fb   : > { %3029 = vst.msk [vmem:[#allocation2 + $0x79] sm:$0xff] %vm307_vm2, %v2997_v15  ;;  %v2998_v27 = vadd.f32 %v9269_v22, %v11174_v48  ;;  %v2856_v32 = vpop.f32.mrb[11].mxu0 }
 0x2fc   : > { %v3057_v61 = vld [vmem:[#allocation2 + $0x48] ss:$2 sm:$0xff]  ;;  %v3089_v3 = vld [vmem:[#allocation2 + $0x49] ss:$2 sm:$0xff]  ;;  %3027 = vst.msk [vmem:[#allocation2 + $0x61] sm:$0xff] %vm307_vm2, %v2995_v17  ;;  %v2996_v33 = vadd.f32 %v11174_v48, %v2856_v32 }
 0x2fd   : > { %v3117_v34 = vmax.f32 %v3057_v61, %v3089_v3  ;;  %v3055_v41 = vld [vmem:[#allocation2 + $0x30] ss:$2 sm:$0xff]  ;;  %v3087_v10 = vld [vmem:[#allocation2 + $0x31] ss:$2 sm:$0xff]  ;;  %3030 = vst.msk [vmem:[#allocation2 + $0x81] sm:$0xff] %vm307_vm2, %v2998_v27 }
 0x2fe   : > { %v3137_v44 = vld [vmem:[#allocation2 + $0x4a] ss:$2 sm:$0xff]  ;;  %v3116_v45 = vmax.f32 %v3055_v41, %v3087_v10  ;;  %3028 = vst.msk [vmem:[#allocation2 + $0x69] sm:$0xff] %vm307_vm2, %v2996_v33 }
 0x2ff   : > { %v3165_v50 = vmax.f32 %v3117_v34, %v3137_v44  ;;  %v3135_v53 = vld [vmem:[#allocation2 + $0x32] ss:$2 sm:$0xff] }
 0x300   : > { %v3164_v56 = vmax.f32 %v3116_v45, %v3135_v53  ;;  %v9272_v57 = vpop.f32.mrb[12].mxu0  ;;  %v3220_v19 = vld [vmem:[#allocation3 + $0x10] sm:$0xff] }
 0x301   : > { %3182 = vst.msk [vmem:[#allocation3 + $0x20] sm:$0xff] %vm307_vm2, %v3165_v50  ;;  %v3001_v58 = vadd.f32 %v9272_v57, %v11174_v48  ;;  %v2869_v2 = vpop.f32.mrb[13].mxu0  ;;  %v3203_v62 = vld [vmem:[#allocation3 + $0x8] sm:$0xff] }
 0x302   : > { %3181 = vst.msk [vmem:[#allocation3 + $0x18] sm:$0xff] %vm307_vm2, %v3164_v56  ;;  %v2999_v4 = vadd.f32 %v11174_v48, %v2869_v2  ;;  %v9273_v5 = vpop.f32.mrb[14].mxu0  ;;  %v3211_v11 = vmax.f32 %v3195_v0, %v3203_v62 }
 0x303   : > { %3033 = vst.msk [vmem:[#allocation2 + $0xa9] sm:$0xff] %vm307_vm2, %v3001_v58  ;;  %v3002_v12 = vadd.f32 %v9273_v5, %v11174_v48  ;;  %v2872_v18 = vpop.f32.mrb[15].mxu0 }
 0x304   : > { %v3061_v24 = vld [vmem:[#allocation2 + $0x78] ss:$2 sm:$0xff]  ;;  %v3093_v25 = vld [vmem:[#allocation2 + $0x79] ss:$2 sm:$0xff]  ;;  %3031 = vst.msk [vmem:[#allocation2 + $0x91] sm:$0xff] %vm307_vm2, %v2999_v4  ;;  %v3000_v30 = vadd.f32 %v11174_v48, %v2872_v18  ;;  %v11210_v31 = vmax.f32 %v3211_v11, %v3220_v19 }
 0x305   : > { %v3119_v37 = vmax.f32 %v3061_v24, %v3093_v25  ;;  %v3059_v42 = vld [vmem:[#allocation2 + $0x60] ss:$2 sm:$0xff]  ;;  %v3091_v49 = vld [vmem:[#allocation2 + $0x61] ss:$2 sm:$0xff]  ;;  %3034 = vst.msk [vmem:[#allocation2 + $0xb1] sm:$0xff] %vm307_vm2, %v3002_v12 }
 0x306   : > { %v3141_v54 = vld [vmem:[#allocation2 + $0x7a] ss:$2 sm:$0xff]  ;;  %v3118_v13 = vmax.f32 %v3059_v42, %v3091_v49  ;;  %3032 = vst.msk [vmem:[#allocation2 + $0x99] sm:$0xff] %vm307_vm2, %v3000_v30  ;;  %v3236_v20 = vmax.f32 %v11210_v31, 0.0 }
 0x307   : > { %v3167_v21 = vmax.f32 %v3119_v37, %v3141_v54  ;;  %v3139_v28 = vld [vmem:[#allocation2 + $0x62] ss:$2 sm:$0xff] }
 0x308   : > { %v3166_v29 = vmax.f32 %v3118_v13, %v3139_v28  ;;  %v9276_v38 = vpop.f32.mrb[16].mxu0  ;;  %3245 = vst.msk [vmem:[#allocation4 + $0x11] sm:$0xff] %vm307_vm2, %v3236_v20  ;;  %v3197_v26 = vld [vmem:[#allocation3 + $0x20] sm:$0xff] }
 0x309   : > { %3184 = vst.msk [vmem:[#allocation3 + $0x30] sm:$0xff] %vm307_vm2, %v3167_v21  ;;  %v3005_v39 = vadd.f32 %v9276_v38, %v11174_v48  ;;  %v2885_v46 = vpop.f32.mrb[17].mxu0  ;;  %v3204_v47 = vld [vmem:[#allocation3 + $0x18] sm:$0xff] }
 0x30a   : > { %3183 = vst.msk [vmem:[#allocation3 + $0x28] sm:$0xff] %vm307_vm2, %v3166_v29  ;;  %v3003_v55 = vadd.f32 %v11174_v48, %v2885_v46  ;;  %v9277_v1 = vpop.f32.mrb[18].mxu0  ;;  %v3212_v63 = vmax.f32 %v3220_v19, %v3204_v47 }
 0x30b   : > { %3037 = vst.msk [vmem:[#allocation2 + $0xd9] sm:$0xff] %vm307_vm2, %v3005_v39  ;;  %v3006_v14 = vadd.f32 %v9277_v1, %v11174_v48  ;;  %v2888_v23 = vpop.f32.mrb[19].mxu0 }
 0x30c   : > { %v3065_v35 = vld [vmem:[#allocation2 + $0xa8] ss:$2 sm:$0xff]  ;;  %v3097_v40 = vld [vmem:[#allocation2 + $0xa9] ss:$2 sm:$0xff]  ;;  %3035 = vst.msk [vmem:[#allocation2 + $0xc1] sm:$0xff] %vm307_vm2, %v3003_v55  ;;  %v3004_v51 = vadd.f32 %v11174_v48, %v2888_v23  ;;  %v11226_v52 = vmax.f32 %v3212_v63, %v3197_v26 }
 0x30d   : > { %v3121_v59 = vmax.f32 %v3065_v35, %v3097_v40  ;;  %v3063_v60 = vld [vmem:[#allocation2 + $0x90] ss:$2 sm:$0xff]  ;;  %v3095_v6 = vld [vmem:[#allocation2 + $0x91] ss:$2 sm:$0xff]  ;;  %3038 = vst.msk [vmem:[#allocation2 + $0xe1] sm:$0xff] %vm307_vm2, %v3006_v14 }
 0x30e   : > { %v3145_v8 = vld [vmem:[#allocation2 + $0xaa] ss:$2 sm:$0xff]  ;;  %v3120_v9 = vmax.f32 %v3063_v60, %v3095_v6  ;;  %3036 = vst.msk [vmem:[#allocation2 + $0xc9] sm:$0xff] %vm307_vm2, %v3004_v51  ;;  %v3237_v15 = vmax.f32 %v11226_v52, 0.0 }
 0x30f   : > { %v3169_v16 = vmax.f32 %v3121_v59, %v3145_v8  ;;  %v3143_v17 = vld [vmem:[#allocation2 + $0x92] ss:$2 sm:$0xff]  ;;  %v11233_v22 = vld [vmem:[#allocation4 + $0x11] sm:$0xff] }
 0x310   : > { %v3168_v27 = vmax.f32 %v3120_v9, %v3143_v17  ;;  %v9280_v32 = vpop.f32.mrb[20].mxu0  ;;  %v3277_v61 = vpack.c.bf16 %v11233_v22, %v11229_v7  ;;  %3246 = vst.msk [vmem:[#allocation4 + $0x21] sm:$0xff] %vm307_vm2, %v3237_v15  ;;  %v3222_v53 = vld [vmem:[#allocation3 + $0x30] sm:$0xff]  ;;  %v10289_v9 = vld [vmem:[%s12326_s3 + $0x8] sm:$0xff]  }
 0x311   : > { %3186 = vst.msk [vmem:[#allocation3 + $0x40] sm:$0xff] %vm307_vm2, %v3169_v16  ;;  %v3009_v3 = vadd.f32 %v9280_v32, %v11174_v48  ;;  %v2901_v33 = vpop.f32.mrb[21].mxu0  ;;  %v3205_v34 = vld [vmem:[#allocation3 + $0x28] sm:$0xff] }
 0x312   : > { %3185 = vst.msk [vmem:[#allocation3 + $0x38] sm:$0xff] %vm307_vm2, %v3168_v27  ;;  %v3007_v41 = vadd.f32 %v11174_v48, %v2901_v33  ;;  %v9281_v10 = vpop.f32.mrb[22].mxu0  ;;  %9294 = vmatprep.mubr.msk.bf16.mxu1 %vm307_vm2, %v3277_v61  ;;  %v3213_v44 = vmax.f32 %v3197_v26, %v3205_v34 }
 0x313   : > { %3041 = vst.msk [vmem:[#allocation2 + $0x109] sm:$0xff] %vm307_vm2, %v3009_v3  ;;  %v3010_v45 = vadd.f32 %v9281_v10, %v11174_v48  ;;  %v2904_v50 = vpop.f32.mrb[23].mxu0 }
 0x314   : > { %v3069_v0 = vld [vmem:[#allocation2 + $0xd8] ss:$2 sm:$0xff]  ;;  %v3101_v56 = vld [vmem:[#allocation2 + $0xd9] ss:$2 sm:$0xff]  ;;  %3039 = vst.msk [vmem:[#allocation2 + $0xf1] sm:$0xff] %vm307_vm2, %v3007_v41  ;;  %v3008_v57 = vadd.f32 %v11174_v48, %v2904_v50  ;;  %v11249_v58 = vmax.f32 %v3213_v44, %v3222_v53 }
 0x315   : > { %v3123_v2 = vmax.f32 %v3069_v0, %v3101_v56  ;;  %v3067_v62 = vld [vmem:[#allocation2 + $0xc0] ss:$2 sm:$0xff]  ;;  %v3099_v4 = vld [vmem:[#allocation2 + $0xc1] ss:$2 sm:$0xff]  ;;  %3042 = vst.msk [vmem:[#allocation2 + $0x111] sm:$0xff] %vm307_vm2, %v3010_v45 }
 0x316   : > { %v3149_v5 = vld [vmem:[#allocation2 + $0xda] ss:$2 sm:$0xff]  ;;  %v3122_v11 = vmax.f32 %v3067_v62, %v3099_v4  ;;  %3040 = vst.msk [vmem:[#allocation2 + $0xf9] sm:$0xff] %vm307_vm2, %v3008_v57  ;;  %v3238_v12 = vmax.f32 %v11249_v58, 0.0 }
 0x317   : > { %v3171_v18 = vmax.f32 %v3123_v2, %v3149_v5  ;;  %v3147_v19 = vld [vmem:[#allocation2 + $0xc2] ss:$2 sm:$0xff]  ;;  %v11270_v51 = vld [vmem:[#allocation4 + $0x21] sm:$0xff] }
 0x318   : > { %v3170_v24 = vmax.f32 %v3122_v11, %v3147_v19  ;;  %v9284_v25 = vpop.f32.mrb[24].mxu0  ;;  %3247 = vst.msk [vmem:[#allocation4 + $0x31] sm:$0xff] %vm307_vm2, %v3238_v12  ;;  %v3199_v29 = vld [vmem:[#allocation3 + $0x40] sm:$0xff] }
 0x319   : > { %3188 = vst.msk [vmem:[#allocation3 + $0x50] sm:$0xff] %vm307_vm2, %v3171_v18  ;;  %v3013_v30 = vadd.f32 %v9284_v25, %v11174_v48  ;;  %v2917_v37 = vpop.f32.mrb[25].mxu0  ;;  %v3206_v42 = vld [vmem:[#allocation3 + $0x38] sm:$0xff] }
 0x31a   : > { %3187 = vst.msk [vmem:[#allocation3 + $0x48] sm:$0xff] %vm307_vm2, %v3170_v24  ;;  %v3011_v49 = vadd.f32 %v11174_v48, %v2917_v37  ;;  %v9285_v54 = vpop.f32.mrb[26].mxu0  ;;  %v3214_v13 = vmax.f32 %v3222_v53, %v3206_v42  ;;  %v11300_v53 = vld [vmem:[%s12326_s3 + $0x20] sm:$0xff]  }
 0x31b   : > { %3045 = vst.msk [vmem:[#allocation2 + $0x139] sm:$0xff] %vm307_vm2, %v3013_v30  ;;  %v3014_v21 = vadd.f32 %v9285_v54, %v11174_v48  ;;  %v2920_v28 = vpop.f32.mrb[27].mxu0 }
 0x31c   : > { %v3073_v38 = vld [vmem:[#allocation2 + $0x108] ss:$2 sm:$0xff]  ;;  %v3105_v39 = vld [vmem:[#allocation2 + $0x109] ss:$2 sm:$0xff]  ;;  %3043 = vst.msk [vmem:[#allocation2 + $0x121] sm:$0xff] %vm307_vm2, %v3011_v49  ;;  %v3012_v46 = vadd.f32 %v11174_v48, %v2920_v28  ;;  %v11265_v47 = vmax.f32 %v3214_v13, %v3199_v29 }
 0x31d   : > { %v3125_v55 = vmax.f32 %v3073_v38, %v3105_v39  ;;  %v3071_v1 = vld [vmem:[#allocation2 + $0xf0] ss:$2 sm:$0xff]  ;;  %v3103_v63 = vld [vmem:[#allocation2 + $0xf1] ss:$2 sm:$0xff]  ;;  %3046 = vst.msk [vmem:[#allocation2 + $0x141] sm:$0xff] %vm307_vm2, %v3014_v21 }
 0x31e   : > { %v3153_v14 = vld [vmem:[#allocation2 + $0x10a] ss:$2 sm:$0xff]  ;;  %v3124_v23 = vmax.f32 %v3071_v1, %v3103_v63  ;;  %3044 = vst.msk [vmem:[#allocation2 + $0x129] sm:$0xff] %vm307_vm2, %v3012_v46  ;;  %v3239_v26 = vmax.f32 %v11265_v47, 0.0 }
 0x31f   : > { %v3173_v35 = vmax.f32 %v3125_v55, %v3153_v14  ;;  %v3151_v40 = vld [vmem:[#allocation2 + $0xf2] ss:$2 sm:$0xff]  ;;  %v11272_v59 = vld [vmem:[#allocation4 + $0x31] sm:$0xff] }
 0x320   : > { %v3172_v60 = vmax.f32 %v3124_v23, %v3151_v40  ;;  %v9288_v6 = vpop.f32.mrb[28].mxu0  ;;  %v11276_v8 = vpack.c.bf16 %v11272_v59, %v11270_v51  ;;  %3248 = vst.msk [vmem:[#allocation4 + $0x41] sm:$0xff] %vm307_vm2, %v3239_v26  ;;  %v3224_v41 = vld [vmem:[#allocation3 + $0x50] sm:$0xff] }
 0x321   : > { %3190 = vst.msk [vmem:[#allocation3 + $0x60] sm:$0xff] %vm307_vm2, %v3173_v35  ;;  %v3017_v16 = vadd.f32 %v9288_v6, %v11174_v48  ;;  %v2933_v17 = vpop.f32.mrb[29].mxu0  ;;  %v3207_v27 = vld [vmem:[#allocation3 + $0x48] sm:$0xff] }
 0x322   : > { %3189 = vst.msk [vmem:[#allocation3 + $0x58] sm:$0xff] %vm307_vm2, %v3172_v60  ;;  %v3015_v32 = vadd.f32 %v11174_v48, %v2933_v17  ;;  %v9289_v61 = vpop.f32.mrb[30].mxu0  ;;  %9295 = vmatmul.mubr.msk.bf16.vlgmr.msra.gmra.mrb[0].mxu1 %vm307_vm2, %v11276_v8  ;;  %v3215_v3 = vmax.f32 %v3199_v29, %v3207_v27  ;;  %v3254_v17 = vld [vmem:[#allocation4 + $0x10] sm:$0xff] }
 0x323   : > { %3049 = vst.msk [vmem:[#allocation2 + $0x169] sm:$0xff] %vm307_vm2, %v3017_v16  ;;  %v3018_v33 = vadd.f32 %v9289_v61, %v11174_v48  ;;  %v2936_v34 = vpop.f32.mrb[31].mxu0  ;;  %9303 = vmatpush3.bf16.msra.mxu1 %v11168_v43  ;;  %v11337_v16 = vld [vmem:[#allocation4] sm:$0xff] }
 0x324   : > { %v3077_v10 = vld [vmem:[#allocation2 + $0x138] ss:$2 sm:$0xff]  ;;  %v3109_v44 = vld [vmem:[#allocation2 + $0x139] ss:$2 sm:$0xff]  ;;  %3047 = vst.msk [vmem:[#allocation2 + $0x151] sm:$0xff] %vm307_vm2, %v3015_v32  ;;  %v3016_v45 = vadd.f32 %v11174_v48, %v2936_v34  ;;  %v11295_v50 = vmax.f32 %v3215_v3, %v3224_v41  ;;  %9304 = vmatprep.subr.bf16.mxu1 %v10289_v9 }
 0x325   : > { %v3127_v0 = vmax.f32 %v3077_v10, %v3109_v44  ;;  %v3075_v56 = vld [vmem:[#allocation2 + $0x120] ss:$2 sm:$0xff]  ;;  %v3107_v57 = vld [vmem:[#allocation2 + $0x121] ss:$2 sm:$0xff]  ;;  %3050 = vst.msk [vmem:[#allocation2 + $0x171] sm:$0xff] %vm307_vm2, %v3018_v33  ;;  %v3261_v33 = vpack.c.bf16 %v3254_v17, %v11337_v16  ;;  %v3255_v10 = vld [vmem:[#allocation4 + $0x20] sm:$0xff] }
 0x326   : > { %v3157_v43 = vld [vmem:[#allocation2 + $0x13a] ss:$2 sm:$0xff]  ;;  %v3126_v2 = vmax.f32 %v3075_v56, %v3107_v57  ;;  %3048 = vst.msk [vmem:[#allocation2 + $0x159] sm:$0xff] %vm307_vm2, %v3016_v45  ;;  %v3240_v62 = vmax.f32 %v11295_v50, 0.0  ;;  %v10292_v57 = vld [vmem:[%s12326_s3 + $0x30] sm:$0xff]  }
 0x327   : > { %v3175_v48 = vmax.f32 %v3127_v0, %v3157_v43  ;;  %v3155_v4 = vld [vmem:[#allocation2 + $0x122] ss:$2 sm:$0xff]  ;;  %9305 = vmatpush3.bf16.msra.mxu1 %v10289_v9  ;;  %v11314_v38 = vld [vmem:[#allocation4 + $0x41] sm:$0xff] }
 0x328   : > { %v3174_v5 = vmax.f32 %v3126_v2, %v3155_v4  ;;  %3249 = vst.msk [vmem:[#allocation4 + $0x51] sm:$0xff] %vm307_vm2, %v3240_v62  ;;  %9314 = vmatprep.subr.bf16.mxu1 %v11300_v53  ;;  %v3201_v19 = vld [vmem:[#allocation3 + $0x60] sm:$0xff]  ;;  %v3257_v45 = vld [vmem:[#allocation4 + $0x40] sm:$0xff]  ;;  %v10291_v0 = vld [vmem:[%s12326_s3 + $0x28] sm:$0xff]  }
 0x329   : > { %3192 = vst.msk [vmem:[#allocation3 + $0x70] sm:$0xff] %vm307_vm2, %v3175_v48  ;;  %v3208_v11 = vld [vmem:[#allocation3 + $0x58] sm:$0xff]  ;;  %v3256_v34 = vld [vmem:[#allocation4 + $0x30] sm:$0xff] }
 0x32a   : > { %3191 = vst.msk [vmem:[#allocation3 + $0x68] sm:$0xff] %vm307_vm2, %v3174_v5  ;;  %v3216_v18 = vmax.f32 %v3224_v41, %v3208_v11  ;;  %v11355_v44 = vpack.c.bf16 %v3256_v34, %v3255_v10  ;;  %v11370_v2 = vld [vmem:[#allocation4 + $0x2] sm:$0xff]  ;;  %v3465_v48 = vld [vmem:[#allocation4 + $0x12] sm:$0xff] }
 0x32b   : > { %v3472_v11 = vpack.c.bf16 %v3465_v48, %v11370_v2 }
 0x32c   : > { %v3081_v24 = vld [vmem:[#allocation2 + $0x168] ss:$2 sm:$0xff]  ;;  %v3113_v25 = vld [vmem:[#allocation2 + $0x169] ss:$2 sm:$0xff]  ;;  %v11311_v30 = vmax.f32 %v3216_v18, %v3201_v19 }
 0x32d   : > { %v3129_v37 = vmax.f32 %v3081_v24, %v3113_v25  ;;  %v3079_v42 = vld [vmem:[#allocation2 + $0x150] ss:$2 sm:$0xff]  ;;  %v3111_v49 = vld [vmem:[#allocation2 + $0x151] ss:$2 sm:$0xff] }
 0x32e   : > { %v3161_v54 = vld [vmem:[#allocation2 + $0x16a] ss:$2 sm:$0xff]  ;;  %v3128_v13 = vmax.f32 %v3079_v42, %v3111_v49  ;;  %v3241_v21 = vmax.f32 %v11311_v30, 0.0  ;;  %v10294_v49 = vld [vmem:[%s12326_s3 + $0x40] sm:$0xff]  }
 0x32f   : > { %v3177_v28 = vmax.f32 %v3129_v37, %v3161_v54  ;;  %v3159_v29 = vld [vmem:[#allocation2 + $0x152] ss:$2 sm:$0xff]  ;;  %v11316_v39 = vld [vmem:[#allocation4 + $0x51] sm:$0xff] }
 0x330   : > { %v3176_v46 = vmax.f32 %v3128_v13, %v3159_v29  ;;  %v11320_v55 = vpack.c.bf16 %v11316_v39, %v11314_v38  ;;  %3250 = vst.msk [vmem:[#allocation4 + $0x61] sm:$0xff] %vm307_vm2, %v3241_v21  ;;  %v3226_v14 = vld [vmem:[#allocation3 + $0x70] sm:$0xff]  ;;  %v3258_v41 = vld [vmem:[#allocation4 + $0x50] sm:$0xff]  ;;  %v10293_v37 = vld [vmem:[%s12326_s3 + $0x38] sm:$0xff]   ;;  %v3586_v29 = vpack.c.bf16 %v3255_v10, %v3254_v17  ;;  %v3701_v17 = vpack.c.bf16 %v11314_v38, %v11272_v59 }
 0x331   : > { %3194 = vst.msk [vmem:[#allocation3 + $0x80] sm:$0xff] %vm307_vm2, %v3177_v28  ;;  %v3209_v1 = vld [vmem:[#allocation3 + $0x68] sm:$0xff]  ;;  %v11360_v56 = vpack.c.bf16 %v3258_v41, %v3257_v45  ;;  %v3468_v25 = vld [vmem:[#allocation4 + $0x42] sm:$0xff] }
 0x332   : > { %3193 = vst.msk [vmem:[#allocation3 + $0x78] sm:$0xff] %vm307_vm2, %v3176_v46  ;;  %9298 = vmatprep.mubr.msk.bf16.mxu1 %vm307_vm2, %v11320_v55  ;;  %v3217_v63 = vmax.f32 %v3201_v19, %v3209_v1  ;;  %v3469_v18 = vld [vmem:[#allocation4 + $0x52] sm:$0xff]  ;;  %v3466_v19 = vld [vmem:[#allocation4 + $0x22] sm:$0xff]  ;;  %v3587_v46 = vpack.c.bf16 %v3257_v45, %v3256_v34 }
 0x333   : > { %v11383_v42 = vpack.c.bf16 %v3469_v18, %v3468_v25  ;;  %v10295_v1 = vld [vmem:[%s12326_s3 + $0x48] sm:$0xff]   ;;  %v3814_v38 = vpack.c.bf16 %v3466_v19, %v3465_v48  ;;  %v10304_v48 = vld [vmem:[%s12326_s3 + $0xa0] sm:$0xff]  }
 0x334   : > { %v11329_v23 = vmax.f32 %v3217_v63, %v3226_v14 }
 0x336   : > { %v3242_v35 = vmax.f32 %v11329_v23, 0.0 }
 0x337   : > { %v11340_v32 = vld [vmem:[#allocation4 + $0x61] sm:$0xff] }
 0x338   : > { %3251 = vst.msk [vmem:[#allocation4 + $0x71] sm:$0xff] %vm307_vm2, %v3242_v35  ;;  %v3227_v6 = vld [vmem:[#allocation3 + $0x80] sm:$0xff]  ;;  %v3259_v4 = vld [vmem:[#allocation4 + $0x60] sm:$0xff]  ;;  %v3702_v34 = vpack.c.bf16 %v11340_v32, %v11316_v39 }
 0x339   : > { %v3210_v40 = vld [vmem:[#allocation3 + $0x78] sm:$0xff]  ;;  %v3588_v63 = vpack.c.bf16 %v3259_v4, %v3258_v41 }
 0x33a   : > { %v3218_v60 = vmax.f32 %v3226_v14, %v3210_v40  ;;  %v3470_v13 = vld [vmem:[#allocation4 + $0x62] sm:$0xff] }
 0x33b   : > { %v10296_v14 = vld [vmem:[%s12326_s3 + $0x50] sm:$0xff]   ;;  %v3816_v41 = vpack.c.bf16 %v3470_v13, %v3469_v18 }
 0x33c   : > { %v11335_v9 = vmax.f32 %v3218_v60, %v3227_v6  ;;  %v3700_v6 = vpack.c.bf16 %v11270_v51, %v11233_v22  ;;  %v10298_v22 = vld [vmem:[%s12326_s3 + $0x60] sm:$0xff]  }
 0x33e   : > { %v3243_v27 = vmax.f32 %v11335_v9, 0.0 }
 0x33f   : > { %v11342_v61 = vld [vmem:[#allocation4 + $0x71] sm:$0xff] }
 0x340   : > { %v11346_v3 = vpack.c.bf16 %v11342_v61, %v11340_v32  ;;  %3252 = vst.msk [vmem:[#allocation4 + $0x81] sm:$0xff] %vm307_vm2, %v3243_v27  ;;  %v3260_v43 = vld [vmem:[#allocation4 + $0x70] sm:$0xff]  ;;  %v10299_v32 = vld [vmem:[%s12326_s3 + $0x68] sm:$0xff]  }
 0x341   : > { %v11372_v5 = vpack.c.bf16 %v3260_v43, %v3259_v4  ;;  %v3471_v54 = vld [vmem:[#allocation4 + $0x72] sm:$0xff] }
 0x342   : > { %9299 = vmatmul.mubr.msk.bf16.gmra.mrb[4].mxu1 %vm307_vm2, %v11346_v3  ;;  %v11392_v28 = vpack.c.bf16 %v3471_v54, %v3470_v13  ;;  %v11461_v4 = vld [vmem:[#allocation4 + $0x91] sm:$0xff] }
 0x343   : > { %9306 = vmatprep.mubr.msk.bf16.mxu1 %vm307_vm2, %v3261_v33  ;;  %v10297_v33 = vld [vmem:[%s12326_s3 + $0x58] sm:$0xff]  }
 0x347   : > { %v3585_v40 = vld [vmem:[#allocation4 + $0x80] sm:$0xff] }
 0x348   : > { %v3589_v60 = vpack.c.bf16 %v3585_v40, %v3260_v43  ;;  %v3699_v51 = vld [vmem:[#allocation4 + $0x81] sm:$0xff]  ;;  %v11445_v43 = vld [vmem:[#allocation4 + $0x90] sm:$0xff] }
 0x349   : > { %v3703_v59 = vpack.c.bf16 %v3699_v51, %v11342_v61  ;;  %v10300_v61 = vld [vmem:[%s12326_s3 + $0x70] sm:$0xff]  }
 0x34a   : > { %9307 = vmatmul.mubr.msk.bf16.vlgmr.msra.gmra.mrb[0].mxu1 %vm307_vm2, %v11355_v44  ;;  %v3813_v10 = vld [vmem:[#allocation4 + $0x82] sm:$0xff] }
 0x34b   : > { %9315 = vmatpush3.bf16.msra.mxu1 %v11300_v53  ;;  %9310 = vmatprep.mubr.msk.bf16.mxu1 %vm307_vm2, %v11360_v56  ;;  %v3467_v53 = vld [vmem:[#allocation4 + $0x32] sm:$0xff]  ;;  %v3817_v45 = vpack.c.bf16 %v3813_v10, %v3471_v54 }
 0x34c   : > { %9316 = vmatprep.subr.bf16.mxu1 %v10291_v0  ;;  %v11378_v24 = vpack.c.bf16 %v3467_v53, %v3466_v19  ;;  %v3815_v39 = vpack.c.bf16 %v3468_v25, %v3467_v53 }
 0x34f   : > { %9317 = vmatpush3.bf16.msra.mxu1 %v10291_v0  ;;  %v10301_v0 = vld [vmem:[%s12326_s3 + $0x78] sm:$0xff]  }
 0x350   : > { %9326 = vmatprep.subr.bf16.mxu1 %v10292_v57 }
 0x352   : > { %9311 = vmatmul.mubr.msk.bf16.gmra.mrb[4].mxu1 %vm307_vm2, %v11372_v5 }
 0x353   : > { %9318 = vmatprep.mubr.msk.bf16.mxu1 %vm307_vm2, %v3472_v11  ;;  %v10306_v11 = vld [vmem:[%s12326_s3 + $0x90] sm:$0xff]  }
 0x35a   : > { %9319 = vmatmul.mubr.msk.bf16.vlgmr.msra.gmra.mrb[0].mxu1 %vm307_vm2, %v11378_v24 }
 0x35b   : > { %9327 = vmatpush3.bf16.msra.mxu1 %v10292_v57  ;;  %9322 = vmatprep.mubr.msk.bf16.mxu1 %vm307_vm2, %v11383_v42  ;;  %v10302_v57 = vld [vmem:[%s12326_s3 + $0x80] sm:$0xff]  }
 0x35c   : > { %9328 = vmatprep.subr.bf16.mxu1 %v10293_v37 }
 0x35f   : > { %9329 = vmatpush3.bf16.msra.mxu1 %v10293_v37 }
 0x360   : > { %9338 = vmatprep.subr.bf16.mxu1 %v10294_v49 }
 0x362   : > { %9323 = vmatmul.mubr.msk.bf16.gmra.mrb[4].mxu1 %vm307_vm2, %v11392_v28 }
 0x363   : > { %9330 = vmatprep.mubr.msk.bf16.mxu1 %vm307_vm2, %v3586_v29 }
 0x36a   : > { %9331 = vmatmul.mubr.msk.bf16.vlgmr.msra.gmra.mrb[0].mxu1 %vm307_vm2, %v3587_v46 }
 0x36b   : > { %9339 = vmatpush3.bf16.msra.mxu1 %v10294_v49  ;;  %9334 = vmatprep.mubr.msk.bf16.mxu1 %vm307_vm2, %v3588_v63 }
 0x36c   : > { %9340 = vmatprep.subr.bf16.mxu1 %v10295_v1 }
 0x36f   : > { %9341 = vmatpush3.bf16.msra.mxu1 %v10295_v1 }
 0x370   : > { %9350 = vmatprep.subr.bf16.mxu1 %v10296_v14 }
 0x372   : > { %9335 = vmatmul.mubr.msk.bf16.gmra.mrb[4].mxu1 %vm307_vm2, %v3589_v60 }
 0x373   : > { %9342 = vmatprep.mubr.msk.bf16.mxu1 %vm307_vm2, %v3700_v6 }
 0x37a   : > { %9343 = vmatmul.mubr.msk.bf16.vlgmr.msra.gmra.mrb[0].mxu1 %vm307_vm2, %v3701_v17 }
 0x37b   : > { %9351 = vmatpush3.bf16.msra.mxu1 %v10296_v14  ;;  %9346 = vmatprep.mubr.msk.bf16.mxu1 %vm307_vm2, %v3702_v34  ;;  %v10307_v34 = vld [vmem:[%s12326_s3 + $0x98] sm:$0xff]  }
 0x37c   : > { %9352 = vmatprep.subr.bf16.mxu1 %v10297_v33 }
 0x37f   : > { %9353 = vmatpush3.bf16.msra.mxu1 %v10297_v33 }
 0x380   : > { %9362 = vmatprep.subr.bf16.mxu1 %v10298_v22 }
 0x382   : > { %9347 = vmatmul.mubr.msk.bf16.gmra.mrb[4].mxu1 %vm307_vm2, %v3703_v59 }
 0x383   : > { %9354 = vmatprep.mubr.msk.bf16.mxu1 %vm307_vm2, %v3814_v38 }
 0x38a   : > { %9355 = vmatmul.mubr.msk.bf16.vlgmr.msra.gmra.mrb[0].mxu1 %vm307_vm2, %v3815_v39 }
 0x38b   : > { %9363 = vmatpush3.bf16.msra.mxu1 %v10298_v22  ;;  %9358 = vmatprep.mubr.msk.bf16.mxu1 %vm307_vm2, %v3816_v41 }
 0x38c   : > { %9364 = vmatprep.subr.bf16.mxu1 %v10299_v32 }
 0x38f   : > { %9365 = vmatpush3.bf16.msra.mxu1 %v10299_v32 }
 0x390   : > { %9374 = vmatprep.subr.bf16.mxu1 %v10300_v61 }
 0x392   : > { %9359 = vmatmul.mubr.msk.bf16.gmra.mrb[4].mxu1 %vm307_vm2, %v3817_v45 }
 0x393   : > { %9366 = vmatprep.mubr.msk.bf16.mxu1 %vm307_vm2, %v11355_v44  ;;  %v3932_v44 = vpack.c.bf16 %v11445_v43, %v3585_v40 }
 0x39a   : > { %9367 = vmatmul.mubr.msk.bf16.vlgmr.msra.gmra.mrb[0].mxu1 %vm307_vm2, %v11360_v56  ;;  %v10303_v56 = vld [vmem:[%s12326_s3 + $0x88] sm:$0xff]  }
 0x39b   : > { %9375 = vmatpush3.bf16.msra.mxu1 %v10300_v61  ;;  %9370 = vmatprep.mubr.msk.bf16.mxu1 %vm307_vm2, %v11372_v5  ;;  %v10305_v5 = vld [vmem:[%s12326_s3 + $0xa8] sm:$0xff]  }
 0x39c   : > { %9376 = vmatprep.subr.bf16.mxu1 %v10301_v0 }
 0x39f   : > { %9377 = vmatpush3.bf16.msra.mxu1 %v10301_v0 }
 0x3a0   : > { %9386 = vmatprep.subr.bf16.mxu1 %v10302_v57 }
 0x3a2   : > { %9371 = vmatmul.mubr.msk.bf16.gmra.mrb[4].mxu1 %vm307_vm2, %v3932_v44 }
 0x3a3   : > { %9378 = vmatprep.mubr.msk.bf16.mxu1 %vm307_vm2, %v11276_v8  ;;  %v4046_v8 = vpack.c.bf16 %v11461_v4, %v3699_v51 }
 0x3aa   : > { %9379 = vmatmul.mubr.msk.bf16.vlgmr.msra.gmra.mrb[0].mxu1 %vm307_vm2, %v11320_v55  ;;  %v11471_v55 = vld [vmem:[#allocation4 + $0x92] sm:$0xff] }
 0x3ab   : > { %9387 = vmatpush3.bf16.msra.mxu1 %v10302_v57  ;;  %9382 = vmatprep.mubr.msk.bf16.mxu1 %vm307_vm2, %v11346_v3  ;;  %v4160_v3 = vpack.c.bf16 %v11471_v55, %v3813_v10 }
 0x3ac   : > { %9388 = vmatprep.subr.bf16.mxu1 %v10303_v56 }
 0x3af   : > { %9389 = vmatpush3.bf16.msra.mxu1 %v10303_v56  ;;  %v10309_v56 = vld [vmem:[%s12326_s3 + $0xb8] sm:$0xff]  }
 0x3b0   : > { %9398 = vmatprep.subr.bf16.mxu1 %v10304_v48 }
 0x3b2   : > { %9383 = vmatmul.mubr.msk.bf16.gmra.mrb[4].mxu1 %vm307_vm2, %v4046_v8 }
 0x3b3   : > { %9390 = vmatprep.mubr.msk.bf16.mxu1 %vm307_vm2, %v11378_v24 }
 0x3ba   : > { %9391 = vmatmul.mubr.msk.bf16.vlgmr.msra.gmra.mrb[0].mxu1 %vm307_vm2, %v11383_v42 }
 0x3bb   : > { %9394 = vmatprep.mubr.msk.bf16.mxu1 %vm307_vm2, %v11392_v28  ;;  %9399 = vmatpush3.bf16.msra.mxu1 %v10304_v48 }
 0x3bc   : > { %9400 = vmatprep.subr.bf16.mxu1 %v10305_v5 }
 0x3bf   : > { %9401 = vmatpush3.bf16.msra.mxu1 %v10305_v5 }
 0x3c0   : > { %9410 = vmatprep.subr.bf16.mxu1 %v10306_v11 }
 0x3c2   : > { %9395 = vmatmul.mubr.msk.bf16.gmra.mrb[4].mxu1 %vm307_vm2, %v4160_v3 }
 0x48d   : > { %v9392_v53 = vpop.f32.mrb[0].mxu1 }
 0x48e   : > { %v4265_v18 = vmax.f32 %v9392_v53, 0.0  ;;  %v4224_v19 = vpop.f32.mrb[1].mxu1 }
 0x48f   : > { %v4263_v24 = vmax.f32 %v4224_v19, 0.0  ;;  %v9393_v25 = vpop.f32.mrb[2].mxu1 }
 0x490   : > { %4273 = vst.msk [vmem:[#allocation4 + $0x31] sm:$0xff] %vm307_vm2, %v4265_v18  ;;  %v4266_v37 = vmax.f32 %v9393_v25, 0.0  ;;  %v4227_v42 = vpop.f32.mrb[3].mxu1 }
 0x491   : > { %4271 = vst.msk [vmem:[#allocation4 + $0x11] sm:$0xff] %vm307_vm2, %v4263_v24  ;;  %v4264_v49 = vmax.f32 %v4227_v42, 0.0  ;;  %v10311_v42 = vld [vmem:[%s12326_s3 + $0xc8] sm:$0xff]  }
 0x492   : > { %4274 = vst.msk [vmem:[#allocation4 + $0x41] sm:$0xff] %vm307_vm2, %v4266_v37 }
 0x493   : > { %4272 = vst.msk [vmem:[#allocation4 + $0x21] sm:$0xff] %vm307_vm2, %v4264_v49 }
 0x495   : > { %v9396_v54 = vpop.f32.mrb[4].mxu1 }
 0x496   : > { %v4269_v13 = vmax.f32 %v9396_v54, 0.0  ;;  %v4240_v28 = vpop.f32.mrb[5].mxu1 }
 0x497   : > { %v4267_v29 = vmax.f32 %v4240_v28, 0.0  ;;  %v9397_v46 = vpop.f32.mrb[6].mxu1  ;;  %v11494_v17 = vld [vmem:[#allocation4 + $0x31] sm:$0xff] }
 0x498   : > { %4277 = vst.msk [vmem:[#allocation4 + $0x71] sm:$0xff] %vm307_vm2, %v4269_v13  ;;  %v4270_v1 = vmax.f32 %v9397_v46, 0.0  ;;  %v4243_v63 = vpop.f32.mrb[7].mxu1  ;;  %v11486_v14 = vld [vmem:[#allocation4 + $0x11] sm:$0xff] }
 0x499   : > { %4275 = vst.msk [vmem:[#allocation4 + $0x51] sm:$0xff] %vm307_vm2, %v4267_v29  ;;  %v4268_v40 = vmax.f32 %v4243_v63, 0.0  ;;  %v4304_v60 = vpack.c.bf16 %v11486_v14, %v11229_v7  ;;  %v10308_v7 = vld [vmem:[%s12326_s3 + $0xb0] sm:$0xff]   ;;  %v4280_v38 = vld [vmem:[#allocation4 + $0x10] sm:$0xff] }
 0x49a   : > { %4278 = vst.msk [vmem:[#allocation4 + $0x81] sm:$0xff] %vm307_vm2, %v4270_v1  ;;  %v11492_v6 = vld [vmem:[#allocation4 + $0x21] sm:$0xff]  ;;  %v4287_v61 = vpack.c.bf16 %v4280_v38, %v11337_v16  ;;  %v4282_v0 = vld [vmem:[#allocation4 + $0x30] sm:$0xff] }
 0x49b   : > { %4276 = vst.msk [vmem:[#allocation4 + $0x61] sm:$0xff] %vm307_vm2, %v4268_v40  ;;  %9402 = vmatprep.mubr.msk.bf16.mxu1 %vm307_vm2, %v4304_v60  ;;  %v11500_v33 = vpack.c.bf16 %v11494_v17, %v11492_v6  ;;  %v11510_v22 = vld [vmem:[#allocation4 + $0x41] sm:$0xff]  ;;  %v10310_v16 = vld [vmem:[%s12326_s3 + $0xc0] sm:$0xff]  }
 0x49c   : > { %v4281_v10 = vld [vmem:[#allocation4 + $0x20] sm:$0xff]  ;;  %v4492_v3 = vld [vmem:[#allocation4 + $0x12] sm:$0xff]  ;;  %v10313_v1 = vld [vmem:[%s12326_s3 + $0xd8] sm:$0xff]  }
 0x49d   : > { %9403 = vmatmul.mubr.msk.bf16.vlgmr.msra.gmra.mrb[8].mxu1 %vm307_vm2, %v11500_v33  ;;  %v11532_v57 = vpack.c.bf16 %v4282_v0, %v4281_v10  ;;  %v4283_v44 = vld [vmem:[#allocation4 + $0x40] sm:$0xff]  ;;  %v4499_v53 = vpack.c.bf16 %v4492_v3, %v11370_v2  ;;  %v4494_v24 = vld [vmem:[#allocation4 + $0x32] sm:$0xff]  ;;  %v4613_v29 = vpack.c.bf16 %v4281_v10, %v4280_v38  ;;  %v4728_v38 = vpack.c.bf16 %v11510_v22, %v11494_v17 }
 0x49e   : > { %9411 = vmatpush3.bf16.msra.mxu1 %v10306_v11  ;;  %v4493_v18 = vld [vmem:[#allocation4 + $0x22] sm:$0xff]  ;;  %v4614_v46 = vpack.c.bf16 %v4283_v44, %v4282_v0  ;;  %v10314_v40 = vld [vmem:[%s12326_s3 + $0xe0] sm:$0xff]  }
 0x49f   : > { %9412 = vmatprep.subr.bf16.mxu1 %v10307_v34  ;;  %v11520_v32 = vld [vmem:[#allocation4 + $0x71] sm:$0xff]  ;;  %v11552_v25 = vpack.c.bf16 %v4494_v24, %v4493_v18  ;;  %v4495_v37 = vld [vmem:[#allocation4 + $0x42] sm:$0xff] }
 0x4a0   : > { %v11512_v51 = vld [vmem:[#allocation4 + $0x51] sm:$0xff]  ;;  %v10312_v2 = vld [vmem:[%s12326_s3 + $0xd0] sm:$0xff]  }
 0x4a1   : > { %v11516_v59 = vpack.c.bf16 %v11512_v51, %v11510_v22  ;;  %v4284_v45 = vld [vmem:[#allocation4 + $0x50] sm:$0xff]  ;;  %v4612_v60 = vld [vmem:[#allocation4 + $0x80] sm:$0xff]  ;;  %v4841_v22 = vpack.c.bf16 %v4493_v18, %v4492_v3 }
 0x4a2   : > { %v11518_v39 = vld [vmem:[#allocation4 + $0x61] sm:$0xff]  ;;  %9413 = vmatpush3.bf16.msra.mxu1 %v10307_v34  ;;  %v11537_v48 = vpack.c.bf16 %v4284_v45, %v4283_v44  ;;  %v4286_v5 = vld [vmem:[#allocation4 + $0x70] sm:$0xff] }
 0x4a3   : > { %9406 = vmatprep.mubr.msk.bf16.mxu1 %vm307_vm2, %v11516_v59  ;;  %v11526_v41 = vpack.c.bf16 %v11520_v32, %v11518_v39  ;;  %9422 = vmatprep.subr.bf16.mxu1 %v10308_v7  ;;  %v4285_v8 = vld [vmem:[#allocation4 + $0x60] sm:$0xff]  ;;  %v4496_v19 = vld [vmem:[#allocation4 + $0x52] sm:$0xff]  ;;  %v4616_v34 = vpack.c.bf16 %v4612_v60, %v4286_v5  ;;  %v4729_v10 = vpack.c.bf16 %v11518_v39, %v11512_v51  ;;  %v10317_v39 = vld [vmem:[%s12326_s3 + $0xf8] sm:$0xff]  }
 0x4a4   : > { %v11546_v11 = vpack.c.bf16 %v4286_v5, %v4285_v8  ;;  %v11557_v49 = vpack.c.bf16 %v4496_v19, %v4495_v37  ;;  %v4497_v54 = vld [vmem:[#allocation4 + $0x62] sm:$0xff]  ;;  %v4498_v13 = vld [vmem:[#allocation4 + $0x72] sm:$0xff]  ;;  %v4615_v63 = vpack.c.bf16 %v4285_v8, %v4284_v45  ;;  %v4842_v51 = vpack.c.bf16 %v4495_v37, %v4494_v24 }
 0x4a5   : > { %9407 = vmatmul.mubr.msk.bf16.gmra.mrb[12].mxu1 %vm307_vm2, %v11526_v41  ;;  %v11566_v28 = vpack.c.bf16 %v4498_v13, %v4497_v54  ;;  %v4843_v45 = vpack.c.bf16 %v4497_v54, %v4496_v19  ;;  %v4840_v0 = vld [vmem:[#allocation4 + $0x82] sm:$0xff]  ;;  %v4958_v8 = vpack.c.bf16 %v11445_v43, %v4612_v60 }
 0x4a6   : > { %9414 = vmatprep.mubr.msk.bf16.mxu1 %vm307_vm2, %v4287_v61  ;;  %v10315_v61 = vld [vmem:[%s12326_s3 + $0xe8] sm:$0xff]   ;;  %v4844_v44 = vpack.c.bf16 %v4840_v0, %v4498_v13 }
 0x4ad   : > { %9415 = vmatmul.mubr.msk.bf16.vlgmr.msra.gmra.mrb[8].mxu1 %vm307_vm2, %v11532_v57 }
 0x4ae   : > { %9423 = vmatpush3.bf16.msra.mxu1 %v10308_v7  ;;  %9418 = vmatprep.mubr.msk.bf16.mxu1 %vm307_vm2, %v11537_v48  ;;  %v4727_v7 = vpack.c.bf16 %v11492_v6, %v11486_v14  ;;  %v10316_v14 = vld [vmem:[%s12326_s3 + $0xf0] sm:$0xff]  }
 0x4af   : > { %9424 = vmatprep.subr.bf16.mxu1 %v10309_v56  ;;  %v4726_v6 = vld [vmem:[#allocation4 + $0x81] sm:$0xff] }
 0x4b0   : > { %v4730_v17 = vpack.c.bf16 %v4726_v6, %v11520_v32  ;;  %v10318_v32 = vld [vmem:[%s12326_s3 + $0x100] sm:$0xff]   ;;  %v5072_v43 = vpack.c.bf16 %v11461_v4, %v4726_v6 }
 0x4b1   : > { %v10322_v4 = vld [vmem:[%s12327_s4] sm:$0xff]  }
 0x4b2   : > { %9425 = vmatpush3.bf16.msra.mxu1 %v10309_v56  ;;  %v10319_v56 = vld [vmem:[%s12326_s3 + $0x108] sm:$0xff]  }
 0x4b3   : > { %9434 = vmatprep.subr.bf16.mxu1 %v10310_v16 }
 0x4b5   : > { %9419 = vmatmul.mubr.msk.bf16.gmra.mrb[12].mxu1 %vm307_vm2, %v11546_v11 }
 0x4b6   : > { %9426 = vmatprep.mubr.msk.bf16.mxu1 %vm307_vm2, %v4499_v53 }
 0x4bd   : > { %9427 = vmatmul.mubr.msk.bf16.vlgmr.msra.gmra.mrb[8].mxu1 %vm307_vm2, %v11552_v25 }
 0x4be   : > { %9435 = vmatpush3.bf16.msra.mxu1 %v10310_v16  ;;  %9430 = vmatprep.mubr.msk.bf16.mxu1 %vm307_vm2, %v11557_v49  ;;  %v10320_v16 = vld [vmem:[%s12326_s3 + $0x110] sm:$0xff]  }
 0x4bf   : > { %9436 = vmatprep.subr.bf16.mxu1 %v10311_v42 }
 0x4c2   : > { %9437 = vmatpush3.bf16.msra.mxu1 %v10311_v42 }
 0x4c3   : > { %9446 = vmatprep.subr.bf16.mxu1 %v10312_v2 }
 0x4c5   : > { %9431 = vmatmul.mubr.msk.bf16.gmra.mrb[12].mxu1 %vm307_vm2, %v11566_v28 }
 0x4c6   : > { %9438 = vmatprep.mubr.msk.bf16.mxu1 %vm307_vm2, %v4613_v29 }
 0x4cd   : > { %9439 = vmatmul.mubr.msk.bf16.vlgmr.msra.gmra.mrb[8].mxu1 %vm307_vm2, %v4614_v46 }
 0x4ce   : > { %9447 = vmatpush3.bf16.msra.mxu1 %v10312_v2  ;;  %9442 = vmatprep.mubr.msk.bf16.mxu1 %vm307_vm2, %v4615_v63 }
 0x4cf   : > { %9448 = vmatprep.subr.bf16.mxu1 %v10313_v1 }
 0x4d2   : > { %9449 = vmatpush3.bf16.msra.mxu1 %v10313_v1 }
 0x4d3   : > { %9458 = vmatprep.subr.bf16.mxu1 %v10314_v40 }
 0x4d5   : > { %9443 = vmatmul.mubr.msk.bf16.gmra.mrb[12].mxu1 %vm307_vm2, %v4616_v34 }
 0x4d6   : > { %9450 = vmatprep.mubr.msk.bf16.mxu1 %vm307_vm2, %v4727_v7 }
 0x4dd   : > { %9451 = vmatmul.mubr.msk.bf16.vlgmr.msra.gmra.mrb[8].mxu1 %vm307_vm2, %v4728_v38 }
 0x4de   : > { %9459 = vmatpush3.bf16.msra.mxu1 %v10314_v40  ;;  %9454 = vmatprep.mubr.msk.bf16.mxu1 %vm307_vm2, %v4729_v10 }
 0x4df   : > { %9460 = vmatprep.subr.bf16.mxu1 %v10315_v61 }
 0x4e2   : > { %9461 = vmatpush3.bf16.msra.mxu1 %v10315_v61 }
 0x4e3   : > { %9470 = vmatprep.subr.bf16.mxu1 %v10316_v14 }
 0x4e5   : > { %9455 = vmatmul.mubr.msk.bf16.gmra.mrb[12].mxu1 %vm307_vm2, %v4730_v17 }
 0x4e6   : > { %9462 = vmatprep.mubr.msk.bf16.mxu1 %vm307_vm2, %v4841_v22 }
 0x4ed   : > { %9463 = vmatmul.mubr.msk.bf16.vlgmr.msra.gmra.mrb[8].mxu1 %vm307_vm2, %v4842_v51  ;;  %v5316_v51 = vld [vmem:[%s12328_s5] sm:$0x1] }
 0x4ee   : > { %9471 = vmatpush3.bf16.msra.mxu1 %v10316_v14  ;;  %9466 = vmatprep.mubr.msk.bf16.mxu1 %vm307_vm2, %v4843_v45  ;;  %v5374_v14 = vld [vmem:[%s12329_s6] sm:$0x1] }
 0x4ef   : > { %9472 = vmatprep.subr.bf16.mxu1 %v10317_v39  ;;  %v5382_v22 = vsel %vm5380_vm5, %v5374_v14, 0 }
 0x4f2   : > { %9473 = vmatpush3.bf16.msra.mxu1 %v10317_v39 }
 0x4f3   : > { %9482 = vmatprep.subr.bf16.mxu1 %v10318_v32 }
 0x4f5   : > { %9467 = vmatmul.mubr.msk.bf16.gmra.mrb[12].mxu1 %vm307_vm2, %v4844_v44 }
 0x4f6   : > { %9474 = vmatprep.mubr.msk.bf16.mxu1 %vm307_vm2, %v11532_v57  ;;  %v10321_v57 = vld [vmem:[%s12326_s3 + $0x118] sm:$0xff]  }
 0x4fd   : > { %9475 = vmatmul.mubr.msk.bf16.vlgmr.msra.gmra.mrb[8].mxu1 %vm307_vm2, %v11537_v48 }
 0x4fe   : > { %9483 = vmatpush3.bf16.msra.mxu1 %v10318_v32  ;;  %9478 = vmatprep.mubr.msk.bf16.mxu1 %vm307_vm2, %v11546_v11 }
 0x4ff   : > { %9484 = vmatprep.subr.bf16.mxu1 %v10319_v56 }
 0x502   : > { %9485 = vmatpush3.bf16.msra.mxu1 %v10319_v56 }
 0x503   : > { %9494 = vmatprep.subr.bf16.mxu1 %v10320_v16 }
 0x505   : > { %9479 = vmatmul.mubr.msk.bf16.gmra.mrb[12].mxu1 %vm307_vm2, %v4958_v8  ;;  %v10324_v8 = vld [vmem:[%s12326_s3 + $0x130] sm:$0xff]  }
 0x506   : > { %9486 = vmatprep.mubr.msk.bf16.mxu1 %vm307_vm2, %v11500_v33  ;;  %v5186_v33 = vpack.c.bf16 %v11471_v55, %v4840_v0 }
 0x50d   : > { %9487 = vmatmul.mubr.msk.bf16.vlgmr.msra.gmra.mrb[8].mxu1 %vm307_vm2, %v11516_v59  ;;  %v10323_v59 = vld [vmem:[%s12327_s4 + $0x8] sm:$0xff]  }
 0x50e   : > { %9495 = vmatpush3.bf16.msra.mxu1 %v10320_v16  ;;  %9490 = vmatprep.mubr.msk.bf16.mxu1 %vm307_vm2, %v11526_v41 }
 0x50f   : > { %9496 = vmatprep.subr.bf16.mxu1 %v10321_v57 }
 0x512   : > { %9497 = vmatpush3.bf16.msra.mxu1 %v10321_v57  ;;  %v10325_v57 = vld [vmem:[%s12326_s3 + $0x138] sm:$0xff]  }
 0x513   : > { %9506 = vmatprep.subr.bf16.mxu1 %v10379_v36 }
 0x515   : > { %9491 = vmatmul.mubr.msk.bf16.gmra.mrb[12].mxu1 %vm307_vm2, %v5072_v43  ;;  %v11702_v43 = vld [vmem:[%s12326_s3 + $0x120] sm:$0xff]  }
 0x516   : > { %9498 = vmatprep.mubr.msk.bf16.mxu1 %vm307_vm2, %v11552_v25 }
 0x51d   : > { %9499 = vmatmul.mubr.msk.bf16.vlgmr.msra.gmra.mrb[8].mxu1 %vm307_vm2, %v11557_v49 }
 0x51e   : > { %9502 = vmatprep.mubr.msk.bf16.mxu1 %vm307_vm2, %v11566_v28  ;;  %9507 = vmatpush3.bf16.msra.mxu1 %v10322_v4 }
 0x51f   : > { %9508 = vmatprep.subr.bf16.mxu1 %v10379_v36 }
 0x522   : > { %9509 = vmatpush3.bf16.msra.mxu1 %v10323_v59 }
 0x523   : > { %9514 = vmatprep.subr.bf16.mxu1 %v10379_v36 }
 0x525   : > { %9503 = vmatmul.mubr.msk.bf16.gmra.mrb[12].mxu1 %vm307_vm2, %v5186_v33  ;;  %v5375_v33 = vld [vmem:[%s12330_s7] sm:$0x1] }
 0x526   : > { %9510 = vmatprep.mubr.msk.bf16.mxu1 %vm10380_vm4, %v10379_v36 }
 0x5f0   : > { %v11653_v55 = vpop.f32.mrb[8].mxu1 }
 0x5f1   : > { %v11655_v41 = vpop.f32.mrb[9].mxu1  ;;  %v5292_v18 = vsel %vm307_vm2, %v11653_v55, 0.0 }
 0x5f2   : > { %v11657_v48 = vpop.f32.mrb[10].mxu1  ;;  %v5289_v5 = vsel %vm307_vm2, %v11655_v41, 0.0 }
 0x5f3   : > { %v11659_v3 = vpop.f32.mrb[11].mxu1  ;;  %v5294_v24 = vsel %vm307_vm2, %v11657_v48, 0.0 }
 0x5f4   : > { %v5290_v11 = vsel %vm307_vm2, %v11659_v3, 0.0 }
 0x5f5   : > { %v5291_v53 = vadd.f32 %v5290_v11, %v5289_v5 }
 0x5f7   : > { %v5293_v19 = vadd.f32 %v5292_v18, %v5291_v53 }
 0x5f8   : > { %v11669_v25 = vpop.f32.mrb[12].mxu1 }
 0x5f9   : > { %v11671_v37 = vpop.f32.mrb[13].mxu1  ;;  %v5295_v42 = vadd.f32 %v5294_v24, %v5293_v19  ;;  %v5300_v46 = vsel %vm307_vm2, %v11669_v25, 0.0 }
 0x5fa   : > { %v5296_v49 = vsel %vm307_vm2, %v11671_v37, 0.0  ;;  %v11675_v2 = vpop.f32.mrb[14].mxu1 }
 0x5fb   : > { %v5297_v54 = vadd.f32 %v5296_v49, %v5295_v42  ;;  %v5269_v13 = vpop.f32.mrb[15].mxu1  ;;  %v5302_v63 = vsel %vm307_vm2, %v11675_v2, 0.0  ;;  %v5430_v49 = vlaneseq }
 0x5fc   : > { %v5298_v28 = vsel %vm307_vm2, %v5269_v13, 0.0 }
 0x5fd   : > { %v5299_v29 = vadd.f32 %v5298_v28, %v5297_v54  ;;  %v11708_v54 = vshrl.u32 %v5430_v49, 7 }
 0x5ff   : > { %v5301_v1 = vadd.f32 %v5300_v46, %v5299_v29  ;;  %v5432_v28 = vsub.s32 0, %v11708_v54 }
 0x601   : > { %v5303_v40 = vadd.f32 %v5302_v63, %v5301_v1 }
 0x603   : > { %v5304_v60 = vrot.slane %v5303_v40, 4 }
 0x605   : > { %v5305_v34 = vadd.f32 %v5304_v60, %v5303_v40 }
 0x607   : > { %v5306_v7 = vrot.slane %v5305_v34, 2 }
 0x609   : > { %v5307_v38 = vadd.f32 %v5306_v7, %v5305_v34 }
 0x60b   : > { %v5308_v61 = vrot.slane %v5307_v38, 1 }
 0x60d   : > { %v5309_v10 = vadd.f32 %v5308_v61, %v5307_v38 }
 0x60f   : > { %v5310_v6 = vmul.f32 0.015625, %v5309_v10 }
 0x611   : > { %v5311_v17 = vpack.c.bf16 %v5310_v6, %v5310_v6  ;;  %v10328_v6 = vld [vmem:[%s12326_s3 + $0x140] sm:$0xff]  }
 0x613   : > { %9511 = vmatmul.mubr.msk.bf16.vlgmr.msra.gmra.mrb[16].mxu1 %vm307_vm2, %v5311_v17 }
 0x614   : > { %9515 = vmatpush3.bf16.msra.mxu1 %v5382_v22  ;;  %9516 = vmatprep.mubr.msk.bf16.mxu1 %vm10380_vm4, %v10379_v36 }
 0x615   : > { %9520 = vmatprep.subr.bf16.mxu1 %v10324_v8 }
 0x6e6   : > { %v5366_v39 = vpop.f32.mrb[16].mxu1 }
 0x6e7   : > { %v5367_v45 = vadd.f32 %v5366_v39, %v5316_v51  ;;  %v9512_v32 = vpop.f32.mrb[17].mxu1  ;;  %v11822_v51 = vld [vmem:[#allocation4] sm:$0xff] }
 0x6e8   : > { %v5369_v0 = vpop.f32.mrb[18].mxu1 }
 0x6e9   : > { %v5372_v44 = vmax.f32 %v5367_v45, 0.0  ;;  %v9513_v56 = vpop.f32.mrb[19].mxu1 }
 0x6eb   : > { %v5373_v16 = vpack.c.bf16 %v5372_v44, %v5372_v44 }
 0x6ed   : > { %9517 = vmatmul.mubr.msk.bf16.vlgmr.msra.gmra.mrb[20].mxu1 %vm5376_vm6, %v5373_v16 }
 0x6ee   : > { %9521 = vmatpush3.bf16.msra.mxu1 %v10324_v8 }
 0x6ef   : > { %9522 = vmatprep.subr.bf16.mxu1 %v10325_v57 }
 0x6f2   : > { %9523 = vmatpush3.bf16.msra.mxu1 %v10325_v57  ;;  %v10329_v57 = vld [vmem:[%s12326_s3 + $0x148] sm:$0xff]  }
 0x6f3   : > { %9532 = vmatprep.subr.bf16.mxu1 %v11702_v43 }
 0x7c0   : > { %v5418_v4 = vpop.f32.mrb[20].mxu1 }
 0x7c1   : > { %v5419_v59 = vadd.f32 %v5418_v4, %v5375_v33  ;;  %v9518_v5 = vpop.f32.mrb[21].mxu1  ;;  %v10330_v33 = vld [vmem:[%s12326_s3 + $0x150] sm:$0xff]  }
 0x7c2   : > { %v5421_v11 = vpop.f32.mrb[22].mxu1  ;;  %v11846_v5 = vld [vmem:[#allocation4 + $0x2] sm:$0xff] }
 0x7c3   : > { %v5424_v53 = vsub.f32 0.0, %v5419_v59  ;;  %v9519_v18 = vpop.f32.mrb[23].mxu1 }
 0x7c5   : > { %v5425_v19 = vmul.f32 1.442695, %v5424_v53 }
 0x7c7   : > { %10362 = vpow2.f32 %v5425_v19 }
 0x7d1   : > { %v10363_v24 = vpop.eup %10362 }
 0x7d2   : > { %v5427_v42 = vadd.f32 1.0, %v10363_v24 }
 0x7d4   : > { %10364 = vrcp.f32 %v5427_v42 }
 0x7de   : > { %v10365_v29 = vpop.eup %10364 }
 0x7df   : > { %v5433_v46 = vrot.slane %v10365_v29, %v5432_v28 }
 0x7e1   : > { %v5434_v1 = vmul.f32 %v5433_v46, %v11655_v41  ;;  %v5435_v63 = vmul.f32 %v5433_v46, %v11659_v3  ;;  %v5436_v40 = vmul.f32 %v11653_v55, %v5433_v46  ;;  %v5437_v60 = vmul.f32 %v11657_v48, %v5433_v46 }
 0x7e2   : > { %v5438_v34 = vmul.f32 %v5433_v46, %v11671_v37  ;;  %v5439_v7 = vmul.f32 %v5433_v46, %v5269_v13  ;;  %v5440_v38 = vmul.f32 %v11669_v25, %v5433_v46  ;;  %v5441_v61 = vmul.f32 %v11675_v2, %v5433_v46  ;;  %v10327_v13 = vld [vmem:[%s12326_s3 + $0x128] sm:$0xff]   ;;  %v10331_v46 = vld [vmem:[%s12326_s3 + $0x158] sm:$0xff]  }
 0x7e3   : > { %v11722_v10 = vadd.f32 %v5434_v1, %v3236_v20  ;;  %v11726_v41 = vadd.f32 %v5435_v63, %v3237_v15  ;;  %v11730_v55 = vadd.f32 %v5436_v40, %v3238_v12  ;;  %v11734_v48 = vadd.f32 %v5437_v60, %v3239_v26  ;;  %v10332_v63 = vld [vmem:[%s12326_s3 + $0x160] sm:$0xff]  }
 0x7e4   : > { %v11738_v3 = vadd.f32 %v5438_v34, %v3240_v62  ;;  %v11742_v31 = vadd.f32 %v5439_v7, %v3241_v21  ;;  %v11746_v20 = vadd.f32 %v5440_v38, %v3242_v35  ;;  %v11750_v52 = vadd.f32 %v5441_v61, %v3243_v27  ;;  %v11784_v21 = vld [vmem:[#allocation4 + $0x1] sm:$0xff]  ;;  %v10333_v61 = vld [vmem:[%s12326_s3 + $0x168] sm:$0xff]  }
 0x7e5   : > { %v5450_v15 = vmax.f32 %v11722_v10, 0.0  ;;  %v5451_v58 = vmax.f32 %v11726_v41, 0.0  ;;  %v5452_v12 = vmax.f32 %v11730_v55, 0.0  ;;  %v5453_v47 = vmax.f32 %v11734_v48, 0.0 }
 0x7e6   : > { %v5454_v26 = vmax.f32 %v11738_v3, 0.0  ;;  %v5455_v50 = vmax.f32 %v11742_v31, 0.0  ;;  %v5456_v62 = vmax.f32 %v11746_v20, 0.0  ;;  %v5457_v30 = vmax.f32 %v11750_v52, 0.0 }
 0x7e7   : > { %5458 = vst.msk [vmem:[#allocation4 + $0x11] sm:$0xff] %vm307_vm2, %v5450_v15  ;;  %5459 = vst.msk [vmem:[#allocation4 + $0x21] sm:$0xff] %vm307_vm2, %v5451_v58 }
 0x7e8   : > { %5460 = vst.msk [vmem:[#allocation4 + $0x31] sm:$0xff] %vm307_vm2, %v5452_v12  ;;  %5461 = vst.msk [vmem:[#allocation4 + $0x41] sm:$0xff] %vm307_vm2, %v5453_v47 }
 0x7e9   : > { %5462 = vst.msk [vmem:[#allocation4 + $0x51] sm:$0xff] %vm307_vm2, %v5454_v26  ;;  %5463 = vst.msk [vmem:[#allocation4 + $0x61] sm:$0xff] %vm307_vm2, %v5455_v50 }
 0x7ea   : > { %5464 = vst.msk [vmem:[#allocation4 + $0x71] sm:$0xff] %vm307_vm2, %v5456_v62  ;;  %5465 = vst.msk [vmem:[#allocation4 + $0x81] sm:$0xff] %vm307_vm2, %v5457_v30 }
 0x7ee   : > { %v11786_v23 = vld [vmem:[#allocation4 + $0x11] sm:$0xff]  ;;  %v11788_v35 = vld [vmem:[#allocation4 + $0x21] sm:$0xff] }
 0x7ef   : > { %v11790_v9 = vld [vmem:[#allocation4 + $0x31] sm:$0xff]  ;;  %v5491_v27 = vpack.c.bf16 %v11786_v23, %v11784_v21  ;;  %v11798_v37 = vld [vmem:[#allocation4 + $0x41] sm:$0xff] }
 0x7f0   : > { %v11796_v25 = vpack.c.bf16 %v11790_v9, %v11788_v35  ;;  %v11800_v2 = vld [vmem:[#allocation4 + $0x51] sm:$0xff]  ;;  %v11818_v17 = vld [vmem:[#allocation4 + $0x61] sm:$0xff] }
 0x7f1   : > { %9524 = vmatprep.mubr.msk.bf16.mxu1 %vm307_vm2, %v5491_v27  ;;  %v11808_v14 = vpack.c.bf16 %v11800_v2, %v11798_v37  ;;  %v11820_v22 = vld [vmem:[#allocation4 + $0x71] sm:$0xff]  ;;  %v5468_v0 = vld [vmem:[#allocation4 + $0x20] sm:$0xff] }
 0x7f2   : > { %9525 = vmatmul.mubr.msk.bf16.vlgmr.msra.gmra.mrb[24].mxu1 %vm307_vm2, %v11796_v25  ;;  %v5467_v39 = vld [vmem:[#allocation4 + $0x10] sm:$0xff]  ;;  %v11826_v45 = vpack.c.bf16 %v11820_v22, %v11818_v17  ;;  %v5470_v56 = vld [vmem:[#allocation4 + $0x40] sm:$0xff] }
 0x7f3   : > { %9533 = vmatpush3.bf16.msra.mxu1 %v11702_v43  ;;  %9528 = vmatprep.mubr.msk.bf16.mxu1 %vm307_vm2, %v11808_v14  ;;  %v5474_v32 = vpack.c.bf16 %v5467_v39, %v11822_v51  ;;  %v5469_v44 = vld [vmem:[#allocation4 + $0x30] sm:$0xff]  ;;  %v5472_v4 = vld [vmem:[#allocation4 + $0x60] sm:$0xff]  ;;  %v5800_v7 = vpack.c.bf16 %v5468_v0, %v5467_v39 }
 0x7f4   : > { %9534 = vmatprep.subr.bf16.mxu1 %v10327_v13  ;;  %v5471_v16 = vld [vmem:[#allocation4 + $0x50] sm:$0xff]  ;;  %v11832_v8 = vpack.c.bf16 %v5469_v44, %v5468_v0  ;;  %v5680_v19 = vld [vmem:[#allocation4 + $0x22] sm:$0xff]  ;;  %v5801_v38 = vpack.c.bf16 %v5470_v56, %v5469_v44  ;;  %v5915_v0 = vpack.c.bf16 %v11798_v37, %v11790_v9 }
 0x7f5   : > { %v11837_v43 = vpack.c.bf16 %v5471_v16, %v5470_v56  ;;  %v5473_v59 = vld [vmem:[#allocation4 + $0x70] sm:$0xff]  ;;  %v5682_v42 = vld [vmem:[#allocation4 + $0x42] sm:$0xff]  ;;  %v5802_v27 = vpack.c.bf16 %v5472_v4, %v5471_v16  ;;  %v5916_v56 = vpack.c.bf16 %v11818_v17, %v11800_v2  ;;  %v10337_v17 = vld [vmem:[%s12326_s3 + $0x188] sm:$0xff]  }
 0x7f6   : > { %v5679_v11 = vld [vmem:[#allocation4 + $0x12] sm:$0xff]  ;;  %v11848_v53 = vpack.c.bf16 %v5473_v59, %v5472_v4  ;;  %v5684_v40 = vld [vmem:[#allocation4 + $0x62] sm:$0xff] }
 0x7f7   : > { %9535 = vmatpush3.bf16.msra.mxu1 %v10327_v13  ;;  %v5686_v18 = vpack.c.bf16 %v5679_v11, %v11846_v5  ;;  %v5681_v24 = vld [vmem:[#allocation4 + $0x32] sm:$0xff]  ;;  %v10334_v13 = vld [vmem:[%s12326_s3 + $0x170] sm:$0xff]   ;;  %v10335_v44 = vld [vmem:[%s12326_s3 + $0x178] sm:$0xff]   ;;  %v6028_v37 = vpack.c.bf16 %v5680_v19, %v5679_v11 }
 0x7f8   : > { %9544 = vmatprep.subr.bf16.mxu1 %v10328_v6  ;;  %v5683_v49 = vld [vmem:[#allocation4 + $0x52] sm:$0xff]  ;;  %v11854_v29 = vpack.c.bf16 %v5681_v24, %v5680_v19  ;;  %v6029_v2 = vpack.c.bf16 %v5682_v42, %v5681_v24  ;;  %v10339_v4 = vld [vmem:[%s12326_s3 + $0x198] sm:$0xff]   ;;  %v10344_v24 = vld [vmem:[%s12326_s3 + $0x1b0] sm:$0xff]  }
 0x7f9   : > { %v11859_v1 = vpack.c.bf16 %v5683_v49, %v5682_v42  ;;  %v5685_v60 = vld [vmem:[#allocation4 + $0x72] sm:$0xff]  ;;  %v6030_v16 = vpack.c.bf16 %v5684_v40, %v5683_v49 }
 0x7fa   : > { %9529 = vmatmul.mubr.msk.bf16.gmra.mrb[28].mxu1 %vm307_vm2, %v11826_v45  ;;  %v11868_v34 = vpack.c.bf16 %v5685_v60, %v5684_v40  ;;  %v11921_v11 = vld [vmem:[#allocation4 + $0x90] sm:$0xff]  ;;  %v10343_v19 = vld [vmem:[%s12326_s3 + $0x1c8] sm:$0xff]  }
 0x7fb   : > { %9536 = vmatprep.mubr.msk.bf16.mxu1 %vm307_vm2, %v5474_v32  ;;  %v5914_v32 = vpack.c.bf16 %v11788_v35, %v11786_v23  ;;  %v10336_v23 = vld [vmem:[%s12326_s3 + $0x180] sm:$0xff]   ;;  %v5913_v35 = vld [vmem:[#allocation4 + $0x81] sm:$0xff] }
 0x7fc   : > { %v5917_v9 = vpack.c.bf16 %v5913_v35, %v11820_v22  ;;  %v10338_v22 = vld [vmem:[%s12326_s3 + $0x190] sm:$0xff]  }
 0x802   : > { %9537 = vmatmul.mubr.msk.bf16.vlgmr.msra.gmra.mrb[24].mxu1 %vm307_vm2, %v11832_v8 }
 0x803   : > { %9545 = vmatpush3.bf16.msra.mxu1 %v10328_v6  ;;  %9540 = vmatprep.mubr.msk.bf16.mxu1 %vm307_vm2, %v11837_v43  ;;  %v5799_v6 = vld [vmem:[#allocation4 + $0x80] sm:$0xff] }
 0x804   : > { %9546 = vmatprep.subr.bf16.mxu1 %v10329_v57  ;;  %v5803_v39 = vpack.c.bf16 %v5799_v6, %v5473_v59  ;;  %v10340_v59 = vld [vmem:[%s12326_s3 + $0x1a0] sm:$0xff]  }
 0x807   : > { %9547 = vmatpush3.bf16.msra.mxu1 %v10329_v57  ;;  %v6027_v57 = vld [vmem:[#allocation4 + $0x82] sm:$0xff] }
 0x808   : > { %9556 = vmatprep.subr.bf16.mxu1 %v10330_v33 }
 0x80a   : > { %9541 = vmatmul.mubr.msk.bf16.gmra.mrb[28].mxu1 %vm307_vm2, %v11848_v53 }
 0x80b   : > { %9548 = vmatprep.mubr.msk.bf16.mxu1 %vm307_vm2, %v5686_v18  ;;  %v11937_v18 = vld [vmem:[#allocation4 + $0x91] sm:$0xff] }
 0x812   : > { %9549 = vmatmul.mubr.msk.bf16.vlgmr.msra.gmra.mrb[24].mxu1 %vm307_vm2, %v11854_v29 }
 0x813   : > { %9557 = vmatpush3.bf16.msra.mxu1 %v10330_v33  ;;  %9552 = vmatprep.mubr.msk.bf16.mxu1 %vm307_vm2, %v11859_v1  ;;  %v6031_v33 = vpack.c.bf16 %v6027_v57, %v5685_v60 }
 0x814   : > { %9558 = vmatprep.subr.bf16.mxu1 %v10331_v46 }
 0x817   : > { %9559 = vmatpush3.bf16.msra.mxu1 %v10331_v46 }
 0x818   : > { %9568 = vmatprep.subr.bf16.mxu1 %v10332_v63 }
 0x81a   : > { %9553 = vmatmul.mubr.msk.bf16.gmra.mrb[28].mxu1 %vm307_vm2, %v11868_v34 }
 0x81b   : > { %9560 = vmatprep.mubr.msk.bf16.mxu1 %vm307_vm2, %v5800_v7 }
 0x822   : > { %9561 = vmatmul.mubr.msk.bf16.vlgmr.msra.gmra.mrb[24].mxu1 %vm307_vm2, %v5801_v38 }
 0x823   : > { %9569 = vmatpush3.bf16.msra.mxu1 %v10332_v63  ;;  %9564 = vmatprep.mubr.msk.bf16.mxu1 %vm307_vm2, %v5802_v27 }
 0x824   : > { %9570 = vmatprep.subr.bf16.mxu1 %v10333_v61 }
 0x827   : > { %9571 = vmatpush3.bf16.msra.mxu1 %v10333_v61 }
 0x828   : > { %9580 = vmatprep.subr.bf16.mxu1 %v10334_v13 }
 0x82a   : > { %9565 = vmatmul.mubr.msk.bf16.gmra.mrb[28].mxu1 %vm307_vm2, %v5803_v39 }
 0x82b   : > { %9572 = vmatprep.mubr.msk.bf16.mxu1 %vm307_vm2, %v5914_v32 }
 0x832   : > { %9573 = vmatmul.mubr.msk.bf16.vlgmr.msra.gmra.mrb[24].mxu1 %vm307_vm2, %v5915_v0 }
 0x833   : > { %9581 = vmatpush3.bf16.msra.mxu1 %v10334_v13  ;;  %9576 = vmatprep.mubr.msk.bf16.mxu1 %vm307_vm2, %v5916_v56 }
 0x834   : > { %9582 = vmatprep.subr.bf16.mxu1 %v10335_v44 }
 0x837   : > { %9583 = vmatpush3.bf16.msra.mxu1 %v10335_v44 }
 0x838   : > { %9592 = vmatprep.subr.bf16.mxu1 %v10336_v23 }
 0x83a   : > { %9577 = vmatmul.mubr.msk.bf16.gmra.mrb[28].mxu1 %vm307_vm2, %v5917_v9 }
 0x83b   : > { %9584 = vmatprep.mubr.msk.bf16.mxu1 %vm307_vm2, %v6028_v37 }
 0x842   : > { %9585 = vmatmul.mubr.msk.bf16.vlgmr.msra.gmra.mrb[24].mxu1 %vm307_vm2, %v6029_v2 }
 0x843   : > { %9593 = vmatpush3.bf16.msra.mxu1 %v10336_v23  ;;  %9588 = vmatprep.mubr.msk.bf16.mxu1 %vm307_vm2, %v6030_v16 }
 0x844   : > { %9594 = vmatprep.subr.bf16.mxu1 %v10337_v17 }
 0x847   : > { %9595 = vmatpush3.bf16.msra.mxu1 %v10337_v17 }
 0x848   : > { %9604 = vmatprep.subr.bf16.mxu1 %v10338_v22 }
 0x84a   : > { %9589 = vmatmul.mubr.msk.bf16.gmra.mrb[28].mxu1 %vm307_vm2, %v6031_v33 }
 0x84b   : > { %9596 = vmatprep.mubr.msk.bf16.mxu1 %vm307_vm2, %v11832_v8  ;;  %v6145_v8 = vpack.c.bf16 %v11921_v11, %v5799_v6 }
 0x852   : > { %9597 = vmatmul.mubr.msk.bf16.vlgmr.msra.gmra.mrb[24].mxu1 %vm307_vm2, %v11837_v43  ;;  %v10341_v43 = vld [vmem:[%s12326_s3 + $0x1a8] sm:$0xff]  }
 0x853   : > { %9605 = vmatpush3.bf16.msra.mxu1 %v10338_v22  ;;  %9600 = vmatprep.mubr.msk.bf16.mxu1 %vm307_vm2, %v11848_v53  ;;  %v10342_v53 = vld [vmem:[%s12326_s3 + $0x1c0] sm:$0xff]  }
 0x854   : > { %9606 = vmatprep.subr.bf16.mxu1 %v10339_v4 }
 0x857   : > { %9607 = vmatpush3.bf16.msra.mxu1 %v10339_v4  ;;  %v10360_v4 = vld [vmem:[%s12327_s4 + $0x10] sm:$0xff]  }
 0x858   : > { %9616 = vmatprep.subr.bf16.mxu1 %v10340_v59  ;;  %9737 = vmatpush3.bf16.msra.mxu0 %v10360_v4 }
 0x859   : > { %9738 = vmatprep.subr.bf16.mxu0 %v10379_v36 }
 0x85a   : > { %9601 = vmatmul.mubr.msk.bf16.gmra.mrb[28].mxu1 %vm307_vm2, %v6145_v8 }
 0x85b   : > { %9608 = vmatprep.mubr.msk.bf16.mxu1 %vm307_vm2, %v11796_v25  ;;  %v6259_v25 = vpack.c.bf16 %v11937_v18, %v5913_v35  ;;  %v10345_v35 = vld [vmem:[%s12326_s3 + $0x1b8] sm:$0xff]  }
 0x862   : > { %9609 = vmatmul.mubr.msk.bf16.vlgmr.msra.gmra.mrb[24].mxu1 %vm307_vm2, %v11808_v14  ;;  %v11947_v14 = vld [vmem:[#allocation4 + $0x92] sm:$0xff] }
 0x863   : > { %9617 = vmatpush3.bf16.msra.mxu1 %v10340_v59  ;;  %9612 = vmatprep.mubr.msk.bf16.mxu1 %vm307_vm2, %v11826_v45  ;;  %v6373_v45 = vpack.c.bf16 %v11947_v14, %v6027_v57 }
 0x864   : > { %9618 = vmatprep.subr.bf16.mxu1 %v10341_v43 }
 0x867   : > { %9619 = vmatpush3.bf16.msra.mxu1 %v10341_v43 }
 0x868   : > { %9628 = vmatprep.subr.bf16.mxu1 %v10342_v53 }
 0x86a   : > { %9613 = vmatmul.mubr.msk.bf16.gmra.mrb[28].mxu1 %vm307_vm2, %v6259_v25 }
 0x86b   : > { %9620 = vmatprep.mubr.msk.bf16.mxu1 %vm307_vm2, %v11854_v29 }
 0x872   : > { %9621 = vmatmul.mubr.msk.bf16.vlgmr.msra.gmra.mrb[24].mxu1 %vm307_vm2, %v11859_v1 }
 0x873   : > { %9624 = vmatprep.mubr.msk.bf16.mxu1 %vm307_vm2, %v11868_v34  ;;  %9629 = vmatpush3.bf16.msra.mxu1 %v10342_v53 }
 0x874   : > { %9630 = vmatprep.subr.bf16.mxu1 %v10343_v19 }
 0x877   : > { %9631 = vmatpush3.bf16.msra.mxu1 %v10343_v19  ;;  %v10348_v19 = vld [vmem:[%s12326_s3 + $0x1e0] sm:$0xff]  }
 0x878   : > { %9640 = vmatprep.subr.bf16.mxu1 %v10344_v24 }
 0x87a   : > { %9625 = vmatmul.mubr.msk.bf16.gmra.mrb[28].mxu1 %vm307_vm2, %v6373_v45 }
 0x945   : > { %v9622_v42 = vpop.f32.mrb[24].mxu1 }
 0x946   : > { %v6478_v49 = vmax.f32 %v9622_v42, 0.0  ;;  %v6437_v29 = vpop.f32.mrb[25].mxu1 }
 0x947   : > { %v6476_v46 = vmax.f32 %v6437_v29, 0.0  ;;  %v9623_v1 = vpop.f32.mrb[26].mxu1 }
 0x948   : > { %6486 = vst.msk [vmem:[#allocation4 + $0x31] sm:$0xff] %vm307_vm2, %v6478_v49  ;;  %v6479_v63 = vmax.f32 %v9623_v1, 0.0  ;;  %v6440_v40 = vpop.f32.mrb[27].mxu1 }
 0x949   : > { %6484 = vst.msk [vmem:[#allocation4 + $0x11] sm:$0xff] %vm307_vm2, %v6476_v46  ;;  %v6477_v60 = vmax.f32 %v6440_v40, 0.0 }
 0x94a   : > { %6487 = vst.msk [vmem:[#allocation4 + $0x41] sm:$0xff] %vm307_vm2, %v6479_v63 }
 0x94b   : > { %6485 = vst.msk [vmem:[#allocation4 + $0x21] sm:$0xff] %vm307_vm2, %v6477_v60 }
 0x94d   : > { %v9626_v34 = vpop.f32.mrb[28].mxu1 }
 0x94e   : > { %v6482_v7 = vmax.f32 %v9626_v34, 0.0  ;;  %v6453_v38 = vpop.f32.mrb[29].mxu1 }
 0x94f   : > { %v6480_v61 = vmax.f32 %v6453_v38, 0.0  ;;  %v9627_v27 = vpop.f32.mrb[30].mxu1  ;;  %v11970_v56 = vld [vmem:[#allocation4 + $0x31] sm:$0xff] }
 0x950   : > { %6490 = vst.msk [vmem:[#allocation4 + $0x71] sm:$0xff] %vm307_vm2, %v6482_v7  ;;  %v6483_v13 = vmax.f32 %v9627_v27, 0.0  ;;  %v6456_v6 = vpop.f32.mrb[31].mxu1  ;;  %v11962_v39 = vld [vmem:[#allocation4 + $0x11] sm:$0xff] }
 0x951   : > { %6488 = vst.msk [vmem:[#allocation4 + $0x51] sm:$0xff] %vm307_vm2, %v6480_v61  ;;  %v6481_v32 = vmax.f32 %v6456_v6, 0.0  ;;  %v6517_v0 = vpack.c.bf16 %v11962_v39, %v11784_v21  ;;  %v10346_v21 = vld [vmem:[%s12326_s3 + $0x1d0] sm:$0xff]   ;;  %v6493_v17 = vld [vmem:[#allocation4 + $0x10] sm:$0xff]  ;;  %v10349_v7 = vld [vmem:[%s12326_s3 + $0x1e8] sm:$0xff]  }
 0x952   : > { %6491 = vst.msk [vmem:[#allocation4 + $0x81] sm:$0xff] %vm307_vm2, %v6483_v13  ;;  %v11968_v44 = vld [vmem:[#allocation4 + $0x21] sm:$0xff]  ;;  %v6500_v33 = vpack.c.bf16 %v6493_v17, %v11822_v51  ;;  %v6495_v43 = vld [vmem:[#allocation4 + $0x30] sm:$0xff] }
 0x953   : > { %6489 = vst.msk [vmem:[#allocation4 + $0x61] sm:$0xff] %vm307_vm2, %v6481_v32  ;;  %9632 = vmatprep.mubr.msk.bf16.mxu1 %vm307_vm2, %v6517_v0  ;;  %v11976_v23 = vpack.c.bf16 %v11970_v56, %v11968_v44  ;;  %v11986_v9 = vld [vmem:[#allocation4 + $0x41] sm:$0xff]  ;;  %v6705_v42 = vld [vmem:[#allocation4 + $0x12] sm:$0xff]  ;;  %v6940_v4 = vpack.c.bf16 %v11968_v44, %v11962_v39 }
 0x954   : > { %v6494_v59 = vld [vmem:[#allocation4 + $0x20] sm:$0xff]  ;;  %v10347_v51 = vld [vmem:[%s12326_s3 + $0x1d8] sm:$0xff]   ;;  %v6712_v46 = vpack.c.bf16 %v6705_v42, %v11846_v5  ;;  %v6707_v40 = vld [vmem:[#allocation4 + $0x32] sm:$0xff] }
 0x955   : > { %9633 = vmatmul.mubr.msk.bf16.vlgmr.msra.gmra.mrb[32].mxu1 %vm307_vm2, %v11976_v23  ;;  %v12012_v53 = vpack.c.bf16 %v6495_v43, %v6494_v59  ;;  %v6496_v25 = vld [vmem:[#allocation4 + $0x40] sm:$0xff]  ;;  %v6826_v6 = vpack.c.bf16 %v6494_v59, %v6493_v17  ;;  %v10351_v0 = vld [vmem:[%s12326_s3 + $0x1f8] sm:$0xff]   ;;  %v6941_v59 = vpack.c.bf16 %v11986_v9, %v11970_v56 }
 0x956   : > { %9641 = vmatpush3.bf16.msra.mxu1 %v10344_v24  ;;  %v6706_v1 = vld [vmem:[#allocation4 + $0x22] sm:$0xff]  ;;  %v6827_v32 = vpack.c.bf16 %v6496_v25, %v6495_v43 }
 0x957   : > { %9642 = vmatprep.subr.bf16.mxu1 %v10345_v35  ;;  %v11996_v22 = vld [vmem:[#allocation4 + $0x71] sm:$0xff]  ;;  %v12032_v60 = vpack.c.bf16 %v6707_v40, %v6706_v1  ;;  %v6708_v34 = vld [vmem:[#allocation4 + $0x42] sm:$0xff] }
 0x958   : > { %v11988_v37 = vld [vmem:[#allocation4 + $0x51] sm:$0xff]  ;;  %v10350_v5 = vld [vmem:[%s12326_s3 + $0x1f0] sm:$0xff]  }
 0x959   : > { %v11992_v2 = vpack.c.bf16 %v11988_v37, %v11986_v9  ;;  %v6497_v8 = vld [vmem:[#allocation4 + $0x50] sm:$0xff]  ;;  %v6825_v17 = vld [vmem:[#allocation4 + $0x80] sm:$0xff]  ;;  %v7054_v9 = vpack.c.bf16 %v6706_v1, %v6705_v42 }
 0x95a   : > { %v11994_v16 = vld [vmem:[#allocation4 + $0x61] sm:$0xff]  ;;  %9643 = vmatpush3.bf16.msra.mxu1 %v10345_v35  ;;  %v12017_v45 = vpack.c.bf16 %v6497_v8, %v6496_v25  ;;  %v6499_v49 = vld [vmem:[#allocation4 + $0x70] sm:$0xff] }
 0x95b   : > { %9636 = vmatprep.mubr.msk.bf16.mxu1 %vm307_vm2, %v11992_v2  ;;  %v12002_v57 = vpack.c.bf16 %v11996_v22, %v11994_v16  ;;  %9652 = vmatprep.subr.bf16.mxu1 %v10346_v21  ;;  %v6498_v24 = vld [vmem:[#allocation4 + $0x60] sm:$0xff]  ;;  %v6709_v63 = vld [vmem:[#allocation4 + $0x52] sm:$0xff]  ;;  %v6942_v43 = vpack.c.bf16 %v11994_v16, %v11988_v37  ;;  %v7055_v37 = vpack.c.bf16 %v6708_v34, %v6707_v40  ;;  %v10355_v16 = vld [vmem:[%s12326_s3 + $0x218] sm:$0xff]  }
 0x95c   : > { %v12026_v29 = vpack.c.bf16 %v6499_v49, %v6498_v24  ;;  %v12037_v38 = vpack.c.bf16 %v6709_v63, %v6708_v34  ;;  %v6710_v61 = vld [vmem:[#allocation4 + $0x62] sm:$0xff]  ;;  %v6711_v27 = vld [vmem:[#allocation4 + $0x72] sm:$0xff]  ;;  %v6828_v35 = vpack.c.bf16 %v6498_v24, %v6497_v8 }
 0x95d   : > { %9637 = vmatmul.mubr.msk.bf16.gmra.mrb[36].mxu1 %vm307_vm2, %v12002_v57  ;;  %v12046_v13 = vpack.c.bf16 %v6711_v27, %v6710_v61  ;;  %v10353_v8 = vld [vmem:[%s12326_s3 + $0x208] sm:$0xff]   ;;  %v10354_v39 = vld [vmem:[%s12326_s3 + $0x210] sm:$0xff]   ;;  %v7056_v25 = vpack.c.bf16 %v6710_v61, %v6709_v63 }
 0x95e   : > { %9644 = vmatprep.mubr.msk.bf16.mxu1 %vm307_vm2, %v6500_v33  ;;  %v6829_v33 = vpack.c.bf16 %v6825_v17, %v6499_v49  ;;  %v6939_v44 = vld [vmem:[#allocation4 + $0x81] sm:$0xff]  ;;  %v10357_v24 = vld [vmem:[%s12326_s3 + $0x228] sm:$0xff]   ;;  %v7171_v49 = vpack.c.bf16 %v11921_v11, %v6825_v17 }
 0x95f   : > { %v6943_v56 = vpack.c.bf16 %v6939_v44, %v11996_v22  ;;  %v10356_v22 = vld [vmem:[%s12326_s3 + $0x220] sm:$0xff]   ;;  %v10358_v42 = vld [vmem:[%s12326_s3 + $0x230] sm:$0xff]   ;;  %v7285_v11 = vpack.c.bf16 %v11937_v18, %v6939_v44 }
 0x960   : > { %v8599_v44 = vld [vmem:[%s12329_s6 + $0x1] sm:$0x1] }
 0x965   : > { %9645 = vmatmul.mubr.msk.bf16.vlgmr.msra.gmra.mrb[32].mxu1 %vm307_vm2, %v12012_v53 }
 0x966   : > { %9653 = vmatpush3.bf16.msra.mxu1 %v10346_v21  ;;  %9648 = vmatprep.mubr.msk.bf16.mxu1 %vm307_vm2, %v12017_v45  ;;  %v10352_v21 = vld [vmem:[%s12326_s3 + $0x200] sm:$0xff]  }
 0x967   : > { %9654 = vmatprep.subr.bf16.mxu1 %v10347_v51 }
 0x96a   : > { %9655 = vmatpush3.bf16.msra.mxu1 %v10347_v51  ;;  %v7053_v51 = vld [vmem:[#allocation4 + $0x82] sm:$0xff] }
 0x96b   : > { %9664 = vmatprep.subr.bf16.mxu1 %v10348_v19 }
 0x96d   : > { %9649 = vmatmul.mubr.msk.bf16.gmra.mrb[36].mxu1 %vm307_vm2, %v12026_v29 }
 0x96e   : > { %9656 = vmatprep.mubr.msk.bf16.mxu1 %vm307_vm2, %v6712_v46 }
 0x975   : > { %9657 = vmatmul.mubr.msk.bf16.vlgmr.msra.gmra.mrb[32].mxu1 %vm307_vm2, %v12032_v60 }
 0x976   : > { %9665 = vmatpush3.bf16.msra.mxu1 %v10348_v19  ;;  %9660 = vmatprep.mubr.msk.bf16.mxu1 %vm307_vm2, %v12037_v38  ;;  %v7057_v19 = vpack.c.bf16 %v7053_v51, %v6711_v27 }
 0x977   : > { %9666 = vmatprep.subr.bf16.mxu1 %v10349_v7 }
 0x97a   : > { %9667 = vmatpush3.bf16.msra.mxu1 %v10349_v7 }
 0x97b   : > { %9676 = vmatprep.subr.bf16.mxu1 %v10350_v5 }
 0x97d   : > { %9661 = vmatmul.mubr.msk.bf16.gmra.mrb[36].mxu1 %vm307_vm2, %v12046_v13 }
 0x97e   : > { %9668 = vmatprep.mubr.msk.bf16.mxu1 %vm307_vm2, %v6826_v6 }
 0x985   : > { %9669 = vmatmul.mubr.msk.bf16.vlgmr.msra.gmra.mrb[32].mxu1 %vm307_vm2, %v6827_v32 }
 0x986   : > { %9677 = vmatpush3.bf16.msra.mxu1 %v10350_v5  ;;  %9672 = vmatprep.mubr.msk.bf16.mxu1 %vm307_vm2, %v6828_v35 }
 0x987   : > { %9678 = vmatprep.subr.bf16.mxu1 %v10351_v0 }
 0x98a   : > { %9679 = vmatpush3.bf16.msra.mxu1 %v10351_v0 }
 0x98b   : > { %9688 = vmatprep.subr.bf16.mxu1 %v10352_v21 }
 0x98d   : > { %9673 = vmatmul.mubr.msk.bf16.gmra.mrb[36].mxu1 %vm307_vm2, %v6829_v33 }
 0x98e   : > { %9680 = vmatprep.mubr.msk.bf16.mxu1 %vm307_vm2, %v6940_v4 }
 0x995   : > { %9681 = vmatmul.mubr.msk.bf16.vlgmr.msra.gmra.mrb[32].mxu1 %vm307_vm2, %v6941_v59 }
 0x996   : > { %9689 = vmatpush3.bf16.msra.mxu1 %v10352_v21  ;;  %9684 = vmatprep.mubr.msk.bf16.mxu1 %vm307_vm2, %v6942_v43 }
 0x997   : > { %9690 = vmatprep.subr.bf16.mxu1 %v10353_v8 }
 0x99a   : > { %9691 = vmatpush3.bf16.msra.mxu1 %v10353_v8 }
 0x99b   : > { %9700 = vmatprep.subr.bf16.mxu1 %v10354_v39 }
 0x99d   : > { %9685 = vmatmul.mubr.msk.bf16.gmra.mrb[36].mxu1 %vm307_vm2, %v6943_v56 }
 0x99e   : > { %9692 = vmatprep.mubr.msk.bf16.mxu1 %vm307_vm2, %v7054_v9 }
 0x9a5   : > { %9693 = vmatmul.mubr.msk.bf16.vlgmr.msra.gmra.mrb[32].mxu1 %vm307_vm2, %v7055_v37  ;;  %v7597_v37 = vsel %vm5380_vm5, %v8599_v44, 0 }
 0x9a6   : > { %9701 = vmatpush3.bf16.msra.mxu1 %v10354_v39  ;;  %9696 = vmatprep.mubr.msk.bf16.mxu1 %vm307_vm2, %v7056_v25 }
 0x9a7   : > { %9702 = vmatprep.subr.bf16.mxu1 %v10355_v16 }
 0x9aa   : > { %9703 = vmatpush3.bf16.msra.mxu1 %v10355_v16  ;;  %v8595_v16 = vld [vmem:[%s12328_s5 + $0x1] sm:$0x1] }
 0x9ab   : > { %9712 = vmatprep.subr.bf16.mxu1 %v10356_v22 }
 0x9ad   : > { %9697 = vmatmul.mubr.msk.bf16.gmra.mrb[36].mxu1 %vm307_vm2, %v7057_v19 }
 0x9ae   : > { %9704 = vmatprep.mubr.msk.bf16.mxu1 %vm307_vm2, %v12012_v53  ;;  %v10359_v53 = vld [vmem:[%s12326_s3 + $0x238] sm:$0xff]  }
 0x9b5   : > { %9705 = vmatmul.mubr.msk.bf16.vlgmr.msra.gmra.mrb[32].mxu1 %vm307_vm2, %v12017_v45 }
 0x9b6   : > { %9713 = vmatpush3.bf16.msra.mxu1 %v10356_v22  ;;  %9708 = vmatprep.mubr.msk.bf16.mxu1 %vm307_vm2, %v12026_v29 }
 0x9b7   : > { %9714 = vmatprep.subr.bf16.mxu1 %v10357_v24 }
 0x9ba   : > { %9715 = vmatpush3.bf16.msra.mxu1 %v10357_v24 }
 0x9bb   : > { %9724 = vmatprep.subr.bf16.mxu1 %v10358_v42 }
 0x9bd   : > { %9709 = vmatmul.mubr.msk.bf16.gmra.mrb[36].mxu1 %vm307_vm2, %v7171_v49 }
 0x9be   : > { %9716 = vmatprep.mubr.msk.bf16.mxu1 %vm307_vm2, %v11976_v23  ;;  %v7399_v23 = vpack.c.bf16 %v11947_v14, %v7053_v51 }
 0x9c5   : > { %9717 = vmatmul.mubr.msk.bf16.vlgmr.msra.gmra.mrb[32].mxu1 %vm307_vm2, %v11992_v2  ;;  %v10361_v2 = vld [vmem:[%s12327_s4 + $0x18] sm:$0xff]  }
 0x9c6   : > { %9725 = vmatpush3.bf16.msra.mxu1 %v10358_v42  ;;  %9720 = vmatprep.mubr.msk.bf16.mxu1 %vm307_vm2, %v12002_v57 }
 0x9c7   : > { %9726 = vmatprep.subr.bf16.mxu1 %v10359_v53  ;;  %9739 = vmatpush3.bf16.msra.mxu0 %v10361_v2 }
 0x9c8   : > { %9744 = vmatprep.subr.bf16.mxu0 %v10379_v36 }
 0x9ca   : > { %9727 = vmatpush3.bf16.msra.mxu1 %v10359_v53  ;;  %v8600_v53 = vld [vmem:[%s12330_s7 + $0x1] sm:$0x1] }
 0x9cd   : > { %9721 = vmatmul.mubr.msk.bf16.gmra.mrb[36].mxu1 %vm307_vm2, %v7285_v11 }
 0x9ce   : > { %9728 = vmatprep.mubr.msk.bf16.mxu1 %vm307_vm2, %v12032_v60 }
 0x9d5   : > { %9729 = vmatmul.mubr.msk.bf16.vlgmr.msra.gmra.mrb[32].mxu1 %vm307_vm2, %v12037_v38 }
 0x9d6   : > { %9732 = vmatprep.mubr.msk.bf16.mxu1 %vm307_vm2, %v12046_v13 }
 0x9dd   : > { %9733 = vmatmul.mubr.msk.bf16.gmra.mrb[36].mxu1 %vm307_vm2, %v7399_v23 }
 0xaa8   : > { %v12124_v18 = vpop.f32.mrb[32].mxu1 }
 0xaa9   : > { %v12126_v57 = vpop.f32.mrb[33].mxu1  ;;  %v7505_v63 = vsel %vm307_vm2, %v12124_v18, 0.0 }
 0xaaa   : > { %v12128_v45 = vpop.f32.mrb[34].mxu1  ;;  %v7502_v46 = vsel %vm307_vm2, %v12126_v57, 0.0 }
 0xaab   : > { %v7466_v29 = vpop.f32.mrb[35].mxu1  ;;  %v7507_v60 = vsel %vm307_vm2, %v12128_v45, 0.0 }
 0xaac   : > { %v7503_v14 = vsel %vm307_vm2, %v7466_v29, 0.0 }
 0xaad   : > { %v7504_v1 = vadd.f32 %v7503_v14, %v7502_v46 }
 0xaaf   : > { %v7506_v40 = vadd.f32 %v7505_v63, %v7504_v1 }
 0xab0   : > { %v9734_v34 = vpop.f32.mrb[36].mxu1 }
 0xab1   : > { %v7479_v7 = vpop.f32.mrb[37].mxu1  ;;  %v7508_v38 = vadd.f32 %v7507_v60, %v7506_v40  ;;  %v7513_v0 = vsel %vm307_vm2, %v9734_v34, 0.0 }
 0xab2   : > { %v7509_v5 = vsel %vm307_vm2, %v7479_v7, 0.0  ;;  %v9735_v61 = vpop.f32.mrb[38].mxu1 }
 0xab3   : > { %v7510_v27 = vadd.f32 %v7509_v5, %v7508_v38  ;;  %v7482_v13 = vpop.f32.mrb[39].mxu1  ;;  %v7515_v21 = vsel %vm307_vm2, %v9735_v61, 0.0 }
 0xab4   : > { %v7511_v6 = vsel %vm307_vm2, %v7482_v13, 0.0 }
 0xab5   : > { %v7512_v32 = vadd.f32 %v7511_v6, %v7510_v27 }
 0xab7   : > { %v7514_v35 = vadd.f32 %v7513_v0, %v7512_v32 }
 0xab9   : > { %v7516_v17 = vadd.f32 %v7515_v21, %v7514_v35 }
 0xabb   : > { %v7517_v33 = vrot.slane %v7516_v17, 4 }
 0xabd   : > { %v7518_v4 = vadd.f32 %v7517_v33, %v7516_v17 }
 0xabf   : > { %v7519_v59 = vrot.slane %v7518_v4, 2 }
 0xac1   : > { %v7520_v8 = vadd.f32 %v7519_v59, %v7518_v4 }
 0xac3   : > { %v7521_v43 = vrot.slane %v7520_v8, 1 }
 0xac5   : > { %v7522_v39 = vadd.f32 %v7521_v43, %v7520_v8 }
 0xac7   : > { %v7523_v56 = vmul.f32 0.015625, %v7522_v39 }
 0xac9   : > { %v7524_v9 = vpack.c.bf16 %v7523_v56, %v7523_v56 }
 0xacb   : > { %9741 = vmatmul.mubr.msk.bf16.vlgmr.msra.gmra.mrb[32].mxu0 %vm307_vm2, %v7524_v9 }
 0xacc   : > { %9745 = vmatpush3.bf16.msra.mxu0 %v7597_v37  ;;  %9746 = vmatprep.mubr.msk.bf16.mxu0 %vm10380_vm4, %v10379_v36 }
 0xb9e   : > { %v7581_v25 = vpop.f32.mrb[32].mxu0 }
 0xb9f   : > { %v7582_v22 = vadd.f32 %v8595_v16, %v7581_v25  ;;  %v9742_v51 = vpop.f32.mrb[33].mxu0 }
 0xba0   : > { %v7584_v19 = vpop.f32.mrb[34].mxu0 }
 0xba1   : > { %v7587_v24 = vmax.f32 %v7582_v22, 0.0  ;;  %v9743_v42 = vpop.f32.mrb[35].mxu0 }
 0xba3   : > { %v7588_v49 = vpack.c.bf16 %v7587_v24, %v7587_v24 }
 0xba5   : > { %9747 = vmatmul.mubr.msk.bf16.vlgmr.msra.gmra.mrb[36].mxu0 %vm5376_vm6, %v7588_v49 }
 0xc78   : > { %v7633_v11 = vpop.f32.mrb[36].mxu0 }
 0xc79   : > { %v7634_v23 = vadd.f32 %v8600_v53, %v7633_v11  ;;  %v9748_v36 = vpop.f32.mrb[37].mxu0 }
 0xc7a   : > { %v7636_v2 = vpop.f32.mrb[38].mxu0 }
 0xc7b   : > { %v7639_v46 = vsub.f32 0.0, %v7634_v23  ;;  %v9749_v14 = vpop.f32.mrb[39].mxu0 }
 0xc7d   : > { %v7640_v1 = vmul.f32 1.442695, %v7639_v46 }
 0xc7f   : > { %10366 = vpow2.f32 %v7640_v1 }
 0xc89   : > { %v10367_v63 = vpop.eup %10366 }
 0xc8a   : > { %v7642_v40 = vadd.f32 1.0, %v10367_v63 }
 0xc8c   : > { %10368 = vrcp.f32 %v7642_v40 }
 0xc96   : > { %v10369_v60 = vpop.eup %10368 }
 0xc97   : > { %v7648_v38 = vrot.slane %v10369_v60, %v5432_v28 }
 0xc99   : > { %v7649_v5 = vmul.f32 %v7648_v38, %v12126_v57  ;;  %v7650_v27 = vmul.f32 %v7648_v38, %v7466_v29  ;;  %v7651_v6 = vmul.f32 %v12124_v18, %v7648_v38  ;;  %v7652_v32 = vmul.f32 %v12128_v45, %v7648_v38 }
 0xc9a   : > { %v7653_v0 = vmul.f32 %v7648_v38, %v7479_v7  ;;  %v7654_v35 = vmul.f32 %v7648_v38, %v7482_v13  ;;  %v7655_v21 = vmul.f32 %v9734_v34, %v7648_v38  ;;  %v7656_v17 = vmul.f32 %v9735_v61, %v7648_v38 }
 0xc9b   : > { %v12162_v54 = vadd.f32 %v7649_v5, %v5450_v15  ;;  %v12166_v28 = vadd.f32 %v7650_v27, %v5451_v58  ;;  %v12170_v57 = vadd.f32 %v7651_v6, %v5452_v12  ;;  %v12174_v18 = vadd.f32 %v7652_v32, %v5453_v47 }
 0xc9c   : > { %v12178_v45 = vadd.f32 %v7653_v0, %v5454_v26  ;;  %v12182_v10 = vadd.f32 %v7654_v35, %v5455_v50  ;;  %v12186_v41 = vadd.f32 %v7655_v21, %v5456_v62  ;;  %v12190_v55 = vadd.f32 %v7656_v17, %v5457_v30 }
 0xc9d   : > { %v7715_v48 = vrot.slane %v12162_v54, 2  ;;  %v7716_v15 = vrot.slane %v12166_v28, 1  ;;  %v7696_v3 = vrot.slane %v12162_v54, 1  ;;  %v7719_v58 = vrot.slane %v12174_v18, 7 }
 0xc9e   : > { %v7721_v31 = vrot.slane %v12178_v45, 6  ;;  %v7723_v12 = vrot.slane %v12182_v10, 5  ;;  %v7725_v20 = vrot.slane %v12186_v41, 4  ;;  %v7727_v52 = vrot.slane %v12190_v55, 3 }
 0xc9f   : > { %v7717_v47 = vsel %vm7674_vm7, %v7716_v15, %v7715_v48  ;;  %v7697_v26 = vsel %vm7674_vm7, %v12166_v28, %v7696_v3  ;;  %v7698_v50 = vrot.slane %v12170_v57, 7  ;;  %v7700_v30 = vrot.slane %v12174_v18, 6 }
 0xca0   : > { %v7718_v62 = vsel %vm7677_vm8, %v12170_v57, %v7717_v47  ;;  %v7702_v29 = vrot.slane %v12178_v45, 5  ;;  %v7704_v34 = vrot.slane %v12182_v10, 4  ;;  %v7706_v13 = vrot.slane %v12186_v41, 3 }
 0xca1   : > { %v7720_v7 = vsel %vm7680_vm9, %v7719_v58, %v7718_v62  ;;  %v7699_v61 = vsel %vm7677_vm8, %v7698_v50, %v7697_v26  ;;  %v7787_v33 = vrot.slane %v12162_v54, 6  ;;  %v7788_v8 = vrot.slane %v12166_v28, 5 }
 0xca2   : > { %v7722_v4 = vsel %vm7683_vm10, %v7721_v31, %v7720_v7  ;;  %v7701_v59 = vsel %vm7680_vm9, %v7700_v30, %v7699_v61  ;;  %v7790_v43 = vrot.slane %v12170_v57, 4  ;;  %v7708_v56 = vrot.slane %v12190_v55, 2 }
 0xca3   : > { %v7724_v39 = vsel %vm7686_vm11, %v7723_v12, %v7722_v4  ;;  %v7703_v44 = vsel %vm7683_vm10, %v7702_v29, %v7701_v59  ;;  %v7792_v9 = vrot.slane %v12174_v18, 3  ;;  %v7789_v25 = vsel %vm7674_vm7, %v7788_v8, %v7787_v33 }
 0xca4   : > { %v7726_v37 = vsel %vm7689_vm12, %v7725_v20, %v7724_v39  ;;  %v7705_v16 = vsel %vm7686_vm11, %v7704_v34, %v7703_v44  ;;  %v7794_v22 = vrot.slane %v12178_v45, 2  ;;  %v7791_v24 = vsel %vm7677_vm8, %v7790_v43, %v7789_v25 }
 0xca5   : > { %v7728_v51 = vsel %vm7692_vm13, %v7727_v52, %v7726_v37  ;;  %v7707_v19 = vsel %vm7689_vm12, %v7706_v13, %v7705_v16  ;;  %v7796_v42 = vrot.slane %v12182_v10, 1  ;;  %v7793_v53 = vsel %vm7680_vm9, %v7792_v9, %v7791_v24 }
 0xca6   : > { %7729 = vrot.lane.b32.xlu1 %v7728_v51, %s10381_s15  ;;  %v7709_v49 = vsel %vm7692_vm13, %v7708_v56, %v7707_v19  ;;  %v7769_v11 = vrot.slane %v12162_v54, 5  ;;  %v7770_v23 = vrot.slane %v12166_v28, 4  ;;  %v7795_v36 = vsel %vm7683_vm10, %v7794_v22, %v7793_v53 }
 0xca7   : > { %7710 = vrot.lane.b32.xlu0 %v7709_v49, %s10382_s16  ;;  %v7799_v2 = vrot.slane %v12190_v55, 7  ;;  %v7772_v46 = vrot.slane %v12170_v57, 3  ;;  %v7774_v14 = vrot.slane %v12174_v18, 2  ;;  %v7797_v1 = vsel %vm7686_vm11, %v7796_v42, %v7795_v36 }
 0xca8   : > { %v7771_v63 = vsel %vm7674_vm7, %v7770_v23, %v7769_v11  ;;  %v7776_v40 = vrot.slane %v12178_v45, 1  ;;  %v7779_v60 = vrot.slane %v12186_v41, 7  ;;  %v7798_v38 = vsel %vm7689_vm12, %v12186_v41, %v7797_v1 }
 0xca9   : > { %v7773_v5 = vsel %vm7677_vm8, %v7772_v46, %v7771_v63  ;;  %v7805_v27 = vrot.slane %v12162_v54, 7  ;;  %v7806_v6 = vrot.slane %v12166_v28, 6  ;;  %v7800_v32 = vsel %vm7692_vm13, %v7799_v2, %v7798_v38 }
 0xcaa   : > { %v7775_v0 = vsel %vm7680_vm9, %v7774_v14, %v7773_v5  ;;  %v7781_v35 = vrot.slane %v12190_v55, 6  ;;  %v7808_v21 = vrot.slane %v12170_v57, 5  ;;  %7801 = vrot.lane.b32.xlu1 %v7800_v32, %s10381_s15  ;;  %v7810_v15 = vrot.slane %v12174_v18, 4 }
 0xcab   : > { %v7777_v17 = vsel %vm7683_vm10, %v7776_v40, %v7775_v0  ;;  %v7807_v48 = vsel %vm7674_vm7, %v7806_v6, %v7805_v27  ;;  %v7812_v3 = vrot.slane %v12178_v45, 3  ;;  %v7814_v12 = vrot.slane %v12182_v10, 2 }
 0xcac   : > { %v7778_v58 = vsel %vm7686_vm11, %v12182_v10, %v7777_v17  ;;  %v7809_v31 = vsel %vm7677_vm8, %v7808_v21, %v7807_v48  ;;  %v7734_v20 = vrot.slane %v12162_v54, 3  ;;  %v7735_v26 = vrot.slane %v12166_v28, 2 }
 0xcad   : > { %v7780_v47 = vsel %vm7689_vm12, %v7779_v60, %v7778_v58  ;;  %v7811_v52 = vsel %vm7680_vm9, %v7810_v15, %v7809_v31  ;;  %v7737_v50 = vrot.slane %v12170_v57, 1  ;;  %v7816_v29 = vrot.slane %v12186_v41, 1 }
 0xcae   : > { %v7782_v62 = vsel %vm7692_vm13, %v7781_v35, %v7780_v47  ;;  %v7813_v30 = vsel %vm7683_vm10, %v7812_v3, %v7811_v52  ;;  %v7736_v7 = vsel %vm7674_vm7, %v7735_v26, %v7734_v20  ;;  %v7740_v61 = vrot.slane %v12178_v45, 7 }
 0xcaf   : > { %7783 = vrot.lane.b32.xlu0 %v7782_v62, %s10382_s16  ;;  %v7815_v34 = vsel %vm7686_vm11, %v7814_v12, %v7813_v30  ;;  %v7738_v33 = vsel %vm7677_vm8, %v7737_v50, %v7736_v7  ;;  %v7673_v4 = vrot.slane %v12166_v28, 7  ;;  %v7676_v59 = vrot.slane %v12170_v57, 6 }
 0xcb0   : > { %v7817_v13 = vsel %vm7689_vm12, %v7816_v29, %v7815_v34  ;;  %v7739_v43 = vsel %vm7680_vm9, %v12174_v18, %v7738_v33  ;;  %v7742_v39 = vrot.slane %v12182_v10, 6  ;;  %v7744_v44 = vrot.slane %v12186_v41, 5 }
 0xcb1   : > { %v7818_v8 = vsel %vm7692_vm13, %v12190_v55, %v7817_v13  ;;  %v7741_v56 = vsel %vm7683_vm10, %v7740_v61, %v7739_v43  ;;  %v7746_v9 = vrot.slane %v12190_v55, 4  ;;  %v7679_v37 = vrot.slane %v12174_v18, 5 }
 0xcb2   : > { %7819 = vrot.lane.b32.xlu1 %v7818_v8, %s10383_s17  ;;  %v7682_v16 = vrot.slane %v12178_v45, 4  ;;  %v7743_v25 = vsel %vm7686_vm11, %v7742_v39, %v7741_v56  ;;  %v7675_v22 = vsel %vm7674_vm7, %v7673_v4, %v12162_v54  ;;  %v7753_v51 = vrot.slane %v12162_v54, 4 }
 0xcb3   : > { %v7754_v19 = vrot.slane %v12166_v28, 3  ;;  %v7745_v24 = vsel %vm7689_vm12, %v7744_v44, %v7743_v25  ;;  %v7685_v42 = vrot.slane %v12182_v10, 3  ;;  %v7678_v49 = vsel %vm7677_vm8, %v7676_v59, %v7675_v22 }
 0xcb4   : > { %v7756_v53 = vrot.slane %v12170_v57, 2  ;;  %v7747_v11 = vsel %vm7692_vm13, %v7746_v9, %v7745_v24  ;;  %v7681_v23 = vsel %vm7680_vm9, %v7679_v37, %v7678_v49  ;;  %v7758_v2 = vrot.slane %v12174_v18, 1 }
 0xcb5   : > { %v7755_v36 = vsel %vm7674_vm7, %v7754_v19, %v7753_v51  ;;  %7748 = vrot.lane.b32.xlu0 %v7747_v11, %s10383_s17  ;;  %v7688_v54 = vrot.slane %v12186_v41, 2  ;;  %v7684_v28 = vsel %vm7683_vm10, %v7682_v16, %v7681_v23  ;;  %v7691_v57 = vrot.slane %v12190_v55, 1 }
 0xcb6   : > { %v7757_v46 = vsel %vm7677_vm8, %v7756_v53, %v7755_v36  ;;  %v7687_v14 = vsel %vm7686_vm11, %v7685_v42, %v7684_v28  ;;  %v7761_v63 = vrot.slane %v12182_v10, 7  ;;  %v7763_v60 = vrot.slane %v12186_v41, 6 }
 0xcb7   : > { %v7759_v1 = vsel %vm7680_vm9, %v7758_v2, %v7757_v46  ;;  %v7690_v18 = vsel %vm7689_vm12, %v7688_v54, %v7687_v14  ;;  %v7765_v27 = vrot.slane %v12190_v55, 5 }
 0xcb8   : > { %v7760_v40 = vsel %vm7683_vm10, %v12178_v45, %v7759_v1  ;;  %v7693_v38 = vsel %vm7692_vm13, %v7691_v57, %v7690_v18 }
 0xcb9   : > { %v7762_v5 = vsel %vm7686_vm11, %v7761_v63, %v7760_v40  ;;  %7695 = vst.msk [vmem:[%s305_s20] sm:$0xff] %vm307_vm2, %v7693_v38 }
 0xcba   : > { %v7764_v6 = vsel %vm7689_vm12, %v7763_v60, %v7762_v5 }
 0xcbb   : > { %v7766_v32 = vsel %vm7692_vm13, %v7765_v27, %v7764_v6 }
 0xcbc   : > { %7768 = vst.msk [vmem:[%s305_s20 + $0x8] sm:$0xff] %vm307_vm2, %v7766_v32 }
 0xd18   : > { %v7730_v10 = vpop.permute.xlu1 %7729 }
 0xd19   : > { %v7711_v45 = vpop.permute.xlu0 %7710 }
 0xd1a   : > { %7714 = vst.msk [vmem:[%s305_s20] sm:$0xff] %vm7713_vm14, %v7711_v45 }
 0xd1b   : > { %7733 = vst.msk [vmem:[%s305_s20] sm:$0xff] %vm7732_vm15, %v7730_v10 }
 0xd1c   : > { %v7802_v41 = vpop.permute.xlu1 %7801 }
 0xd21   : > { %v7784_v0 = vpop.permute.xlu0 %7783 }
 0xd22   : > { %7786 = vst.msk [vmem:[%s305_s20 + $0x8] sm:$0xff] %vm7713_vm14, %v7784_v0 }
 0xd23   : > { %7804 = vst.msk [vmem:[%s305_s20 + $0x8] sm:$0xff] %vm7732_vm15, %v7802_v41 }
 0xd24   : > { %v7820_v55 = vpop.permute.xlu1 %7819 }
 0xd25   : > { %7822 = vst.msk [vmem:[%s305_s20 + $0x8] sm:$0xff] %vm7751_vm0, %v7820_v55 }
 0xd27   : > { %v7749_v35 = vpop.permute.xlu0 %7748 }
 0xd28   : > { %7752 = vst.msk [vmem:[%s305_s20] sm:$0xff] %vm7751_vm0, %v7749_v35 }
 0xd29 PF: > { %s18_s27 = sadd.s32 1, %s10376_s27  }
 0xd2a   : > { %p15_p4 = scmp.ge.s32.totalorder %s18_s27, 4  }
 0xd2c   :  { %17 = sbr.rel (!%p15_p4) target bundleno = 1 (0x1), region = 182 }

</bundles_post_ra>
